<compile_context>
chip_gen: v5e
topology: v5e:2x2
jax: 0.10.0
libtpu: 0.0.40
codegen_flags: <defaults>
</compile_context>

<pallas_src>
import jax
import jax.numpy as jnp
from jax.experimental import pallas as pl
from jax.experimental.pallas import tpu as pltpu

C_IN, C_FEAT = 4, 8
KSIZE, PAD = 3, 1
ALPHA = 25.0          # QATM temperature
EPS = 1e-6
LANE = 128

# Boundedness guard: features are unit-L2 per position, so |score| <= ALPHA and
# exp(score), exp(2*score)/n stay finite in f32 only while ALPHA <= ~40.
assert ALPHA <= 40.0, "ALPHA too large for the un-shifted softmax formulation"


# --------------------------------------------------------------------------
# small helpers
# --------------------------------------------------------------------------
def _cdiv(a, b):
    return -(-a // b)


def _round_up(x, m):
    return _cdiv(x, m) * m


def _next_pow2(x):
    return 1 if x <= 1 else 1 << (x - 1).bit_length()


def _pow2_floor(x):
    x = max(int(x), 1)
    return 1 << (x.bit_length() - 1)


def _vmem_bytes():
    try:
        return int(pltpu.get_tpu_info().vmem_capacity_bytes)
    except Exception:  # fall back to the smallest generation (v7x: 64 MiB/TC)
        return 64 << 20


def _vmem_limit_bytes():
    return int(min(_vmem_bytes() * 3 // 4, 96 << 20))


def _pick_qatm_tile(T):
    """Lane-multiple (power-of-two) HW tile for the QATM passes, sized from the
    per-generation VMEM budget (~4 live (T, TILE) f32 temporaries)."""
    vmem = _vmem_bytes()
    cap = 8192 if vmem >= (96 << 20) else 4096          # v5e/v6e vs v7x
    budget = (_vmem_limit_bytes() * 3) // 5
    per_col = max(T, 8) * 4 * 4 + C_FEAT * 2 * 3 + 16
    cols = max(LANE, budget // per_col)
    return max(LANE, min(cap, _pow2_floor(cols)))


def _feat_geometry(H, W, qatm_tile=None):
    """Flat, lane-aligned geometry of the conv / feature layout.

    Features live as (N, C, HWC) with flat index j = h*Wq + w, Wq a power of
    two >= 128 (so kh*Wq slice offsets are lane-aligned and j%Wq is a bitwise
    AND).  The conv is row-tiled in chunks of TH rows; TH is chosen so that the
    output width n_rt*TH*Wq is a multiple of 2*qatm_tile (no ragged QATM tiles,
    no padding copy of the feature map)."""
    Wq = _next_pow2(max(W + 2 * PAD, LANE))
    unit = 1 if qatm_tile is None else max(1, (2 * qatm_tile) // Wq)
    budget = _vmem_limit_bytes() // 2
    th = max(1, max(Wq, budget // 128) // Wq)           # ~120 B per output col
    th = max(unit, (th // unit) * unit)
    th = min(th, _round_up(H, unit))
    n_rt = _cdiv(H, th)
    return dict(Wq=Wq, TH=th, n_rt=n_rt, HWC=n_rt * th * Wq,
                hw_valid=H * Wq, H=H, W=W)


# --------------------------------------------------------------------------
# Pallas kernel 1: Conv2d(C_IN -> C_FEAT, 3x3, pad=1) + ReLU + per-position
# L2 normalization, lane-dense flat output (N, C_FEAT, HWC) bf16.
# --------------------------------------------------------------------------
def conv3x3_relu_norm(x, weight, bias, geom):
    N, C, H, W = x.shape
    Wq, TH, n_rt, HWC = geom["Wq"], geom["TH"], geom["n_rt"], geom["HWC"]
    slab_w = (TH + 2 * PAD) * Wq
    out_w = TH * Wq
    rows_in = n_rt * TH + 2 * PAD

    # host prep on the small raw input:
    #   spatial zero pad -> power-of-two row stride Wq -> kw-fold (3x channels)
    #   -> per-row-tile slabs with a 2-row halo (non-overlapping BlockSpec blocks)
    xp = jnp.pad(x, ((0, 0), (0, 0),
                     (PAD, rows_in - H - PAD), (PAD, Wq - W - PAD)))
    xk = jnp.concatenate(
        [jnp.pad(xp[:, :, :, kw:], ((0, 0), (0, 0), (0, 0), (0, kw)))
         for kw in range(KSIZE)], axis=1)                        # (N, 3C, rows_in, Wq)
    slabs = jnp.stack(
        [xk[:, :, r * TH:r * TH + TH + 2 * PAD, :] for r in range(n_rt)], axis=1)
    slabs = slabs.reshape(N, n_rt, KSIZE * C, slab_w).astype(jnp.bfloat16)

    # weight[o, c, kh, kw] -> wk[kh, o, kw*C + c]
    wk = jnp.swapaxes(
        weight.transpose(2, 3, 1, 0).reshape(KSIZE, KSIZE * C, C_FEAT), 1, 2)
    wk = wk.astype(jnp.bfloat16)                                 # (3, C_FEAT, 3C)
    b2 = bias.reshape(C_FEAT, 1).astype(jnp.float32)

    def kernel(x_ref, w_ref, b_ref, o_ref):
        # three lane-aligned slices (offsets kh*Wq, multiples of 128), K = 3*C
        acc = jnp.dot(w_ref[0], x_ref[0, 0, :, 0:out_w],
                      preferred_element_type=jnp.float32)
        for kh in range(1, KSIZE):
            acc = acc + jnp.dot(w_ref[kh],
                                x_ref[0, 0, :, kh * Wq:kh * Wq + out_w],
                                preferred_element_type=jnp.float32)
        acc = jnp.maximum(acc + b_ref[...], 0.0)                 # bias + ReLU
        # fused per-position L2 normalization (EUP rsqrt); invalid columns stay
        # column-local garbage and are masked by every downstream consumer.
        inv = jax.lax.rsqrt(jnp.sum(acc * acc, axis=0, keepdims=True) + EPS)
        o_ref[0] = (acc * inv).astype(o_ref.dtype)

    return pl.pallas_call(
        kernel,
        out_shape=jax.ShapeDtypeStruct((N, C_FEAT, HWC), jnp.bfloat16),
        grid=(N, n_rt),
        in_specs=[pl.BlockSpec((1, 1, KSIZE * C, slab_w), lambda n, r: (n, r, 0, 0)),
                  pl.BlockSpec((KSIZE, C_FEAT, KSIZE * C), lambda n, r: (0, 0, 0)),
                  pl.BlockSpec((C_FEAT, 1), lambda n, r: (0, 0))],
        out_specs=pl.BlockSpec((1, C_FEAT, out_w), lambda n, r: (n, 0, r)),
        compiler_params=pltpu.CompilerParams(
            dimension_semantics=("parallel", "parallel"),
            vmem_limit_bytes=_vmem_limit_bytes()),
    )(slabs, wk, b2)


# --------------------------------------------------------------------------
# Pallas kernels 2+3: QATM matching, tiled over HW, two passes
#   pass 1: Z[t] = sum over valid image positions of exp(score[t, s])
#   pass 2: response[s] = max_t softmax_t(score) * softmax_s(score)
# Scores are bounded by ALPHA (unit-L2 operands) so no max-shift is required.
# --------------------------------------------------------------------------
def qatm_response(f_img, tt, geom, tile):
    B, C, HWC = f_img.shape
    T = tt.shape[0]
    n_tiles = HWC // tile
    assert n_tiles * tile == HWC and n_tiles % 2 == 0
    n_half = n_tiles // 2
    Wq, hw_valid, W = geom["Wq"], geom["hw_valid"], geom["W"]
    limit = _vmem_limit_bytes()

    def _valid_cols(col_start):
        jj = col_start + jax.lax.broadcasted_iota(jnp.int32, (1, tile), 1)
        return (jj < hw_valid) & ((jj & (Wq - 1)) < W)           # (1, tile) bool

    def stats_kernel(tt_ref, f_ref, z_ref):
        @pl.when(pl.program_id(2) == 0)
        def _():
            z_ref[...] = jnp.zeros_like(z_ref)
        a = jnp.dot(tt_ref[...], f_ref[0],
                    preferred_element_type=jnp.float32)          # (T, tile), |a|<=ALPHA
        start = (pl.program_id(0) * n_half + pl.program_id(2)) * tile
        p = jnp.where(_valid_cols(start), jnp.exp(a), 0.0)
        z_ref[0, 0] = z_ref[0, 0] + jnp.sum(p, axis=1, keepdims=True)

    def out_kernel(tt_ref, z_ref, f_ref, o_ref):
        a = jnp.dot(tt_ref[...], f_ref[0],
                    preferred_element_type=jnp.float32)          # (T, tile)
        p = jnp.exp(a)                                           # single big exp (EUP)
        # softmax over template positions (column-local)
        lt = p * pl.reciprocal(jnp.sum(p, axis=0, keepdims=True), approx=True)
        # softmax over image positions (global denominator from pass 1)
        ls = p * pl.reciprocal(z_ref[0], approx=True)
        resp = jnp.max(lt * ls, axis=0, keepdims=True)           # (1, tile)
        o_ref[0] = jnp.where(_valid_cols(pl.program_id(1) * tile), resp, 0.0)

    # ---- pass 1: core-split (leading size-2 parallel axis) partial sums ----
    z_pair = pl.pallas_call(
        stats_kernel,
        out_shape=jax.ShapeDtypeStruct((B, 2, T, 1), jnp.float32),
        grid=(2, B, n_half),
        in_specs=[pl.BlockSpec((T, C), lambda c, b, t: (0, 0)),
                  pl.BlockSpec((1, C, tile), lambda c, b, t: (b, 0, c * n_half + t))],
        out_specs=pl.BlockSpec((1, 1, T, 1), lambda c, b, t: (b, c, 0, 0)),
        compiler_params=pltpu.CompilerParams(
            dimension_semantics=("parallel", "parallel", "arbitrary"),
            vmem_limit_bytes=limit),
    )(tt, f_img)
    z = jnp.sum(z_pair, axis=1)                                  # (B, T, 1)

    # ---- pass 2: per-tile response ----
    out = pl.pallas_call(
        out_kernel,
        out_shape=jax.ShapeDtypeStruct((B, 1, HWC), jnp.float32),
        grid=(B, n_tiles),
        in_specs=[pl.BlockSpec((T, C), lambda b, t: (0, 0)),
                  pl.BlockSpec((1, T, 1), lambda b, t: (b, 0, 0)),
                  pl.BlockSpec((1, C, tile), lambda b, t: (b, 0, t))],
        out_specs=pl.BlockSpec((1, 1, tile), lambda b, t: (b, 0, t)),
        compiler_params=pltpu.CompilerParams(
            dimension_semantics=("parallel", "parallel"),
            vmem_limit_bytes=limit),
    )(tt, z, f_img)
    return out.reshape(B, HWC)


def _template_features(f_t, geom_t, Ht, Wt):
    """(1, C_FEAT, HWC_t) conv features (already unit-L2 per position) ->
    (T, C_FEAT) bf16 with ALPHA folded in.  Tiny host-side gather."""
    Wq = geom_t["Wq"]
    n_rows = geom_t["HWC"] // Wq
    ft = f_t[0].astype(jnp.float32).reshape(C_FEAT, n_rows, Wq)[:, :Ht, :Wt]
    tt = ft.reshape(C_FEAT, Ht * Wt).T * ALPHA
    return tt.astype(jnp.bfloat16)


def _unflatten_response(resp_flat, geom):
    Wq, H, W = geom["Wq"], geom["H"], geom["W"]
    B, HWC = resp_flat.shape
    return resp_flat.reshape(B, HWC // Wq, Wq)[:, :H, :W]        # (B, H, W)


# --------------------------------------------------------------------------
# Concrete BaseTemplateMatcher (mirrors forward / forward_test / simple_test)
# --------------------------------------------------------------------------
class BaseTemplateMatcherPallas:
    def __init__(self):
        k1, k2 = jax.random.split(jax.random.PRNGKey(42))
        # deterministic synthetic Conv2d(C_IN -> C_FEAT, 3, padding=1) params
        self.conv_w = jax.random.normal(k1, (C_FEAT, C_IN, KSIZE, KSIZE), jnp.float32) * 0.1
        self.conv_b = jax.random.normal(k2, (C_FEAT,), jnp.float32) * 0.01

    def extract_feat(self, img, qatm_tile=None):
        N, C, H, W = img.shape
        geom = _feat_geometry(H, W, qatm_tile)
        return conv3x3_relu_norm(img, self.conv_w, self.conv_b, geom), geom

    def extract_feats(self, imgs):
        assert isinstance(imgs, list)
        for img in imgs:
            yield self.extract_feat(img)[0]

    def simple_test(self, img, img_meta, template=None, **kwargs):
        B, _, H, W = img.shape
        _, _, Ht, Wt = template.shape
        tile = _pick_qatm_tile(Ht * Wt)
        f_img, geom = self.extract_feat(img, qatm_tile=tile)     # (B, C, HWC) bf16
        f_t, geom_t = self.extract_feat(template)                # (1, C, HWC_t) bf16
        tt = _template_features(f_t, geom_t, Ht, Wt)             # (T, C) bf16, ALPHA folded
        resp = qatm_response(f_img, tt, geom, tile)              # (B, HWC) f32
        return _unflatten_response(resp, geom)                   # (B, H, W) f32

    def forward_test(self, imgs, img_metas, **kwargs):
        for var, name in [(imgs, 'imgs'), (img_metas, 'img_metas')]:
            if not isinstance(var, list):
                raise TypeError('{} must be a list, but got {}'.format(name, type(var)))
        num_augs = len(imgs)
        if num_augs != len(img_metas):
            raise ValueError('num of augmentations ({}) != num of image meta ({})'.format(
                len(imgs), len(img_metas)))
        imgs_per_gpu = imgs[0].shape[0]
        assert imgs_per_gpu == 1
        if num_augs == 1:
            return self.simple_test(imgs[0], img_metas[0], **kwargs)
        # TODO(synk): aug_test (multi-augmentation fusion) is not defined in the reference class.
        raise NotImplementedError

    def forward(self, img, img_meta, return_loss=False, **kwargs):
        if return_loss:
            # TODO(synk): forward_train is abstract in BaseTemplateMatcher; no compute to translate.
            raise NotImplementedError
        return self.forward_test(img, img_meta, **kwargs)


if __name__ == "__main__":
    key = jax.random.PRNGKey(0)
    k_img, k_tpl = jax.random.split(key)
    # batch must be 1 per forward_test's assertion; single test-time augmentation
    img = jax.random.normal(k_img, (1, C_IN, 16, 16), jnp.float32)
    template = jax.random.normal(k_tpl, (1, C_IN, 8, 8), jnp.float32)
    img_metas = [[{'img_shape': (16, 16, C_IN), 'scale_factor': 1.0, 'flip': False}]]

    matcher = BaseTemplateMatcherPallas()
    resp = matcher.forward([img], img_metas, return_loss=False, template=template)
    resp = jax.block_until_ready(resp)
    assert resp.shape == (1, 16, 16) and resp.dtype == jnp.float32
    assert bool(jnp.all(jnp.isfinite(resp)))
    print("KERNEL_OK")
</pallas_src>

<mosaic_0001>
module attributes {stable_mosaic.version = 11 : i64} {
  func.func @kernel(%arg0: i32, %arg1: i32, %arg2: memref<1x1x12x8448xbf16, #tpu.memory_space<vmem>>, %arg3: memref<3x8x12xbf16, #tpu.memory_space<vmem>>, %arg4: memref<8x1xf32, #tpu.memory_space<vmem>>, %arg5: memref<1x8x8192xbf16, #tpu.memory_space<vmem>>) attributes {dimension_semantics = [#tpu.dimension_semantics<parallel>, #tpu.dimension_semantics<parallel>], iteration_bounds = array<i64: 1, 1>, scalar_prefetch = 0 : i64, scratch_operands = 0 : i64, tpu.core_type = #tpu.core_type<tc>, window_params = [{transform_indices = @transform_0, window_bounds = array<i64: 1, 1, 12, 8448>}, {pipeline_mode = #tpu.pipeline_mode<synchronous>, transform_indices = @transform_1, window_bounds = array<i64: 3, 8, 12>}, {pipeline_mode = #tpu.pipeline_mode<synchronous>, transform_indices = @transform_2, window_bounds = array<i64: 8, 1>}, {transform_indices = @transform_3, window_bounds = array<i64: 1, 8, 8192>}]} {
    %c0 = arith.constant 0 : index
    %c0_0 = arith.constant 0 : index
    %c0_1 = arith.constant 0 : index
    %0 = vector.load %arg3[%c0, %c0_0, %c0_1] : memref<3x8x12xbf16, #tpu.memory_space<vmem>>, vector<1x8x12xbf16>
    %1 = vector.shape_cast %0 : vector<1x8x12xbf16> to vector<8x12xbf16>
    %c0_2 = arith.constant 0 : index
    %c0_3 = arith.constant 0 : index
    %c0_4 = arith.constant 0 : index
    %c0_5 = arith.constant 0 : index
    %2 = vector.load %arg2[%c0_2, %c0_3, %c0_4, %c0_5] : memref<1x1x12x8448xbf16, #tpu.memory_space<vmem>>, vector<1x1x12x8192xbf16>
    %3 = vector.shape_cast %2 : vector<1x1x12x8192xbf16> to vector<12x8192xbf16>
    %cst = arith.constant dense<0.000000e+00> : vector<8x8192xf32>
    %4 = tpu.matmul %1, %3, %cst {dimension_numbers = #tpu.dot_dimension_numbers<[1], [0], [0], [1], [0, 0, 1, 1], [], []>} : vector<8x12xbf16>, vector<12x8192xbf16>, vector<8x8192xf32> -> vector<8x8192xf32>
    %c1 = arith.constant 1 : index
    %c0_6 = arith.constant 0 : index
    %c0_7 = arith.constant 0 : index
    %5 = vector.load %arg3[%c1, %c0_6, %c0_7] : memref<3x8x12xbf16, #tpu.memory_space<vmem>>, vector<1x8x12xbf16>
    %6 = vector.shape_cast %5 : vector<1x8x12xbf16> to vector<8x12xbf16>
    %c0_8 = arith.constant 0 : index
    %c0_9 = arith.constant 0 : index
    %c0_10 = arith.constant 0 : index
    %c128 = arith.constant 128 : index
    %7 = vector.load %arg2[%c0_8, %c0_9, %c0_10, %c128] : memref<1x1x12x8448xbf16, #tpu.memory_space<vmem>>, vector<1x1x12x8192xbf16>
    %8 = vector.shape_cast %7 : vector<1x1x12x8192xbf16> to vector<12x8192xbf16>
    %cst_11 = arith.constant dense<0.000000e+00> : vector<8x8192xf32>
    %9 = tpu.matmul %6, %8, %cst_11 {dimension_numbers = #tpu.dot_dimension_numbers<[1], [0], [0], [1], [0, 0, 1, 1], [], []>} : vector<8x12xbf16>, vector<12x8192xbf16>, vector<8x8192xf32> -> vector<8x8192xf32>
    %10 = arith.addf %4, %9 : vector<8x8192xf32>
    %c2 = arith.constant 2 : index
    %c0_12 = arith.constant 0 : index
    %c0_13 = arith.constant 0 : index
    %11 = vector.load %arg3[%c2, %c0_12, %c0_13] : memref<3x8x12xbf16, #tpu.memory_space<vmem>>, vector<1x8x12xbf16>
    %12 = vector.shape_cast %11 : vector<1x8x12xbf16> to vector<8x12xbf16>
    %c0_14 = arith.constant 0 : index
    %c0_15 = arith.constant 0 : index
    %c0_16 = arith.constant 0 : index
    %c256 = arith.constant 256 : index
    %13 = vector.load %arg2[%c0_14, %c0_15, %c0_16, %c256] : memref<1x1x12x8448xbf16, #tpu.memory_space<vmem>>, vector<1x1x12x8192xbf16>
    %14 = vector.shape_cast %13 : vector<1x1x12x8192xbf16> to vector<12x8192xbf16>
    %cst_17 = arith.constant dense<0.000000e+00> : vector<8x8192xf32>
    %15 = tpu.matmul %12, %14, %cst_17 {dimension_numbers = #tpu.dot_dimension_numbers<[1], [0], [0], [1], [0, 0, 1, 1], [], []>} : vector<8x12xbf16>, vector<12x8192xbf16>, vector<8x8192xf32> -> vector<8x8192xf32>
    %16 = arith.addf %10, %15 : vector<8x8192xf32>
    %c0_18 = arith.constant 0 : index
    %c0_19 = arith.constant 0 : index
    %17 = vector.load %arg4[%c0_18, %c0_19] : memref<8x1xf32, #tpu.memory_space<vmem>>, vector<8x1xf32>
    %18 = vector.broadcast %17 : vector<8x1xf32> to vector<8x8192xf32>
    %19 = arith.addf %16, %18 : vector<8x8192xf32>
    %cst_20 = arith.constant 0.000000e+00 : f32
    %20 = vector.broadcast %cst_20 : f32 to vector<8x8192xf32>
    %21 = arith.maximumf %19, %20 : vector<8x8192xf32>
    %22 = arith.mulf %21, %21 : vector<8x8192xf32>
    %cst_21 = arith.constant dense<0.000000e+00> : vector<8192xf32>
    %23 = vector.multi_reduction <add>, %22, %cst_21 [0] : vector<8x8192xf32> to vector<8192xf32>
    %24 = vector.shape_cast %23 : vector<8192xf32> to vector<1x8192xf32>
    %cst_22 = arith.constant 9.99999997E-7 : f32
    %25 = vector.broadcast %cst_22 : f32 to vector<1x8192xf32>
    %26 = arith.addf %24, %25 : vector<1x8192xf32>
    %27 = math.rsqrt %26 : vector<1x8192xf32>
    %28 = vector.broadcast %27 : vector<1x8192xf32> to vector<8x8192xf32>
    %29 = arith.mulf %21, %28 : vector<8x8192xf32>
    %30 = arith.truncf %29 : vector<8x8192xf32> to vector<8x8192xbf16>
    %c0_23 = arith.constant 0 : index
    %c0_24 = arith.constant 0 : index
    %c0_25 = arith.constant 0 : index
    %31 = vector.load %arg5[%c0_23, %c0_24, %c0_25] : memref<1x8x8192xbf16, #tpu.memory_space<vmem>>, vector<1x8x8192xbf16>
    %32 = vector.shape_cast %31 : vector<1x8x8192xbf16> to vector<8x8192xbf16>
    %33 = vector.shape_cast %30 : vector<8x8192xbf16> to vector<1x8x8192xbf16>
    tpu.vector_store %arg5[%c0_23, %c0_24, %c0_25], %33 {strides = array<i32>} : memref<1x8x8192xbf16, #tpu.memory_space<vmem>>, vector<1x8x8192xbf16>,
    return
  }
  func.func @transform_0(%arg0: i32, %arg1: i32) -> (i32, i32, i32, i32) {
    %c0_i32 = arith.constant 0 : i32
    %c0_i32_0 = arith.constant 0 : i32
    %c0_i32_1 = arith.constant 0 : i32
    return %arg0, %arg1, %c0_i32, %c0_i32_0 : i32, i32, i32, i32
  }
  func.func @transform_1(%arg0: i32, %arg1: i32) -> (i32, i32, i32) {
    %c0_i32 = arith.constant 0 : i32
    %c0_i32_0 = arith.constant 0 : i32
    %c0_i32_1 = arith.constant 0 : i32
    %c0_i32_2 = arith.constant 0 : i32
    return %c0_i32, %c0_i32_0, %c0_i32_1 : i32, i32, i32
  }
  func.func @transform_2(%arg0: i32, %arg1: i32) -> (i32, i32) {
    %c0_i32 = arith.constant 0 : i32
    %c0_i32_0 = arith.constant 0 : i32
    %c0_i32_1 = arith.constant 0 : i32
    return %c0_i32, %c0_i32_0 : i32, i32
  }
  func.func @transform_3(%arg0: i32, %arg1: i32) -> (i32, i32, i32) {
    %c0_i32 = arith.constant 0 : i32
    %c0_i32_0 = arith.constant 0 : i32
    return %arg0, %c0_i32, %arg1 : i32, i32, i32
  }
}

</mosaic_0001>

<bundles_post_ra>
// kernel: tpu_custom_call.1
= control target key start
LH: loop header
LB: loop body
LE: loop exit
PB: predicated region body
PF: predicated region fallthrough
CT: control target
= control target key end

     0   :  { %8 = vsyncpa [#allocation3], 0  ;;  %s9531_s0 = inlined_call_operand.hbm [shape: bf16[1,1,12,8448], index: 0, kind: input, shape index: {}]   ;;  %s9532_s1 = inlined_call_operand.hbm [shape: bf16[3,8,12], index: 1, kind: input, shape index: {}]   ;;  %s9533_s2 = inlined_call_operand.vmem [shape: f32[8,1], index: 2, kind: input, shape index: {}]   ;;  %s9534_s3 = inlined_call_operand.hbm [shape: bf16[1,8,8192], index: 3, kind: output, shape index: {}]  }
   0x1   :  { %9 = vsyncpa [#allocation6], 0 }
   0x2   :  { %10 = vsyncpa [#allocation4], 0  ;;  %s15_s14 = sshll.u32 %s9531_s0, 4  ;;  %s6961_s15 = smov [#allocation2]   ;;  %s16_s14 = int_to_ptr.hbm [resolvable:$true] %s15_s14 }
   0x3   :  { %s17_s16 = sshll.u32 %s6961_s15, 4  ;;  %s28_s19 = sshll.u32 %s9532_s1, 4  ;;  %s18_s16 = int_to_ptr.vmem [resolvable:$true] %s17_s16  ;;  %s29_s19 = int_to_ptr.hbm [resolvable:$true] %s28_s19 }
   0x4   :  { %s6962_s20 = smov 4224   ;;  %s6963_s21 = smov 264  }
   0x5   :  { %23 = dma.hbm_to_vmem [thread:$0]  %s16_s14, 8448, %s18_s16, [#allocation3], %s6962_s20, %s6962_s20, %s6963_s21  }
   0x6   :  { %s6964_s22 = smov [#allocation5]   ;;  %s6965_s24 = smov 64  }
   0x7   :  { %s30_s23 = sshll.u32 %s6964_s22, 4  ;;  %s6966_s25 = smov 4   ;;  %s31_s23 = int_to_ptr.vmem [resolvable:$true] %s30_s23 }
   0x8   :  { %36 = dma.hbm_to_vmem [thread:$0]  %s29_s19, 192, %s31_s23, [#allocation6], %s6965_s24, %s6965_s24, %s6966_s25  }
   0x9   :  { %6955 = dma.done.wait [#allocation3], 8448  }
   0xa   :  { %6956 = vsyncadd [#allocation3], 4294958848 }
   0xb   :  { %6957 = dma.done.wait [#allocation6], 192  }
   0xc   :  { %6958 = vsyncadd [#allocation6], 4294967104  ;;  %vm439_vm0 = vcmask 1045504   ;;  %v5594_v0 = vld [vmem:[#allocation2 + $0x4] sm:$0xf]  ;;  %vm435_vm1 = vcmask 97280  }
   0xd   :  { %v6648_v1 = vld [vmem:[#allocation2 + $0x108] sm:$0x30]  ;;  %v6616_v2 = vld [vmem:[#allocation2 + $0x8] sm:$0xf]  ;;  %v5596_v4 = vld [vmem:[#allocation2 + $0x10c] sm:$0x30] }
   0xe   :  { %v5595_v3 = vor.u32 %v6648_v1, %v5594_v0  ;;  %v5602_v5 = vld [vmem:[#allocation2 + $0xc] sm:$0xf]  ;;  %v6649_v6 = vld [vmem:[#allocation2 + $0x110] sm:$0x30]  ;;  %v5599_v7 = vor.u32 %v6616_v2, %v5596_v4  ;;  %v6617_v9 = vld [vmem:[#allocation2 + $0x10] sm:$0xf] }
   0xf   :  { %v5603_v8 = vor.u32 %v6649_v6, %v5602_v5  ;;  %v5604_v10 = vld [vmem:[#allocation2 + $0x114] sm:$0x30]  ;;  %v6995_v11 = vld [vmem:[#allocation5 + $0x4] sm:$0xf]  ;;  %v5618_v14 = vld [vmem:[#allocation2 + $0x1c] sm:$0xf] }
  0x10   :  { %v441_v12 = vsel %vm439_vm0, %v5595_v3, 0  ;;  %v5607_v13 = vor.u32 %v6617_v9, %v5604_v10  ;;  %v6651_v15 = vld [vmem:[#allocation2 + $0x120] sm:$0x30]  ;;  %v444_v16 = vsel %vm439_vm0, %v5599_v7, 0  ;;  %v6619_v19 = vld [vmem:[#allocation2 + $0x20] sm:$0xf] }
  0x11   :  { %639 = vmatpush.bf16.msra.mxu0 %v441_v12  ;;  %v447_v17 = vsel %vm439_vm0, %v5603_v8, 0  ;;  %v5619_v18 = vor.u32 %v6651_v15, %v5618_v14  ;;  %v5620_v20 = vld [vmem:[#allocation2 + $0x124] sm:$0x30]  ;;  %652 = vmatpush.bf16.msra.mxu1 %v444_v16  ;;  %v5610_v23 = vld [vmem:[#allocation2 + $0x14] sm:$0xf]  ;;  %s5581_s29 = sshll.u32 %s9534_s3, 4  ;;  %s5582_s29 = int_to_ptr.hbm [resolvable:$true] %s5581_s29 }
  0x12   :  { %665 = vmatpush.bf16.msra.mxu2 %v447_v17  ;;  %v450_v21 = vsel %vm439_vm0, %v5607_v13, 0  ;;  %v5623_v22 = vor.u32 %v6619_v19, %v5620_v20  ;;  %v6650_v24 = vld [vmem:[#allocation2 + $0x118] sm:$0x30]  ;;  %v6618_v27 = vld [vmem:[#allocation2 + $0x18] sm:$0xf] }
  0x13   :  { %678 = vmatpush.bf16.msra.mxu3 %v450_v21  ;;  %v459_v25 = vsel %vm439_vm0, %v5619_v18, 0  ;;  %v5611_v26 = vor.u32 %v6650_v24, %v5610_v23  ;;  %v5612_v28 = vld [vmem:[#allocation2 + $0x11c] sm:$0x30]  ;;  %v5634_v31 = vld [vmem:[#allocation2 + $0x2c] sm:$0xf] }
  0x14   :  { %5848 = vmatmul.msk.bf16.vlgmr.msra.gmra.mxu0 %vm435_vm1, %v6995_v11  ;;  %v462_v29 = vsel %vm439_vm0, %v5623_v22, 0  ;;  %v5615_v30 = vor.u32 %v6618_v27, %v5612_v28  ;;  %v6653_v32 = vld [vmem:[#allocation2 + $0x130] sm:$0x30]  ;;  %5849 = vmatmul.msk.bf16.vlgmr.msra.gmra.mxu1 %vm435_vm1, %v6995_v11  ;;  %v6621_v35 = vld [vmem:[#allocation2 + $0x30] sm:$0xf] }
  0x15   :  { %5850 = vmatmul.msk.bf16.vlgmr.msra.gmra.mxu2 %vm435_vm1, %v6995_v11  ;;  %v453_v33 = vsel %vm439_vm0, %v5611_v26, 0  ;;  %v5635_v34 = vor.u32 %v6653_v32, %v5634_v31  ;;  %v5636_v36 = vld [vmem:[#allocation2 + $0x134] sm:$0x30]  ;;  %v5626_v39 = vld [vmem:[#allocation2 + $0x24] sm:$0xf] }
  0x16   :  { %717 = vmatpush.bf16.msrb.mxu2 %v459_v25  ;;  %5851 = vmatmul.msk.bf16.vlgmr.msra.gmra.mxu3 %vm435_vm1, %v6995_v11  ;;  %v456_v37 = vsel %vm439_vm0, %v5615_v30, 0  ;;  %v5639_v38 = vor.u32 %v6621_v35, %v5636_v36  ;;  %v6652_v40 = vld [vmem:[#allocation2 + $0x128] sm:$0x30]  ;;  %v6620_v43 = vld [vmem:[#allocation2 + $0x28] sm:$0xf] }
  0x17   :  { %691 = vmatpush.bf16.msrb.mxu0 %v453_v33  ;;  %730 = vmatpush.bf16.msrb.mxu3 %v462_v29  ;;  %v471_v41 = vsel %vm439_vm0, %v5635_v34, 0  ;;  %v5627_v42 = vor.u32 %v6652_v40, %v5626_v39  ;;  %v5628_v44 = vld [vmem:[#allocation2 + $0x12c] sm:$0x30]  ;;  %v5650_v49 = vld [vmem:[#allocation2 + $0x3c] sm:$0xf] }
  0x18   :  { %704 = vmatpush.bf16.msrb.mxu1 %v456_v37  ;;  %v474_v45 = vsel %vm439_vm0, %v5639_v38, 0  ;;  %v5631_v46 = vor.u32 %v6620_v43, %v5628_v44  ;;  %v6655_v50 = vld [vmem:[#allocation2 + $0x140] sm:$0x30]  ;;  %v6623_v51 = vld [vmem:[#allocation2 + $0x40] sm:$0xf] }
  0x19   :  { %v465_v47 = vsel %vm439_vm0, %v5627_v42, 0  ;;  %v5652_v52 = vld [vmem:[#allocation2 + $0x144] sm:$0x30]  ;;  %v5642_v53 = vld [vmem:[#allocation2 + $0x34] sm:$0xf]  ;;  %v5651_v57 = vor.u32 %v6655_v50, %v5650_v49 }
  0x1a   :  { %769 = vmatpush.bf16.msra.mxu2 %v471_v41  ;;  %v468_v48 = vsel %vm439_vm0, %v5631_v46, 0  ;;  %v6654_v54 = vld [vmem:[#allocation2 + $0x138] sm:$0x30]  ;;  %v6622_v55 = vld [vmem:[#allocation2 + $0x38] sm:$0xf]  ;;  %v5655_v58 = vor.u32 %v6623_v51, %v5652_v52 }
  0x1b   :  { %782 = vmatpush.bf16.msra.mxu3 %v474_v45  ;;  %743 = vmatpush.bf16.msra.mxu0 %v465_v47  ;;  %v5644_v56 = vld [vmem:[#allocation2 + $0x13c] sm:$0x30]  ;;  %v5643_v59 = vor.u32 %v6654_v54, %v5642_v53  ;;  %v483_v61 = vsel %vm439_vm0, %v5651_v57, 0  ;;  %v5666_v1 = vld [vmem:[#allocation2 + $0x4c] sm:$0xf] }
  0x1c   :  { %756 = vmatpush.bf16.msra.mxu1 %v468_v48  ;;  %v5647_v60 = vor.u32 %v6622_v55, %v5644_v56  ;;  %v486_v62 = vsel %vm439_vm0, %v5655_v58, 0  ;;  %v6657_v2 = vld [vmem:[#allocation2 + $0x150] sm:$0x30]  ;;  %v6625_v3 = vld [vmem:[#allocation2 + $0x50] sm:$0xf] }
  0x1d   :  { %v477_v63 = vsel %vm439_vm0, %v5643_v59, 0  ;;  %v5668_v4 = vld [vmem:[#allocation2 + $0x154] sm:$0x30]  ;;  %v5658_v5 = vld [vmem:[#allocation2 + $0x44] sm:$0xf]  ;;  %v5667_v9 = vor.u32 %v6657_v2, %v5666_v1 }
  0x1e   :  { %v480_v0 = vsel %vm439_vm0, %v5647_v60, 0  ;;  %v6656_v6 = vld [vmem:[#allocation2 + $0x148] sm:$0x30]  ;;  %v6624_v7 = vld [vmem:[#allocation2 + $0x48] sm:$0xf]  ;;  %v5671_v10 = vor.u32 %v6625_v3, %v5668_v4 }
  0x1f   :  { %v5660_v8 = vld [vmem:[#allocation2 + $0x14c] sm:$0x30]  ;;  %v5659_v12 = vor.u32 %v6656_v6, %v5658_v5  ;;  %v495_v14 = vsel %vm439_vm0, %v5667_v9, 0  ;;  %v5682_v18 = vld [vmem:[#allocation2 + $0x5c] sm:$0xf] }
  0x20   :  { %v5663_v13 = vor.u32 %v6624_v7, %v5660_v8  ;;  %v498_v15 = vsel %vm439_vm0, %v5671_v10, 0  ;;  %v6659_v19 = vld [vmem:[#allocation2 + $0x160] sm:$0x30]  ;;  %v6627_v20 = vld [vmem:[#allocation2 + $0x60] sm:$0xf] }
  0x21   :  { %v489_v16 = vsel %vm439_vm0, %v5659_v12, 0  ;;  %v5684_v21 = vld [vmem:[#allocation2 + $0x164] sm:$0x30]  ;;  %v5674_v22 = vld [vmem:[#allocation2 + $0x54] sm:$0xf]  ;;  %v5683_v26 = vor.u32 %v6659_v19, %v5682_v18 }
  0x22   :  { %v492_v17 = vsel %vm439_vm0, %v5663_v13, 0  ;;  %v6658_v23 = vld [vmem:[#allocation2 + $0x158] sm:$0x30]  ;;  %v6626_v24 = vld [vmem:[#allocation2 + $0x58] sm:$0xf]  ;;  %v5687_v27 = vor.u32 %v6627_v20, %v5684_v21 }
  0x23   :  { %v5676_v25 = vld [vmem:[#allocation2 + $0x15c] sm:$0x30]  ;;  %v5675_v28 = vor.u32 %v6658_v23, %v5674_v22  ;;  %v507_v30 = vsel %vm439_vm0, %v5683_v26, 0  ;;  %v5698_v34 = vld [vmem:[#allocation2 + $0x6c] sm:$0xf] }
  0x24   :  { %5852 = vmatmul.msk.bf16.vlgmr.msrb.gmra.mxu0 %vm435_vm1, %v6995_v11  ;;  %5853 = vmatmul.msk.bf16.vlgmr.msrb.gmra.mxu1 %vm435_vm1, %v6995_v11  ;;  %v5679_v29 = vor.u32 %v6626_v24, %v5676_v25  ;;  %v510_v31 = vsel %vm439_vm0, %v5687_v27, 0  ;;  %v6661_v35 = vld [vmem:[#allocation2 + $0x170] sm:$0x30]  ;;  %v6629_v36 = vld [vmem:[#allocation2 + $0x70] sm:$0xf] }
  0x25   :  { %5854 = vmatmul.msk.bf16.vlgmr.msrb.gmra.mxu2 %vm435_vm1, %v6995_v11  ;;  %795 = vmatpush.bf16.msrb.mxu0 %v477_v63  ;;  %v501_v32 = vsel %vm439_vm0, %v5675_v28, 0  ;;  %v5700_v37 = vld [vmem:[#allocation2 + $0x174] sm:$0x30]  ;;  %v5690_v38 = vld [vmem:[#allocation2 + $0x64] sm:$0xf]  ;;  %v5699_v42 = vor.u32 %v6661_v35, %v5698_v34 }
  0x26   :  { %5855 = vmatmul.msk.bf16.vlgmr.msrb.gmra.mxu3 %vm435_vm1, %v6995_v11  ;;  %821 = vmatpush.bf16.msrb.mxu2 %v483_v61  ;;  %v504_v33 = vsel %vm439_vm0, %v5679_v29, 0  ;;  %v6660_v39 = vld [vmem:[#allocation2 + $0x168] sm:$0x30]  ;;  %v6628_v40 = vld [vmem:[#allocation2 + $0x68] sm:$0xf]  ;;  %v5703_v43 = vor.u32 %v6629_v36, %v5700_v37 }
  0x27   :  { %834 = vmatpush.bf16.msrb.mxu3 %v486_v62  ;;  %808 = vmatpush.bf16.msrb.mxu1 %v480_v0  ;;  %v5692_v41 = vld [vmem:[#allocation2 + $0x16c] sm:$0x30]  ;;  %v5691_v44 = vor.u32 %v6660_v39, %v5690_v38  ;;  %v519_v46 = vsel %vm439_vm0, %v5699_v42, 0  ;;  %v5714_v50 = vld [vmem:[#allocation2 + $0x7c] sm:$0xf] }
  0x28   :  { %v5695_v45 = vor.u32 %v6628_v40, %v5692_v41  ;;  %v522_v47 = vsel %vm439_vm0, %v5703_v43, 0  ;;  %v6663_v51 = vld [vmem:[#allocation2 + $0x180] sm:$0x30]  ;;  %v6631_v52 = vld [vmem:[#allocation2 + $0x80] sm:$0xf] }
  0x29   :  { %v513_v48 = vsel %vm439_vm0, %v5691_v44, 0  ;;  %v5716_v53 = vld [vmem:[#allocation2 + $0x184] sm:$0x30]  ;;  %v5706_v54 = vld [vmem:[#allocation2 + $0x74] sm:$0xf]  ;;  %v5715_v58 = vor.u32 %v6663_v51, %v5714_v50 }
  0x2a   :  { %v516_v49 = vsel %vm439_vm0, %v5695_v45, 0  ;;  %v6662_v55 = vld [vmem:[#allocation2 + $0x178] sm:$0x30]  ;;  %v6630_v56 = vld [vmem:[#allocation2 + $0x78] sm:$0xf]  ;;  %v5719_v59 = vor.u32 %v6631_v52, %v5716_v53 }
  0x2b   :  { %v5708_v57 = vld [vmem:[#allocation2 + $0x17c] sm:$0x30]  ;;  %v5707_v60 = vor.u32 %v6662_v55, %v5706_v54  ;;  %v531_v62 = vsel %vm439_vm0, %v5715_v58, 0  ;;  %v5730_v2 = vld [vmem:[#allocation2 + $0x8c] sm:$0xf] }
  0x2c   :  { %v5711_v61 = vor.u32 %v6630_v56, %v5708_v57  ;;  %v534_v63 = vsel %vm439_vm0, %v5719_v59, 0  ;;  %v6665_v3 = vld [vmem:[#allocation2 + $0x190] sm:$0x30]  ;;  %v6633_v4 = vld [vmem:[#allocation2 + $0x90] sm:$0xf] }
  0x2d   :  { %v525_v0 = vsel %vm439_vm0, %v5707_v60, 0  ;;  %v5732_v5 = vld [vmem:[#allocation2 + $0x194] sm:$0x30]  ;;  %v5722_v6 = vld [vmem:[#allocation2 + $0x84] sm:$0xf]  ;;  %v5731_v10 = vor.u32 %v6665_v3, %v5730_v2 }
  0x2e   :  { %v528_v1 = vsel %vm439_vm0, %v5711_v61, 0  ;;  %v6664_v7 = vld [vmem:[#allocation2 + $0x188] sm:$0x30]  ;;  %v6632_v8 = vld [vmem:[#allocation2 + $0x88] sm:$0xf]  ;;  %v5735_v12 = vor.u32 %v6633_v4, %v5732_v5 }
  0x2f   :  { %v5724_v9 = vld [vmem:[#allocation2 + $0x18c] sm:$0x30]  ;;  %v5723_v13 = vor.u32 %v6664_v7, %v5722_v6  ;;  %v5746_v19 = vld [vmem:[#allocation2 + $0x9c] sm:$0xf]  ;;  %v6667_v20 = vld [vmem:[#allocation2 + $0x1a0] sm:$0x30] }
  0x30   :  { %v6635_v21 = vld [vmem:[#allocation2 + $0xa0] sm:$0xf]  ;;  %v5748_v22 = vld [vmem:[#allocation2 + $0x1a4] sm:$0x30]  ;;  %v5738_v23 = vld [vmem:[#allocation2 + $0x94] sm:$0xf]  ;;  %v5747_v27 = vor.u32 %v6667_v20, %v5746_v19 }
  0x31   :  { %v6666_v24 = vld [vmem:[#allocation2 + $0x198] sm:$0x30]  ;;  %v6634_v25 = vld [vmem:[#allocation2 + $0x98] sm:$0xf]  ;;  %v5740_v26 = vld [vmem:[#allocation2 + $0x19c] sm:$0x30]  ;;  %v5751_v28 = vor.u32 %v6635_v21, %v5748_v22 }
  0x32   :  { %v5739_v29 = vor.u32 %v6666_v24, %v5738_v23  ;;  %v5762_v35 = vld [vmem:[#allocation2 + $0xac] sm:$0xf]  ;;  %v6669_v36 = vld [vmem:[#allocation2 + $0x1b0] sm:$0x30]  ;;  %v6637_v37 = vld [vmem:[#allocation2 + $0xb0] sm:$0xf] }
  0x33   :  { %v5764_v38 = vld [vmem:[#allocation2 + $0x1b4] sm:$0x30]  ;;  %v5754_v39 = vld [vmem:[#allocation2 + $0xa4] sm:$0xf]  ;;  %v6668_v40 = vld [vmem:[#allocation2 + $0x1a8] sm:$0x30]  ;;  %v5763_v43 = vor.u32 %v6669_v36, %v5762_v35 }
  0x34   :  { %5856 = vmatmul.msk.bf16.vlgmr.msra.gmra.mxu0 %vm435_vm1, %v6995_v11  ;;  %5857 = vmatmul.msk.bf16.vlgmr.msra.gmra.mxu1 %vm435_vm1, %v6995_v11  ;;  %v6636_v41 = vld [vmem:[#allocation2 + $0xa8] sm:$0xf]  ;;  %v5756_v42 = vld [vmem:[#allocation2 + $0x1ac] sm:$0x30]  ;;  %v5767_v44 = vor.u32 %v6637_v37, %v5764_v38  ;;  %v5755_v45 = vor.u32 %v6668_v40, %v5754_v39  ;;  %v5778_v57 = vld [vmem:[#allocation2 + $0xbc] sm:$0xf] }
  0x35   :  { %5858 = vmatmul.msk.bf16.vlgmr.msra.gmra.mxu2 %vm435_vm1, %v6995_v11  ;;  %847 = vmatpush.bf16.msra.mxu0 %v489_v16  ;;  %v546_v16 = vsel %vm439_vm0, %v5735_v12, 0  ;;  %v6671_v58 = vld [vmem:[#allocation2 + $0x1c0] sm:$0x30]  ;;  %v6639_v59 = vld [vmem:[#allocation2 + $0xc0] sm:$0xf] }
  0x36   :  { %5859 = vmatmul.msk.bf16.vlgmr.msra.gmra.mxu3 %vm435_vm1, %v6995_v11  ;;  %873 = vmatpush.bf16.msra.mxu2 %v495_v14  ;;  %v5727_v14 = vor.u32 %v6632_v8, %v5724_v9  ;;  %v570_v50 = vsel %vm439_vm0, %v5767_v44, 0  ;;  %v561_v51 = vsel %vm439_vm0, %v5755_v45, 0  ;;  %v5780_v60 = vld [vmem:[#allocation2 + $0x1c4] sm:$0x30]  ;;  %v5770_v61 = vld [vmem:[#allocation2 + $0xb4] sm:$0xf] }
  0x37   :  { %886 = vmatpush.bf16.msra.mxu3 %v498_v15  ;;  %860 = vmatpush.bf16.msra.mxu1 %v492_v17  ;;  %v543_v15 = vsel %vm439_vm0, %v5731_v10, 0  ;;  %v537_v17 = vsel %vm439_vm0, %v5723_v13, 0  ;;  %v5783_v3 = vor.u32 %v6639_v59, %v5780_v60  ;;  %v6673_v19 = vld [vmem:[#allocation2 + $0x1d0] sm:$0x30]  ;;  %v6641_v20 = vld [vmem:[#allocation2 + $0xd0] sm:$0xf] }
  0x38   :  { %v540_v18 = vsel %vm439_vm0, %v5727_v14, 0  ;;  %v5796_v21 = vld [vmem:[#allocation2 + $0x1d4] sm:$0x30]  ;;  %v5786_v22 = vld [vmem:[#allocation2 + $0xc4] sm:$0xf] }
  0x39   :  { %v582_v10 = vsel %vm439_vm0, %v5783_v3, 0  ;;  %v6672_v23 = vld [vmem:[#allocation2 + $0x1c8] sm:$0x30]  ;;  %v6640_v24 = vld [vmem:[#allocation2 + $0xc8] sm:$0xf] }
  0x3a   :  { %v6643_v44 = vld [vmem:[#allocation2 + $0xe0] sm:$0xf]  ;;  %v5812_v45 = vld [vmem:[#allocation2 + $0x1e4] sm:$0x30] }
  0x44   :  { %5860 = vmatmul.msk.bf16.vlgmr.msrb.gmra.mxu0 %vm435_vm1, %v6995_v11  ;;  %5861 = vmatmul.msk.bf16.vlgmr.msrb.gmra.mxu1 %vm435_vm1, %v6995_v11 }
  0x45   :  { %5862 = vmatmul.msk.bf16.vlgmr.msrb.gmra.mxu2 %vm435_vm1, %v6995_v11  ;;  %899 = vmatpush.bf16.msrb.mxu0 %v501_v32  ;;  %v558_v32 = vsel %vm439_vm0, %v5751_v28, 0  ;;  %v5799_v28 = vor.u32 %v6641_v20, %v5796_v21 }
  0x46   :  { %5863 = vmatmul.msk.bf16.vlgmr.msrb.gmra.mxu3 %vm435_vm1, %v6995_v11  ;;  %925 = vmatpush.bf16.msrb.mxu2 %v507_v30  ;;  %v5743_v30 = vor.u32 %v6634_v25, %v5740_v26  ;;  %v5788_v25 = vld [vmem:[#allocation2 + $0x1cc] sm:$0x30] }
  0x47   :  { %938 = vmatpush.bf16.msrb.mxu3 %v510_v31  ;;  %912 = vmatpush.bf16.msrb.mxu1 %v504_v33  ;;  %v555_v31 = vsel %vm439_vm0, %v5747_v27, 0  ;;  %v549_v33 = vsel %vm439_vm0, %v5739_v29, 0  ;;  %v5787_v29 = vor.u32 %v6672_v23, %v5786_v22  ;;  %v594_v35 = vsel %vm439_vm0, %v5799_v28, 0 }
  0x48   :  { %v552_v34 = vsel %vm439_vm0, %v5743_v30, 0 }
  0x49   :  { %v585_v36 = vsel %vm439_vm0, %v5787_v29, 0 }
  0x54   :  { %5864 = vmatmul.msk.bf16.vlgmr.msra.gmra.mxu0 %vm435_vm1, %v6995_v11  ;;  %5865 = vmatmul.msk.bf16.vlgmr.msra.gmra.mxu1 %vm435_vm1, %v6995_v11 }
  0x55   :  { %5866 = vmatmul.msk.bf16.vlgmr.msra.gmra.mxu2 %vm435_vm1, %v6995_v11  ;;  %951 = vmatpush.bf16.msra.mxu0 %v513_v48 }
  0x56   :  { %5867 = vmatmul.msk.bf16.vlgmr.msra.gmra.mxu3 %vm435_vm1, %v6995_v11  ;;  %977 = vmatpush.bf16.msra.mxu2 %v519_v46 }
  0x57   :  { %990 = vmatpush.bf16.msra.mxu3 %v522_v47  ;;  %964 = vmatpush.bf16.msra.mxu1 %v516_v49  ;;  %v5759_v47 = vor.u32 %v6636_v41, %v5756_v42  ;;  %v567_v49 = vsel %vm439_vm0, %v5763_v43, 0  ;;  %v5810_v42 = vld [vmem:[#allocation2 + $0xdc] sm:$0xf]  ;;  %v6675_v43 = vld [vmem:[#allocation2 + $0x1e0] sm:$0x30] }
  0x59   :  { %v564_v52 = vsel %vm439_vm0, %v5759_v47, 0  ;;  %v5802_v47 = vld [vmem:[#allocation2 + $0xd4] sm:$0xf] }
  0x64   :  { %5868 = vmatmul.msk.bf16.vlgmr.msrb.gmra.mxu0 %vm435_vm1, %v6995_v11  ;;  %5869 = vmatmul.msk.bf16.vlgmr.msrb.gmra.mxu1 %vm435_vm1, %v6995_v11 }
  0x65   :  { %5870 = vmatmul.msk.bf16.vlgmr.msrb.gmra.mxu2 %vm435_vm1, %v6995_v11  ;;  %1003 = vmatpush.bf16.msrb.mxu0 %v525_v0  ;;  %v5772_v0 = vld [vmem:[#allocation2 + $0x1bc] sm:$0x30] }
  0x66   :  { %5871 = vmatmul.msk.bf16.vlgmr.msrb.gmra.mxu3 %vm435_vm1, %v6995_v11  ;;  %1029 = vmatpush.bf16.msrb.mxu2 %v531_v62  ;;  %v6670_v62 = vld [vmem:[#allocation2 + $0x1b8] sm:$0x30] }
  0x67   :  { %1042 = vmatpush.bf16.msrb.mxu3 %v534_v63  ;;  %1016 = vmatpush.bf16.msrb.mxu1 %v528_v1  ;;  %v6638_v63 = vld [vmem:[#allocation2 + $0xb8] sm:$0xf]  ;;  %v5779_v1 = vor.u32 %v6671_v58, %v5778_v57  ;;  %v5771_v4 = vor.u32 %v6670_v62, %v5770_v61 }
  0x68   :  { %v5775_v7 = vor.u32 %v6638_v63, %v5772_v0 }
  0x69   :  { %v579_v9 = vsel %vm439_vm0, %v5779_v1, 0  ;;  %v573_v12 = vsel %vm439_vm0, %v5771_v4, 0 }
  0x6a   :  { %v576_v13 = vsel %vm439_vm0, %v5775_v7, 0  ;;  %v5826_v7 = vld [vmem:[#allocation2 + $0xec] sm:$0xf] }
  0x74   :  { %5872 = vmatmul.msk.bf16.vlgmr.msra.gmra.mxu0 %vm435_vm1, %v6995_v11  ;;  %5873 = vmatmul.msk.bf16.vlgmr.msra.gmra.mxu1 %vm435_vm1, %v6995_v11 }
  0x75   :  { %5874 = vmatmul.msk.bf16.vlgmr.msra.gmra.mxu2 %vm435_vm1, %v6995_v11  ;;  %1055 = vmatpush.bf16.msra.mxu0 %v537_v17 }
  0x76   :  { %5875 = vmatmul.msk.bf16.vlgmr.msra.gmra.mxu3 %vm435_vm1, %v6995_v11  ;;  %1081 = vmatpush.bf16.msra.mxu2 %v543_v15 }
  0x77   :  { %1094 = vmatpush.bf16.msra.mxu3 %v546_v16  ;;  %1068 = vmatpush.bf16.msra.mxu1 %v540_v18  ;;  %v5794_v18 = vld [vmem:[#allocation2 + $0xcc] sm:$0xf] }
  0x78   :  { %v5795_v26 = vor.u32 %v6673_v19, %v5794_v18  ;;  %v5820_v18 = vld [vmem:[#allocation2 + $0x1ec] sm:$0x30] }
  0x84   :  { %5876 = vmatmul.msk.bf16.vlgmr.msrb.gmra.mxu0 %vm435_vm1, %v6995_v11  ;;  %5877 = vmatmul.msk.bf16.vlgmr.msrb.gmra.mxu1 %vm435_vm1, %v6995_v11 }
  0x85   :  { %5878 = vmatmul.msk.bf16.vlgmr.msrb.gmra.mxu2 %vm435_vm1, %v6995_v11  ;;  %1107 = vmatpush.bf16.msrb.mxu0 %v549_v33 }
  0x86   :  { %5879 = vmatmul.msk.bf16.vlgmr.msrb.gmra.mxu3 %vm435_vm1, %v6995_v11  ;;  %1133 = vmatpush.bf16.msrb.mxu2 %v555_v31 }
  0x87   :  { %1146 = vmatpush.bf16.msrb.mxu3 %v558_v32  ;;  %1120 = vmatpush.bf16.msrb.mxu1 %v552_v34  ;;  %v5791_v32 = vor.u32 %v6640_v24, %v5788_v25  ;;  %v591_v34 = vsel %vm439_vm0, %v5795_v26, 0 }
  0x89   :  { %v588_v37 = vsel %vm439_vm0, %v5791_v32, 0 }
  0x91   :  { %v7101_v46 = vpop.f32.mrf.mxu0  ;;  %v7103_v48 = vpop.f32.mrf.mxu1 }
  0x94   :  { %5880 = vmatmul.msk.bf16.vlgmr.msra.gmra.mxu0 %vm435_vm1, %v6995_v11  ;;  %5881 = vmatmul.msk.bf16.vlgmr.msra.gmra.mxu1 %vm435_vm1, %v6995_v11 }
  0x95   :  { %5882 = vmatmul.msk.bf16.vlgmr.msra.gmra.mxu2 %vm435_vm1, %v6995_v11  ;;  %1159 = vmatpush.bf16.msra.mxu0 %v561_v51  ;;  %v5804_v51 = vld [vmem:[#allocation2 + $0x1dc] sm:$0x30] }
  0x96   :  { %5883 = vmatmul.msk.bf16.vlgmr.msra.gmra.mxu3 %vm435_vm1, %v6995_v11  ;;  %1185 = vmatpush.bf16.msra.mxu2 %v567_v49  ;;  %v6674_v49 = vld [vmem:[#allocation2 + $0x1d8] sm:$0x30] }
  0x97   :  { %1198 = vmatpush.bf16.msra.mxu3 %v570_v50  ;;  %1172 = vmatpush.bf16.msra.mxu1 %v564_v52  ;;  %v6642_v50 = vld [vmem:[#allocation2 + $0xd8] sm:$0xf]  ;;  %v5811_v52 = vor.u32 %v6675_v43, %v5810_v42  ;;  %v5803_v57 = vor.u32 %v6674_v49, %v5802_v47  ;;  %v5844_v42 = vld [vmem:[#allocation2 + $0x204] sm:$0x30]  ;;  %v5834_v43 = vld [vmem:[#allocation2 + $0xf4] sm:$0xf] }
  0x98   :  { %v7117_v53 = vpop.f32.mrf.mxu2  ;;  %v5807_v60 = vor.u32 %v6642_v50, %v5804_v51  ;;  %v5836_v47 = vld [vmem:[#allocation2 + $0x1fc] sm:$0x30] }
  0x99   :  { %v7119_v54 = vpop.f32.mrf.mxu3  ;;  %v643_v55 = vpop.f32.mrf.mxu0  ;;  %v603_v62 = vsel %vm439_vm0, %v5811_v52, 0  ;;  %v597_v0 = vsel %vm439_vm0, %v5803_v57, 0 }
  0x9a   :  { %v656_v56 = vpop.f32.mrf.mxu1  ;;  %v600_v1 = vsel %vm439_vm0, %v5807_v60, 0 }
  0x9b   :  { %v5815_v56 = vor.u32 %v6643_v44, %v5812_v45  ;;  %v6678_v44 = vld [vmem:[#allocation2 + $0x1f8] sm:$0x30]  ;;  %v6646_v45 = vld [vmem:[#allocation2 + $0xf8] sm:$0xf] }
  0x9c   :  { %v5835_v52 = vor.u32 %v6678_v44, %v5834_v43  ;;  %v5839_v57 = vor.u32 %v6646_v45, %v5836_v47  ;;  %v5938_v44 = vld [vmem:[#allocation2 + $0x18] sm:$0xf]  ;;  %v6587_v45 = vld [vmem:[#allocation2 + $0x11c] sm:$0x30]  ;;  %v6555_v47 = vld [vmem:[#allocation2 + $0x1c] sm:$0xf] }
  0x9d   :  { %v606_v63 = vsel %vm439_vm0, %v5815_v56, 0 }
  0xa0   :  { %v669_v2 = vpop.f32.mrf.mxu2 }
  0xa1   :  { %v682_v5 = vpop.f32.mrf.mxu3  ;;  %v7121_v6 = vpop.f32.mrf.mxu0 }
  0xa2   :  { %v7123_v8 = vpop.f32.mrf.mxu1 }
  0xa4   :  { %5884 = vmatmul.msk.bf16.vlgmr.msrb.gmra.mxu0 %vm435_vm1, %v6995_v11  ;;  %5885 = vmatmul.msk.bf16.vlgmr.msrb.gmra.mxu1 %vm435_vm1, %v6995_v11 }
  0xa5   :  { %5886 = vmatmul.msk.bf16.vlgmr.msrb.gmra.mxu2 %vm435_vm1, %v6995_v11  ;;  %1211 = vmatpush.bf16.msrb.mxu0 %v573_v12  ;;  %v5828_v12 = vld [vmem:[#allocation2 + $0x1f4] sm:$0x30] }
  0xa6   :  { %5887 = vmatmul.msk.bf16.vlgmr.msrb.gmra.mxu3 %vm435_vm1, %v6995_v11  ;;  %1237 = vmatpush.bf16.msrb.mxu2 %v579_v9  ;;  %v6677_v9 = vld [vmem:[#allocation2 + $0x1f0] sm:$0x30] }
  0xa7   :  { %1250 = vmatpush.bf16.msrb.mxu3 %v582_v10  ;;  %1224 = vmatpush.bf16.msrb.mxu1 %v576_v13  ;;  %v6645_v10 = vld [vmem:[#allocation2 + $0xf0] sm:$0xf]  ;;  %v5818_v13 = vld [vmem:[#allocation2 + $0xe4] sm:$0xf]  ;;  %v5827_v19 = vor.u32 %v6677_v9, %v5826_v7  ;;  %v5922_v9 = vld [vmem:[#allocation2 + $0x8] sm:$0xf] }
  0xa8   :  { %v7137_v14 = vpop.f32.mrf.mxu2  ;;  %v5831_v21 = vor.u32 %v6645_v10, %v5828_v12  ;;  %v6585_v10 = vld [vmem:[#allocation2 + $0x10c] sm:$0x30]  ;;  %v6553_v12 = vld [vmem:[#allocation2 + $0xc] sm:$0xf] }
  0xa9   :  { %v7139_v15 = vpop.f32.mrf.mxu3  ;;  %v695_v16 = vpop.f32.mrf.mxu0 }
  0xaa   :  { %v708_v17 = vpop.f32.mrf.mxu1  ;;  %v6676_v16 = vld [vmem:[#allocation2 + $0x1e8] sm:$0x30]  ;;  %v618_v28 = vsel %vm439_vm0, %v5831_v21, 0 }
  0xab   :  { %v6644_v17 = vld [vmem:[#allocation2 + $0xe8] sm:$0xf]  ;;  %v5819_v22 = vor.u32 %v6676_v16, %v5818_v13  ;;  %v5924_v13 = vld [vmem:[#allocation2 + $0x110] sm:$0x30]  ;;  %v5914_v16 = vld [vmem:[#allocation2] sm:$0xf] }
  0xac   :  { %v5823_v25 = vor.u32 %v6644_v17, %v5820_v18  ;;  %v6584_v17 = vld [vmem:[#allocation2 + $0x104] sm:$0x30]  ;;  %v6552_v18 = vld [vmem:[#allocation2 + $0x4] sm:$0xf] }
  0xad   :  { %v609_v29 = vsel %vm439_vm0, %v5819_v22, 0  ;;  %v5927_v22 = vor.u32 %v6553_v12, %v5924_v13 }
  0xb0   :  { %v721_v27 = vpop.f32.mrf.mxu2 }
  0xb1   :  { %v734_v30 = vpop.f32.mrf.mxu3  ;;  %v7141_v31 = vpop.f32.mrf.mxu0  ;;  %v615_v27 = vsel %vm439_vm0, %v5827_v19, 0  ;;  %v5916_v19 = vld [vmem:[#allocation2 + $0x108] sm:$0x30] }
  0xb2   :  { %v7143_v33 = vpop.f32.mrf.mxu1  ;;  %v612_v30 = vsel %vm439_vm0, %v5823_v25, 0 }
  0xb4   :  { %5888 = vmatmul.msk.bf16.vlgmr.msra.gmra.mxu0 %vm435_vm1, %v6995_v11  ;;  %5889 = vmatmul.msk.bf16.vlgmr.msra.gmra.mxu1 %vm435_vm1, %v6995_v11 }
  0xb5   :  { %5890 = vmatmul.msk.bf16.vlgmr.msra.gmra.mxu2 %vm435_vm1, %v6995_v11  ;;  %1263 = vmatpush.bf16.msra.mxu0 %v585_v36 }
  0xb6   :  { %5891 = vmatmul.msk.bf16.vlgmr.msra.gmra.mxu3 %vm435_vm1, %v6995_v11  ;;  %1289 = vmatpush.bf16.msra.mxu2 %v591_v34 }
  0xb7   :  { %1302 = vmatpush.bf16.msra.mxu3 %v594_v35  ;;  %1276 = vmatpush.bf16.msra.mxu1 %v588_v37  ;;  %v5842_v37 = vld [vmem:[#allocation2 + $0xfc] sm:$0xf] }
  0xb8   :  { %v7157_v38 = vpop.f32.mrf.mxu2 }
  0xb9   :  { %v7159_v39 = vpop.f32.mrf.mxu3  ;;  %v747_v40 = vpop.f32.mrf.mxu0 }
  0xba   :  { %v760_v41 = vpop.f32.mrf.mxu1  ;;  %v6679_v40 = vld [vmem:[#allocation2 + $0x200] sm:$0x30] }
  0xbb   :  { %v6647_v41 = vld [vmem:[#allocation2 + $0x100] sm:$0xf]  ;;  %v5843_v49 = vor.u32 %v6679_v40, %v5842_v37 }
  0xbc   :  { %v5847_v51 = vor.u32 %v6647_v41, %v5844_v42 }
  0xbd   :  { %v627_v60 = vsel %vm439_vm0, %v5843_v49, 0  ;;  %v5940_v49 = vld [vmem:[#allocation2 + $0x120] sm:$0x30] }
  0xc0   :  { %v773_v55 = vpop.f32.mrf.mxu2 }
  0xc1   :  { %v786_v58 = vpop.f32.mrf.mxu3  ;;  %v7161_v59 = vpop.f32.mrf.mxu0 }
  0xc2   :  { %v7163_v61 = vpop.f32.mrf.mxu1 }
  0xc4   :  { %5892 = vmatmul.msk.bf16.vlgmr.msrb.gmra.mxu0 %vm435_vm1, %v6995_v11  ;;  %5893 = vmatmul.msk.bf16.vlgmr.msrb.gmra.mxu1 %vm435_vm1, %v6995_v11 }
  0xc5   :  { %5894 = vmatmul.msk.bf16.vlgmr.msrb.gmra.mxu2 %vm435_vm1, %v6995_v11  ;;  %1315 = vmatpush.bf16.msrb.mxu0 %v597_v0  ;;  %v624_v0 = vsel %vm439_vm0, %v5839_v57, 0  ;;  %v5939_v57 = vor.u32 %v6587_v45, %v5938_v44 }
  0xc6   :  { %5895 = vmatmul.msk.bf16.vlgmr.msrb.gmra.mxu3 %vm435_vm1, %v6995_v11  ;;  %1341 = vmatpush.bf16.msrb.mxu2 %v603_v62  ;;  %v630_v62 = vsel %vm439_vm0, %v5847_v51, 0  ;;  %v6586_v51 = vld [vmem:[#allocation2 + $0x114] sm:$0x30] }
  0xc7   :  { %1354 = vmatpush.bf16.msrb.mxu3 %v606_v63  ;;  %1328 = vmatpush.bf16.msrb.mxu1 %v600_v1  ;;  %v621_v63 = vsel %vm439_vm0, %v5835_v52, 0  ;;  %v6554_v52 = vld [vmem:[#allocation2 + $0x14] sm:$0xf] }
  0xc8   :  { %v7177_v2 = vpop.f32.mrf.mxu2 }
  0xc9   :  { %v7179_v3 = vpop.f32.mrf.mxu3  ;;  %v799_v4 = vpop.f32.mrf.mxu0 }
  0xca   :  { %v812_v5 = vpop.f32.mrf.mxu1 }
  0xd0   :  { %v825_v20 = vpop.f32.mrf.mxu2 }
  0xd1   :  { %v838_v23 = vpop.f32.mrf.mxu3  ;;  %v7181_v24 = vpop.f32.mrf.mxu0  ;;  %v5923_v20 = vor.u32 %v6585_v10, %v5922_v9  ;;  %v1742_v10 = vsel %vm439_vm0, %v5939_v57, 0 }
  0xd2   :  { %v7183_v26 = vpop.f32.mrf.mxu1  ;;  %v5915_v23 = vor.u32 %v6584_v17, %v5914_v16 }
  0xd4   :  { %5896 = vmatmul.msk.bf16.vlgmr.msra.gmra.mxu0 %vm435_vm1, %v6995_v11  ;;  %5897 = vmatmul.msk.bf16.vlgmr.msra.gmra.mxu1 %vm435_vm1, %v6995_v11 }
  0xd5   :  { %5898 = vmatmul.msk.bf16.vlgmr.msra.gmra.mxu2 %vm435_vm1, %v6995_v11  ;;  %1367 = vmatpush.bf16.msra.mxu0 %v609_v29 }
  0xd6   :  { %5899 = vmatmul.msk.bf16.vlgmr.msra.gmra.mxu3 %vm435_vm1, %v6995_v11  ;;  %1393 = vmatpush.bf16.msra.mxu2 %v615_v27 }
  0xd7   :  { %1406 = vmatpush.bf16.msra.mxu3 %v618_v28  ;;  %1380 = vmatpush.bf16.msra.mxu1 %v612_v30  ;;  %v5919_v28 = vor.u32 %v6552_v18, %v5916_v19  ;;  %v1730_v30 = vsel %vm439_vm0, %v5923_v20, 0 }
  0xd8   :  { %v7197_v32 = vpop.f32.mrf.mxu2 }
  0xd9   :  { %v7199_v34 = vpop.f32.mrf.mxu3  ;;  %v851_v35 = vpop.f32.mrf.mxu0  ;;  %v1727_v37 = vsel %vm439_vm0, %v5919_v28, 0  ;;  %v5946_v28 = vld [vmem:[#allocation2 + $0x20] sm:$0xf] }
  0xda   :  { %v864_v36 = vpop.f32.mrf.mxu1  ;;  %v1733_v35 = vsel %vm439_vm0, %v5927_v22, 0  ;;  %v6589_v22 = vld [vmem:[#allocation2 + $0x12c] sm:$0x30] }
  0xdb   :  { %v1724_v36 = vsel %vm439_vm0, %v5915_v23, 0  ;;  %v6557_v23 = vld [vmem:[#allocation2 + $0x2c] sm:$0xf] }
  0xe0   :  { %v877_v50 = vpop.f32.mrf.mxu2 }
  0xe1   :  { %v890_v55 = vpop.f32.mrf.mxu3  ;;  %v7201_v56 = vpop.f32.mrf.mxu0  ;;  %v5930_v50 = vld [vmem:[#allocation2 + $0x10] sm:$0xf] }
  0xe2   :  { %v7203_v58 = vpop.f32.mrf.mxu1  ;;  %v5932_v55 = vld [vmem:[#allocation2 + $0x118] sm:$0x30] }
  0xe4   :  { %5900 = vmatmul.msk.bf16.vlgmr.msrb.gmra.mxu0 %vm435_vm1, %v6995_v11  ;;  %5901 = vmatmul.msk.bf16.vlgmr.msrb.gmra.mxu1 %vm435_vm1, %v6995_v11 }
  0xe5   :  { %5902 = vmatmul.msk.bf16.vlgmr.msrb.gmra.mxu2 %vm435_vm1, %v6995_v11  ;;  %1419 = vmatpush.bf16.msrb.mxu0 %v621_v63  ;;  %v5931_v63 = vor.u32 %v6586_v51, %v5930_v50 }
  0xe6   :  { %5903 = vmatmul.msk.bf16.vlgmr.msrb.gmra.mxu3 %vm435_vm1, %v6995_v11  ;;  %1445 = vmatpush.bf16.msrb.mxu2 %v627_v60 }
  0xe7   :  { %1458 = vmatpush.bf16.msrb.mxu3 %v630_v62  ;;  %1432 = vmatpush.bf16.msrb.mxu1 %v624_v0  ;;  %v5943_v62 = vor.u32 %v6555_v47, %v5940_v49  ;;  %v1736_v13 = vsel %vm439_vm0, %v5931_v63, 0  ;;  %v7263_v47 = vld [vmem:[#allocation5] sm:$0xf] }
  0xe8   :  { %v7217_v1 = vpop.f32.mrf.mxu2 }
  0xe9   :  { %9535 = vst [vmem:[#allocation11_spill] sm:$0xff] %v7217_v1  ;;  %v7219_v4 = vpop.f32.mrf.mxu3  ;;  %v903_v5 = vpop.f32.mrf.mxu0  ;;  %v1745_v12 = vsel %vm439_vm0, %v5943_v62, 0 }
  0xea   :  { %9536 = vst [vmem:[#allocation12_spill] sm:$0xff] %v7219_v4  ;;  %v916_v7 = vpop.f32.mrf.mxu1 }
  0xeb   :  { %v5935_v7 = vor.u32 %v6554_v52, %v5932_v55 }
  0xed   :  { %v1739_v16 = vsel %vm439_vm0, %v5935_v7, 0  ;;  %v5970_v7 = vld [vmem:[#allocation2 + $0x38] sm:$0xf] }
  0xf0   :  { %v929_v21 = vpop.f32.mrf.mxu2 }
  0xf1   :  { %v942_v25 = vpop.f32.mrf.mxu3  ;;  %v7221_v27 = vpop.f32.mrf.mxu0  ;;  %v5954_v21 = vld [vmem:[#allocation2 + $0x28] sm:$0xf] }
  0xf2   :  { %9537 = vst [vmem:[#allocation13_spill] sm:$0xff] %v7221_v27  ;;  %v7223_v29 = vpop.f32.mrf.mxu1  ;;  %v5956_v25 = vld [vmem:[#allocation2 + $0x130] sm:$0x30] }
  0xf3   :  { %9538 = vst [vmem:[#allocation14_spill] sm:$0xff] %v7223_v29 }
  0xf4   :  { %5904 = vmatmul.msk.bf16.vlgmr.msra.gmra.mxu0 %vm435_vm1, %v6995_v11  ;;  %5905 = vmatmul.msk.bf16.vlgmr.msra.gmra.mxu1 %vm435_vm1, %v6995_v11 }
  0xf5   :  { %5906 = vmatmul.msk.bf16.vlgmr.msra.gmra.mxu2 %vm435_vm1, %v6995_v11  ;;  %1922 = vmatpush.bf16.msra.mxu0 %v1724_v36  ;;  %v5948_v36 = vld [vmem:[#allocation2 + $0x128] sm:$0x30] }
  0xf6   :  { %5907 = vmatmul.msk.bf16.vlgmr.msra.gmra.mxu3 %vm435_vm1, %v6995_v11  ;;  %1948 = vmatpush.bf16.msra.mxu2 %v1730_v30  ;;  %v6588_v30 = vld [vmem:[#allocation2 + $0x124] sm:$0x30] }
  0xf7   :  { %1961 = vmatpush.bf16.msra.mxu3 %v1733_v35  ;;  %1935 = vmatpush.bf16.msra.mxu1 %v1727_v37  ;;  %v6556_v35 = vld [vmem:[#allocation2 + $0x24] sm:$0xf]  ;;  %v5955_v37 = vor.u32 %v6589_v22, %v5954_v21  ;;  %v5964_v21 = vld [vmem:[#allocation2 + $0x138] sm:$0x30] }
  0xf8   :  { %v7237_v40 = vpop.f32.mrf.mxu2  ;;  %v5951_v49 = vor.u32 %v6556_v35, %v5948_v36 }
  0xf9   :  { %9539 = vst [vmem:[#allocation15_spill] sm:$0xff] %v7237_v40  ;;  %v7239_v41 = vpop.f32.mrf.mxu3  ;;  %v955_v42 = vpop.f32.mrf.mxu0  ;;  %v1754_v51 = vsel %vm439_vm0, %v5955_v37, 0 }
  0xfa   :  { %9540 = vst [vmem:[#allocation16_spill] sm:$0xff] %v7239_v41  ;;  %v968_v43 = vpop.f32.mrf.mxu1  ;;  %v5959_v42 = vor.u32 %v6557_v23, %v5956_v25  ;;  %v1751_v57 = vsel %vm439_vm0, %v5951_v49, 0 }
  0xfb   :  { %v5947_v43 = vor.u32 %v6588_v30, %v5946_v28 }
  0xfc   :  { %v1757_v52 = vsel %vm439_vm0, %v5959_v42, 0 }
  0xfd   :  { %v1748_v55 = vsel %vm439_vm0, %v5947_v43, 0 }
 0x100   :  { %v981_v60 = vpop.f32.mrf.mxu2 }
 0x101   :  { %v994_v0 = vpop.f32.mrf.mxu3  ;;  %v7241_v5 = vpop.f32.mrf.mxu0 }
 0x102   :  { %9541 = vst [vmem:[#allocation17_spill] sm:$0xff] %v7241_v5  ;;  %v7243_v9 = vpop.f32.mrf.mxu1 }
 0x103   :  { %9542 = vst [vmem:[#allocation18_spill] sm:$0xff] %v7243_v9 }
 0x104   :  { %5908 = vmatmul.msk.bf16.vlgmr.msrb.gmra.mxu0 %vm435_vm1, %v6995_v11  ;;  %5909 = vmatmul.msk.bf16.vlgmr.msrb.gmra.mxu1 %vm435_vm1, %v6995_v11 }
 0x105   :  { %5910 = vmatmul.msk.bf16.vlgmr.msrb.gmra.mxu2 %vm435_vm1, %v6995_v11  ;;  %1974 = vmatpush.bf16.msrb.mxu0 %v1736_v13  ;;  %v5972_v13 = vld [vmem:[#allocation2 + $0x140] sm:$0x30] }
 0x106   :  { %5911 = vmatmul.msk.bf16.vlgmr.msrb.gmra.mxu3 %vm435_vm1, %v6995_v11  ;;  %2000 = vmatpush.bf16.msrb.mxu2 %v1742_v10  ;;  %v6591_v10 = vld [vmem:[#allocation2 + $0x13c] sm:$0x30] }
 0x107   :  { %2013 = vmatpush.bf16.msrb.mxu3 %v1745_v12  ;;  %1987 = vmatpush.bf16.msrb.mxu1 %v1739_v16  ;;  %v6559_v12 = vld [vmem:[#allocation2 + $0x3c] sm:$0xf]  ;;  %v5962_v16 = vld [vmem:[#allocation2 + $0x30] sm:$0xf]  ;;  %v5971_v22 = vor.u32 %v6591_v10, %v5970_v7  ;;  %v5988_v7 = vld [vmem:[#allocation2 + $0x150] sm:$0x30] }
 0x108   :  { %v7257_v17 = vpop.f32.mrf.mxu2  ;;  %v5975_v25 = vor.u32 %v6559_v12, %v5972_v13  ;;  %v5978_v10 = vld [vmem:[#allocation2 + $0x40] sm:$0xf]  ;;  %v6592_v12 = vld [vmem:[#allocation2 + $0x144] sm:$0x30]  ;;  %v6560_v13 = vld [vmem:[#allocation2 + $0x44] sm:$0xf] }
 0x109   :  { %9543 = vst [vmem:[#allocation19_spill] sm:$0xff] %v7257_v17  ;;  %v7259_v18 = vpop.f32.mrf.mxu3  ;;  %v1007_v19 = vpop.f32.mrf.mxu0 }
 0x10a   :  { %9544 = vst [vmem:[#allocation20_spill] sm:$0xff] %v7259_v18  ;;  %v1020_v20 = vpop.f32.mrf.mxu1  ;;  %v6590_v19 = vld [vmem:[#allocation2 + $0x134] sm:$0x30]  ;;  %v1769_v42 = vsel %vm439_vm0, %v5975_v25, 0 }
 0x10b   :  { %v6558_v20 = vld [vmem:[#allocation2 + $0x34] sm:$0xf]  ;;  %v5963_v28 = vor.u32 %v6590_v19, %v5962_v16  ;;  %v5980_v16 = vld [vmem:[#allocation2 + $0x148] sm:$0x30] }
 0x10c   :  { %v5967_v36 = vor.u32 %v6558_v20, %v5964_v21 }
 0x10d   :  { %v1760_v43 = vsel %vm439_vm0, %v5963_v28, 0  ;;  %v5983_v28 = vor.u32 %v6560_v13, %v5980_v16  ;;  %v6594_v13 = vld [vmem:[#allocation2 + $0x154] sm:$0x30]  ;;  %v6562_v16 = vld [vmem:[#allocation2 + $0x54] sm:$0xf] }
 0x110   :  { %v1033_v11 = vpop.f32.mrf.mxu2 }
 0x111   :  { %v1046_v44 = vpop.f32.mrf.mxu3  ;;  %v7261_v45 = vpop.f32.mrf.mxu0  ;;  %v1766_v11 = vsel %vm439_vm0, %v5971_v22, 0  ;;  %v5979_v22 = vor.u32 %v6592_v12, %v5978_v10  ;;  %v6004_v10 = vld [vmem:[#allocation2 + $0x160] sm:$0x30]  ;;  %v5994_v12 = vld [vmem:[#allocation2 + $0x50] sm:$0xf] }
 0x112   :  { %9545 = vst [vmem:[#allocation21_spill] sm:$0xff] %v7261_v45  ;;  %v7265_v50 = vpop.f32.mrf.mxu1  ;;  %v1763_v44 = vsel %vm439_vm0, %v5967_v36, 0 }
 0x113   :  { %9546 = vst [vmem:[#allocation22_spill] sm:$0xff] %v7265_v50 }
 0x114   :  { %6168 = vmatmul.msk.bf16.vlgmr.msra.gmra.mxu0 %vm435_vm1, %v7263_v47  ;;  %6169 = vmatmul.msk.bf16.vlgmr.msra.gmra.mxu1 %vm435_vm1, %v7263_v47 }
 0x115   :  { %6170 = vmatmul.msk.bf16.vlgmr.msra.gmra.mxu2 %vm435_vm1, %v7263_v47  ;;  %2026 = vmatpush.bf16.msra.mxu0 %v1748_v55 }
 0x116   :  { %6171 = vmatmul.msk.bf16.vlgmr.msra.gmra.mxu3 %vm435_vm1, %v7263_v47  ;;  %2052 = vmatpush.bf16.msra.mxu2 %v1754_v51 }
 0x117   :  { %2065 = vmatpush.bf16.msra.mxu3 %v1757_v52  ;;  %2039 = vmatpush.bf16.msra.mxu1 %v1751_v57  ;;  %v5986_v57 = vld [vmem:[#allocation2 + $0x48] sm:$0xf] }
 0x118   :  { %v7279_v60 = vpop.f32.mrf.mxu2 }
 0x119   :  { %9547 = vst [vmem:[#allocation23_spill] sm:$0xff] %v7279_v60  ;;  %v7281_v62 = vpop.f32.mrf.mxu3  ;;  %v1059_v63 = vpop.f32.mrf.mxu0 }
 0x11a   :  { %9548 = vst [vmem:[#allocation24_spill] sm:$0xff] %v7281_v62  ;;  %v1072_v0 = vpop.f32.mrf.mxu1  ;;  %v6593_v63 = vld [vmem:[#allocation2 + $0x14c] sm:$0x30] }
 0x11b   :  { %v6561_v0 = vld [vmem:[#allocation2 + $0x4c] sm:$0xf]  ;;  %v5987_v19 = vor.u32 %v6593_v63, %v5986_v57  ;;  %v6002_v63 = vld [vmem:[#allocation2 + $0x58] sm:$0xf] }
 0x11c   :  { %v5991_v21 = vor.u32 %v6561_v0, %v5988_v7  ;;  %v6595_v0 = vld [vmem:[#allocation2 + $0x15c] sm:$0x30]  ;;  %v6563_v7 = vld [vmem:[#allocation2 + $0x5c] sm:$0xf] }
 0x11d   :  { %v1778_v36 = vsel %vm439_vm0, %v5987_v19, 0  ;;  %v5996_v19 = vld [vmem:[#allocation2 + $0x158] sm:$0x30] }
 0x120   :  { %v1085_v23 = vpop.f32.mrf.mxu2 }
 0x121   :  { %v1098_v30 = vpop.f32.mrf.mxu3  ;;  %v7283_v35 = vpop.f32.mrf.mxu0 }
 0x122   :  { %9549 = vst [vmem:[#allocation25_spill] sm:$0xff] %v7283_v35  ;;  %v7285_v37 = vpop.f32.mrf.mxu1 }
 0x123   :  { %9550 = vst [vmem:[#allocation26_spill] sm:$0xff] %v7285_v37 }
 0x124   :  { %6172 = vmatmul.msk.bf16.vlgmr.msrb.gmra.mxu0 %vm435_vm1, %v7263_v47  ;;  %6173 = vmatmul.msk.bf16.vlgmr.msrb.gmra.mxu1 %vm435_vm1, %v7263_v47 }
 0x125   :  { %6174 = vmatmul.msk.bf16.vlgmr.msrb.gmra.mxu2 %vm435_vm1, %v7263_v47  ;;  %2078 = vmatpush.bf16.msrb.mxu0 %v1760_v43  ;;  %v1775_v43 = vsel %vm439_vm0, %v5983_v28, 0 }
 0x126   :  { %6175 = vmatmul.msk.bf16.vlgmr.msrb.gmra.mxu3 %vm435_vm1, %v7263_v47  ;;  %2104 = vmatpush.bf16.msrb.mxu2 %v1766_v11  ;;  %v1781_v11 = vsel %vm439_vm0, %v5991_v21, 0 }
 0x127   :  { %2117 = vmatpush.bf16.msrb.mxu3 %v1769_v42  ;;  %2091 = vmatpush.bf16.msrb.mxu1 %v1763_v44  ;;  %v1772_v42 = vsel %vm439_vm0, %v5979_v22, 0  ;;  %v6007_v22 = vor.u32 %v6563_v7, %v6004_v10 }
 0x128   :  { %v7299_v49 = vpop.f32.mrf.mxu2 }
 0x129   :  { %9551 = vst [vmem:[#allocation27_spill] sm:$0xff] %v7299_v49  ;;  %v7301_v51 = vpop.f32.mrf.mxu3  ;;  %v1111_v52 = vpop.f32.mrf.mxu0 }
 0x12a   :  { %9552 = vst [vmem:[#allocation28_spill] sm:$0xff] %v7301_v51  ;;  %v1124_v55 = vpop.f32.mrf.mxu1 }
 0x130   :  { %v1137_v20 = vpop.f32.mrf.mxu2 }
 0x131   :  { %v1150_v23 = vpop.f32.mrf.mxu3  ;;  %v7303_v25 = vpop.f32.mrf.mxu0  ;;  %v6003_v20 = vor.u32 %v6595_v0, %v6002_v63 }
 0x132   :  { %9553 = vst [vmem:[#allocation29_spill] sm:$0xff] %v7303_v25  ;;  %v7305_v30 = vpop.f32.mrf.mxu1  ;;  %v5995_v23 = vor.u32 %v6594_v13, %v5994_v12  ;;  %v6018_v13 = vld [vmem:[#allocation2 + $0x68] sm:$0xf] }
 0x133   :  { %9554 = vst [vmem:[#allocation30_spill] sm:$0xff] %v7305_v30 }
 0x134   :  { %6176 = vmatmul.msk.bf16.vlgmr.msra.gmra.mxu0 %vm435_vm1, %v7263_v47  ;;  %6177 = vmatmul.msk.bf16.vlgmr.msra.gmra.mxu1 %vm435_vm1, %v7263_v47 }
 0x135   :  { %6178 = vmatmul.msk.bf16.vlgmr.msra.gmra.mxu2 %vm435_vm1, %v7263_v47  ;;  %2130 = vmatpush.bf16.msra.mxu0 %v1772_v42 }
 0x136   :  { %6179 = vmatmul.msk.bf16.vlgmr.msra.gmra.mxu3 %vm435_vm1, %v7263_v47  ;;  %2156 = vmatpush.bf16.msra.mxu2 %v1778_v36 }
 0x137   :  { %2169 = vmatpush.bf16.msra.mxu3 %v1781_v11  ;;  %2143 = vmatpush.bf16.msra.mxu1 %v1775_v43  ;;  %v5999_v11 = vor.u32 %v6562_v16, %v5996_v19  ;;  %v1790_v43 = vsel %vm439_vm0, %v6003_v20, 0  ;;  %v6597_v16 = vld [vmem:[#allocation2 + $0x16c] sm:$0x30]  ;;  %v6565_v19 = vld [vmem:[#allocation2 + $0x6c] sm:$0xf] }
 0x138   :  { %v7319_v44 = vpop.f32.mrf.mxu2  ;;  %v6020_v20 = vld [vmem:[#allocation2 + $0x170] sm:$0x30] }
 0x139   :  { %9555 = vst [vmem:[#allocation31_spill] sm:$0xff] %v7319_v44  ;;  %v7321_v52 = vpop.f32.mrf.mxu3  ;;  %v1163_v55 = vpop.f32.mrf.mxu0  ;;  %v1787_v63 = vsel %vm439_vm0, %v5999_v11, 0  ;;  %v6019_v11 = vor.u32 %v6597_v16, %v6018_v13 }
 0x13a   :  { %9556 = vst [vmem:[#allocation32_spill] sm:$0xff] %v7321_v52  ;;  %v1176_v57 = vpop.f32.mrf.mxu1  ;;  %v1793_v55 = vsel %vm439_vm0, %v6007_v22, 0  ;;  %v6596_v22 = vld [vmem:[#allocation2 + $0x164] sm:$0x30] }
 0x13b   :  { %v1784_v57 = vsel %vm439_vm0, %v5995_v23, 0  ;;  %v6564_v23 = vld [vmem:[#allocation2 + $0x64] sm:$0xf] }
 0x140   :  { %v1189_v21 = vpop.f32.mrf.mxu2 }
 0x141   :  { %v1202_v28 = vpop.f32.mrf.mxu3  ;;  %v7323_v36 = vpop.f32.mrf.mxu0  ;;  %v6010_v21 = vld [vmem:[#allocation2 + $0x60] sm:$0xf] }
 0x142   :  { %9557 = vst [vmem:[#allocation33_spill] sm:$0xff] %v7323_v36  ;;  %v7325_v42 = vpop.f32.mrf.mxu1  ;;  %v6012_v28 = vld [vmem:[#allocation2 + $0x168] sm:$0x30] }
 0x143   :  { %9558 = vst [vmem:[#allocation34_spill] sm:$0xff] %v7325_v42 }
 0x144   :  { %6180 = vmatmul.msk.bf16.vlgmr.msrb.gmra.mxu0 %vm435_vm1, %v7263_v47  ;;  %6181 = vmatmul.msk.bf16.vlgmr.msrb.gmra.mxu1 %vm435_vm1, %v7263_v47 }
 0x145   :  { %6182 = vmatmul.msk.bf16.vlgmr.msrb.gmra.mxu2 %vm435_vm1, %v7263_v47  ;;  %2182 = vmatpush.bf16.msrb.mxu0 %v1784_v57 }
 0x146   :  { %6183 = vmatmul.msk.bf16.vlgmr.msrb.gmra.mxu3 %vm435_vm1, %v7263_v47  ;;  %2208 = vmatpush.bf16.msrb.mxu2 %v1790_v43  ;;  %v6023_v43 = vor.u32 %v6565_v19, %v6020_v20 }
 0x147   :  { %2221 = vmatpush.bf16.msrb.mxu3 %v1793_v55  ;;  %2195 = vmatpush.bf16.msrb.mxu1 %v1787_v63  ;;  %v6011_v55 = vor.u32 %v6596_v22, %v6010_v21  ;;  %v6015_v63 = vor.u32 %v6564_v23, %v6012_v28  ;;  %v6034_v21 = vld [vmem:[#allocation2 + $0x78] sm:$0xf]  ;;  %v6599_v22 = vld [vmem:[#allocation2 + $0x17c] sm:$0x30]  ;;  %v6567_v23 = vld [vmem:[#allocation2 + $0x7c] sm:$0xf] }
 0x148   :  { %v7339_v0 = vpop.f32.mrf.mxu2  ;;  %v6036_v28 = vld [vmem:[#allocation2 + $0x180] sm:$0x30] }
 0x149   :  { %9559 = vst [vmem:[#allocation35_spill] sm:$0xff] %v7339_v0  ;;  %v7341_v7 = vpop.f32.mrf.mxu3  ;;  %v1215_v10 = vpop.f32.mrf.mxu0 }
 0x14a   :  { %9560 = vst [vmem:[#allocation36_spill] sm:$0xff] %v7341_v7  ;;  %v1228_v12 = vpop.f32.mrf.mxu1  ;;  %v1802_v10 = vsel %vm439_vm0, %v6019_v11, 0  ;;  %v1796_v7 = vsel %vm439_vm0, %v6011_v55, 0  ;;  %v6026_v11 = vld [vmem:[#allocation2 + $0x70] sm:$0xf] }
 0x14b   :  { %v1805_v12 = vsel %vm439_vm0, %v6023_v43, 0  ;;  %v6598_v43 = vld [vmem:[#allocation2 + $0x174] sm:$0x30]  ;;  %v6566_v55 = vld [vmem:[#allocation2 + $0x74] sm:$0xf] }
 0x150   :  { %v1241_v42 = vpop.f32.mrf.mxu2 }
 0x151   :  { %v1254_v57 = vpop.f32.mrf.mxu3  ;;  %v7343_v36 = vpop.f32.mrf.mxu0  ;;  %v1799_v42 = vsel %vm439_vm0, %v6015_v63, 0  ;;  %v6035_v63 = vor.u32 %v6599_v22, %v6034_v21 }
 0x152   :  { %9561 = vst [vmem:[#allocation37_spill] sm:$0xff] %v7343_v36  ;;  %v7345_v0 = vpop.f32.mrf.mxu1  ;;  %v6028_v57 = vld [vmem:[#allocation2 + $0x178] sm:$0x30] }
 0x153   :  { %9562 = vst [vmem:[#allocation38_spill] sm:$0xff] %v7345_v0 }
 0x154   :  { %6184 = vmatmul.msk.bf16.vlgmr.msra.gmra.mxu0 %vm435_vm1, %v7263_v47  ;;  %6185 = vmatmul.msk.bf16.vlgmr.msra.gmra.mxu1 %vm435_vm1, %v7263_v47 }
 0x155   :  { %6186 = vmatmul.msk.bf16.vlgmr.msra.gmra.mxu2 %vm435_vm1, %v7263_v47  ;;  %2234 = vmatpush.bf16.msra.mxu0 %v1796_v7 }
 0x156   :  { %6187 = vmatmul.msk.bf16.vlgmr.msra.gmra.mxu3 %vm435_vm1, %v7263_v47  ;;  %2260 = vmatpush.bf16.msra.mxu2 %v1802_v10  ;;  %v6039_v10 = vor.u32 %v6567_v23, %v6036_v28 }
 0x157   :  { %2273 = vmatpush.bf16.msra.mxu3 %v1805_v12  ;;  %2247 = vmatpush.bf16.msra.mxu1 %v1799_v42  ;;  %v6027_v12 = vor.u32 %v6598_v43, %v6026_v11  ;;  %v6031_v42 = vor.u32 %v6566_v55, %v6028_v57  ;;  %v6050_v11 = vld [vmem:[#allocation2 + $0x88] sm:$0xf]  ;;  %v6601_v43 = vld [vmem:[#allocation2 + $0x18c] sm:$0x30]  ;;  %v6569_v55 = vld [vmem:[#allocation2 + $0x8c] sm:$0xf] }
 0x158   :  { %v7359_v13 = vpop.f32.mrf.mxu2  ;;  %v6052_v57 = vld [vmem:[#allocation2 + $0x190] sm:$0x30] }
 0x159   :  { %9563 = vst [vmem:[#allocation39_spill] sm:$0xff] %v7359_v13  ;;  %v7361_v16 = vpop.f32.mrf.mxu3  ;;  %v1267_v19 = vpop.f32.mrf.mxu0 }
 0x15a   :  { %9564 = vst [vmem:[#allocation40_spill] sm:$0xff] %v7361_v16  ;;  %v1280_v20 = vpop.f32.mrf.mxu1  ;;  %v1814_v19 = vsel %vm439_vm0, %v6035_v63, 0  ;;  %v1808_v16 = vsel %vm439_vm0, %v6027_v12, 0  ;;  %v6042_v63 = vld [vmem:[#allocation2 + $0x80] sm:$0xf] }
 0x15b   :  { %v1817_v20 = vsel %vm439_vm0, %v6039_v10, 0  ;;  %v6600_v10 = vld [vmem:[#allocation2 + $0x184] sm:$0x30]  ;;  %v6568_v12 = vld [vmem:[#allocation2 + $0x84] sm:$0xf] }
 0x160   :  { %v1293_v0 = vpop.f32.mrf.mxu2 }
 0x161   :  { %v1306_v7 = vpop.f32.mrf.mxu3  ;;  %v7363_v36 = vpop.f32.mrf.mxu0  ;;  %v1811_v0 = vsel %vm439_vm0, %v6031_v42, 0  ;;  %v6051_v42 = vor.u32 %v6601_v43, %v6050_v11 }
 0x162   :  { %9565 = vst [vmem:[#allocation41_spill] sm:$0xff] %v7363_v36  ;;  %v7365_v13 = vpop.f32.mrf.mxu1  ;;  %v6044_v7 = vld [vmem:[#allocation2 + $0x188] sm:$0x30] }
 0x163   :  { %9566 = vst [vmem:[#allocation42_spill] sm:$0xff] %v7365_v13 }
 0x164   :  { %6188 = vmatmul.msk.bf16.vlgmr.msrb.gmra.mxu0 %vm435_vm1, %v7263_v47  ;;  %6189 = vmatmul.msk.bf16.vlgmr.msrb.gmra.mxu1 %vm435_vm1, %v7263_v47 }
 0x165   :  { %6190 = vmatmul.msk.bf16.vlgmr.msrb.gmra.mxu2 %vm435_vm1, %v7263_v47  ;;  %2286 = vmatpush.bf16.msrb.mxu0 %v1808_v16 }
 0x166   :  { %6191 = vmatmul.msk.bf16.vlgmr.msrb.gmra.mxu3 %vm435_vm1, %v7263_v47  ;;  %2312 = vmatpush.bf16.msrb.mxu2 %v1814_v19  ;;  %v6055_v19 = vor.u32 %v6569_v55, %v6052_v57 }
 0x167   :  { %2325 = vmatpush.bf16.msrb.mxu3 %v1817_v20  ;;  %2299 = vmatpush.bf16.msrb.mxu1 %v1811_v0  ;;  %v6043_v20 = vor.u32 %v6600_v10, %v6042_v63  ;;  %v6047_v0 = vor.u32 %v6568_v12, %v6044_v7  ;;  %v6066_v63 = vld [vmem:[#allocation2 + $0x98] sm:$0xf]  ;;  %v6603_v10 = vld [vmem:[#allocation2 + $0x19c] sm:$0x30]  ;;  %v6571_v12 = vld [vmem:[#allocation2 + $0x9c] sm:$0xf] }
 0x168   :  { %v7379_v21 = vpop.f32.mrf.mxu2  ;;  %v6068_v7 = vld [vmem:[#allocation2 + $0x1a0] sm:$0x30] }
 0x169   :  { %9567 = vst [vmem:[#allocation43_spill] sm:$0xff] %v7379_v21  ;;  %v7381_v22 = vpop.f32.mrf.mxu3  ;;  %v1319_v23 = vpop.f32.mrf.mxu0 }
 0x16a   :  { %9568 = vst [vmem:[#allocation44_spill] sm:$0xff] %v7381_v22  ;;  %v1332_v28 = vpop.f32.mrf.mxu1  ;;  %v1826_v23 = vsel %vm439_vm0, %v6051_v42, 0  ;;  %v1820_v22 = vsel %vm439_vm0, %v6043_v20, 0  ;;  %v6058_v42 = vld [vmem:[#allocation2 + $0x90] sm:$0xf] }
 0x16b   :  { %v1829_v28 = vsel %vm439_vm0, %v6055_v19, 0  ;;  %v6602_v19 = vld [vmem:[#allocation2 + $0x194] sm:$0x30]  ;;  %v6570_v20 = vld [vmem:[#allocation2 + $0x94] sm:$0xf] }
 0x170   :  { %v1345_v13 = vpop.f32.mrf.mxu2 }
 0x171   :  { %v1358_v16 = vpop.f32.mrf.mxu3  ;;  %v7383_v36 = vpop.f32.mrf.mxu0  ;;  %v1823_v13 = vsel %vm439_vm0, %v6047_v0, 0  ;;  %v6067_v0 = vor.u32 %v6603_v10, %v6066_v63 }
 0x172   :  { %9569 = vst [vmem:[#allocation45_spill] sm:$0xff] %v7383_v36  ;;  %v7385_v21 = vpop.f32.mrf.mxu1  ;;  %v6060_v16 = vld [vmem:[#allocation2 + $0x198] sm:$0x30] }
 0x173   :  { %9570 = vst [vmem:[#allocation46_spill] sm:$0xff] %v7385_v21 }
 0x174   :  { %6192 = vmatmul.msk.bf16.vlgmr.msra.gmra.mxu0 %vm435_vm1, %v7263_v47  ;;  %6193 = vmatmul.msk.bf16.vlgmr.msra.gmra.mxu1 %vm435_vm1, %v7263_v47 }
 0x175   :  { %6194 = vmatmul.msk.bf16.vlgmr.msra.gmra.mxu2 %vm435_vm1, %v7263_v47  ;;  %2338 = vmatpush.bf16.msra.mxu0 %v1820_v22 }
 0x176   :  { %6195 = vmatmul.msk.bf16.vlgmr.msra.gmra.mxu3 %vm435_vm1, %v7263_v47  ;;  %2364 = vmatpush.bf16.msra.mxu2 %v1826_v23  ;;  %v6071_v23 = vor.u32 %v6571_v12, %v6068_v7 }
 0x177   :  { %2377 = vmatpush.bf16.msra.mxu3 %v1829_v28  ;;  %2351 = vmatpush.bf16.msra.mxu1 %v1823_v13  ;;  %v6059_v28 = vor.u32 %v6602_v19, %v6058_v42  ;;  %v6063_v13 = vor.u32 %v6570_v20, %v6060_v16  ;;  %v6082_v42 = vld [vmem:[#allocation2 + $0xa8] sm:$0xf]  ;;  %v6605_v19 = vld [vmem:[#allocation2 + $0x1ac] sm:$0x30]  ;;  %v6573_v20 = vld [vmem:[#allocation2 + $0xac] sm:$0xf] }
 0x178   :  { %v7399_v11 = vpop.f32.mrf.mxu2  ;;  %v6084_v16 = vld [vmem:[#allocation2 + $0x1b0] sm:$0x30] }
 0x179   :  { %9571 = vst [vmem:[#allocation47_spill] sm:$0xff] %v7399_v11  ;;  %v7401_v43 = vpop.f32.mrf.mxu3  ;;  %v1371_v55 = vpop.f32.mrf.mxu0 }
 0x17a   :  { %9572 = vst [vmem:[#allocation48_spill] sm:$0xff] %v7401_v43  ;;  %v1384_v57 = vpop.f32.mrf.mxu1  ;;  %v1838_v55 = vsel %vm439_vm0, %v6067_v0, 0  ;;  %v1832_v43 = vsel %vm439_vm0, %v6059_v28, 0  ;;  %v6074_v0 = vld [vmem:[#allocation2 + $0xa0] sm:$0xf] }
 0x17b   :  { %v1841_v57 = vsel %vm439_vm0, %v6071_v23, 0  ;;  %v6604_v23 = vld [vmem:[#allocation2 + $0x1a4] sm:$0x30]  ;;  %v6572_v28 = vld [vmem:[#allocation2 + $0xa4] sm:$0xf] }
 0x180   :  { %v1397_v21 = vpop.f32.mrf.mxu2 }
 0x181   :  { %v1410_v22 = vpop.f32.mrf.mxu3  ;;  %v7403_v36 = vpop.f32.mrf.mxu0  ;;  %v1835_v21 = vsel %vm439_vm0, %v6063_v13, 0  ;;  %v6083_v13 = vor.u32 %v6605_v19, %v6082_v42 }
 0x182   :  { %9573 = vst [vmem:[#allocation49_spill] sm:$0xff] %v7403_v36  ;;  %v7405_v11 = vpop.f32.mrf.mxu1  ;;  %v6076_v22 = vld [vmem:[#allocation2 + $0x1a8] sm:$0x30] }
 0x183   :  { %9574 = vst [vmem:[#allocation50_spill] sm:$0xff] %v7405_v11 }
 0x184   :  { %6196 = vmatmul.msk.bf16.vlgmr.msrb.gmra.mxu0 %vm435_vm1, %v7263_v47  ;;  %6197 = vmatmul.msk.bf16.vlgmr.msrb.gmra.mxu1 %vm435_vm1, %v7263_v47 }
 0x185   :  { %6198 = vmatmul.msk.bf16.vlgmr.msrb.gmra.mxu2 %vm435_vm1, %v7263_v47  ;;  %2390 = vmatpush.bf16.msrb.mxu0 %v1832_v43 }
 0x186   :  { %6199 = vmatmul.msk.bf16.vlgmr.msrb.gmra.mxu3 %vm435_vm1, %v7263_v47  ;;  %2416 = vmatpush.bf16.msrb.mxu2 %v1838_v55  ;;  %v6087_v55 = vor.u32 %v6573_v20, %v6084_v16 }
 0x187   :  { %2429 = vmatpush.bf16.msrb.mxu3 %v1841_v57  ;;  %2403 = vmatpush.bf16.msrb.mxu1 %v1835_v21  ;;  %v6075_v57 = vor.u32 %v6604_v23, %v6074_v0  ;;  %v6079_v21 = vor.u32 %v6572_v28, %v6076_v22  ;;  %v6098_v0 = vld [vmem:[#allocation2 + $0xb8] sm:$0xf]  ;;  %v6607_v23 = vld [vmem:[#allocation2 + $0x1bc] sm:$0x30]  ;;  %v6575_v28 = vld [vmem:[#allocation2 + $0xbc] sm:$0xf] }
 0x188   :  { %v7419_v63 = vpop.f32.mrf.mxu2  ;;  %v6100_v22 = vld [vmem:[#allocation2 + $0x1c0] sm:$0x30] }
 0x189   :  { %9575 = vst [vmem:[#allocation51_spill] sm:$0xff] %v7419_v63  ;;  %v7421_v10 = vpop.f32.mrf.mxu3  ;;  %v1423_v12 = vpop.f32.mrf.mxu0 }
 0x18a   :  { %9576 = vst [vmem:[#allocation52_spill] sm:$0xff] %v7421_v10  ;;  %v1436_v7 = vpop.f32.mrf.mxu1  ;;  %v1850_v12 = vsel %vm439_vm0, %v6083_v13, 0  ;;  %v1844_v10 = vsel %vm439_vm0, %v6075_v57, 0  ;;  %v6090_v13 = vld [vmem:[#allocation2 + $0xb0] sm:$0xf] }
 0x18b   :  { %v1853_v7 = vsel %vm439_vm0, %v6087_v55, 0  ;;  %v6606_v55 = vld [vmem:[#allocation2 + $0x1b4] sm:$0x30]  ;;  %v6574_v57 = vld [vmem:[#allocation2 + $0xb4] sm:$0xf] }
 0x190   :  { %v1449_v11 = vpop.f32.mrf.mxu2 }
 0x191   :  { %v1462_v43 = vpop.f32.mrf.mxu3  ;;  %v7423_v36 = vpop.f32.mrf.mxu0  ;;  %v1847_v11 = vsel %vm439_vm0, %v6079_v21, 0  ;;  %v6099_v21 = vor.u32 %v6607_v23, %v6098_v0 }
 0x192   :  { %v7425_v63 = vpop.f32.mrf.mxu1  ;;  %v6092_v43 = vld [vmem:[#allocation2 + $0x1b8] sm:$0x30] }
 0x194   :  { %6200 = vmatmul.msk.bf16.vlgmr.msra.gmra.mxu0 %vm435_vm1, %v7263_v47  ;;  %6201 = vmatmul.msk.bf16.vlgmr.msra.gmra.mxu1 %vm435_vm1, %v7263_v47 }
 0x195   :  { %6202 = vmatmul.msk.bf16.vlgmr.msra.gmra.mxu2 %vm435_vm1, %v7263_v47  ;;  %2442 = vmatpush.bf16.msra.mxu0 %v1844_v10 }
 0x196   :  { %6203 = vmatmul.msk.bf16.vlgmr.msra.gmra.mxu3 %vm435_vm1, %v7263_v47  ;;  %2468 = vmatpush.bf16.msra.mxu2 %v1850_v12  ;;  %v6103_v12 = vor.u32 %v6575_v28, %v6100_v22 }
 0x197   :  { %2481 = vmatpush.bf16.msra.mxu3 %v1853_v7  ;;  %2455 = vmatpush.bf16.msra.mxu1 %v1847_v11  ;;  %v6091_v7 = vor.u32 %v6606_v55, %v6090_v13  ;;  %v6095_v11 = vor.u32 %v6574_v57, %v6092_v43  ;;  %v6114_v13 = vld [vmem:[#allocation2 + $0xc8] sm:$0xf]  ;;  %v6609_v55 = vld [vmem:[#allocation2 + $0x1cc] sm:$0x30]  ;;  %v6577_v57 = vld [vmem:[#allocation2 + $0xcc] sm:$0xf] }
 0x198   :  { %v7439_v42 = vpop.f32.mrf.mxu2  ;;  %v6116_v43 = vld [vmem:[#allocation2 + $0x1d0] sm:$0x30] }
 0x199   :  { %v7441_v19 = vpop.f32.mrf.mxu3  ;;  %v1926_v20 = vpop.f32.mrf.mxu0  ;;  %v1856_v25 = vsel %vm439_vm0, %v6091_v7, 0  ;;  %v6576_v7 = vld [vmem:[#allocation2 + $0xc4] sm:$0xf] }
 0x19a   :  { %v1939_v16 = vpop.f32.mrf.mxu1  ;;  %v1862_v20 = vsel %vm439_vm0, %v6099_v21, 0  ;;  %v6106_v21 = vld [vmem:[#allocation2 + $0xc0] sm:$0xf] }
 0x19b   :  { %v1865_v16 = vsel %vm439_vm0, %v6103_v12, 0  ;;  %v6608_v12 = vld [vmem:[#allocation2 + $0x1c4] sm:$0x30] }
 0x1a0   :  { %v1952_v52 = vpop.f32.mrf.mxu2 }
 0x1a1   :  { %v1965_v10 = vpop.f32.mrf.mxu3  ;;  %v7443_v44 = vpop.f32.mrf.mxu0  ;;  %v1859_v52 = vsel %vm439_vm0, %v6095_v11, 0  ;;  %v6115_v11 = vor.u32 %v6609_v55, %v6114_v13 }
 0x1a2   :  { %v7445_v30 = vpop.f32.mrf.mxu1  ;;  %v6108_v10 = vld [vmem:[#allocation2 + $0x1c8] sm:$0x30] }
 0x1a4   :  { %6204 = vmatmul.msk.bf16.vlgmr.msrb.gmra.mxu0 %vm435_vm1, %v7263_v47  ;;  %6205 = vmatmul.msk.bf16.vlgmr.msrb.gmra.mxu1 %vm435_vm1, %v7263_v47 }
 0x1a5   :  { %6206 = vmatmul.msk.bf16.vlgmr.msrb.gmra.mxu2 %vm435_vm1, %v7263_v47  ;;  %2494 = vmatpush.bf16.msrb.mxu0 %v1856_v25 }
 0x1a6   :  { %6207 = vmatmul.msk.bf16.vlgmr.msrb.gmra.mxu3 %vm435_vm1, %v7263_v47  ;;  %2520 = vmatpush.bf16.msrb.mxu2 %v1862_v20  ;;  %v6119_v20 = vor.u32 %v6577_v57, %v6116_v43 }
 0x1a7   :  { %2533 = vmatpush.bf16.msrb.mxu3 %v1865_v16  ;;  %2507 = vmatpush.bf16.msrb.mxu1 %v1859_v52  ;;  %v6107_v16 = vor.u32 %v6608_v12, %v6106_v21  ;;  %v6111_v52 = vor.u32 %v6576_v7, %v6108_v10  ;;  %v6130_v21 = vld [vmem:[#allocation2 + $0xd8] sm:$0xf]  ;;  %v6611_v12 = vld [vmem:[#allocation2 + $0x1dc] sm:$0x30]  ;;  %v6579_v7 = vld [vmem:[#allocation2 + $0xdc] sm:$0xf] }
 0x1a8   :  { %v7459_v0 = vpop.f32.mrf.mxu2  ;;  %v6132_v10 = vld [vmem:[#allocation2 + $0x1e0] sm:$0x30] }
 0x1a9   :  { %v7461_v23 = vpop.f32.mrf.mxu3  ;;  %v1978_v28 = vpop.f32.mrf.mxu0  ;;  %v1868_v35 = vsel %vm439_vm0, %v6107_v16, 0  ;;  %v6578_v16 = vld [vmem:[#allocation2 + $0xd4] sm:$0xf] }
 0x1aa   :  { %v1991_v22 = vpop.f32.mrf.mxu1  ;;  %v1874_v28 = vsel %vm439_vm0, %v6115_v11, 0  ;;  %v6122_v11 = vld [vmem:[#allocation2 + $0xd0] sm:$0xf] }
 0x1ab   :  { %v1877_v22 = vsel %vm439_vm0, %v6119_v20, 0  ;;  %v6610_v20 = vld [vmem:[#allocation2 + $0x1d4] sm:$0x30] }
 0x1b0   :  { %v2004_v51 = vpop.f32.mrf.mxu2 }
 0x1b1   :  { %v2017_v25 = vpop.f32.mrf.mxu3  ;;  %v7463_v49 = vpop.f32.mrf.mxu0  ;;  %v1871_v51 = vsel %vm439_vm0, %v6111_v52, 0  ;;  %v6131_v52 = vor.u32 %v6611_v12, %v6130_v21 }
 0x1b2   :  { %v7465_v37 = vpop.f32.mrf.mxu1  ;;  %v6124_v25 = vld [vmem:[#allocation2 + $0x1d8] sm:$0x30] }
 0x1b4   :  { %6208 = vmatmul.msk.bf16.vlgmr.msra.gmra.mxu0 %vm435_vm1, %v7263_v47  ;;  %6209 = vmatmul.msk.bf16.vlgmr.msra.gmra.mxu1 %vm435_vm1, %v7263_v47 }
 0x1b5   :  { %6210 = vmatmul.msk.bf16.vlgmr.msra.gmra.mxu2 %vm435_vm1, %v7263_v47  ;;  %2546 = vmatpush.bf16.msra.mxu0 %v1868_v35 }
 0x1b6   :  { %6211 = vmatmul.msk.bf16.vlgmr.msra.gmra.mxu3 %vm435_vm1, %v7263_v47  ;;  %2572 = vmatpush.bf16.msra.mxu2 %v1874_v28  ;;  %v6135_v28 = vor.u32 %v6579_v7, %v6132_v10 }
 0x1b7   :  { %2585 = vmatpush.bf16.msra.mxu3 %v1877_v22  ;;  %2559 = vmatpush.bf16.msra.mxu1 %v1871_v51  ;;  %v6123_v22 = vor.u32 %v6610_v20, %v6122_v11  ;;  %v6127_v51 = vor.u32 %v6578_v16, %v6124_v25  ;;  %v6146_v11 = vld [vmem:[#allocation2 + $0xe8] sm:$0xf]  ;;  %v6613_v20 = vld [vmem:[#allocation2 + $0x1ec] sm:$0x30]  ;;  %v6581_v16 = vld [vmem:[#allocation2 + $0xec] sm:$0xf] }
 0x1b8   :  { %v7479_v13 = vpop.f32.mrf.mxu2  ;;  %v6148_v25 = vld [vmem:[#allocation2 + $0x1f0] sm:$0x30] }
 0x1b9   :  { %v7481_v55 = vpop.f32.mrf.mxu3  ;;  %v2030_v57 = vpop.f32.mrf.mxu0  ;;  %v1880_v45 = vsel %vm439_vm0, %v6123_v22, 0  ;;  %v6580_v22 = vld [vmem:[#allocation2 + $0xe4] sm:$0xf] }
 0x1ba   :  { %v2043_v43 = vpop.f32.mrf.mxu1  ;;  %v1886_v57 = vsel %vm439_vm0, %v6131_v52, 0  ;;  %v6138_v52 = vld [vmem:[#allocation2 + $0xe0] sm:$0xf] }
 0x1bb   :  { %v1889_v43 = vsel %vm439_vm0, %v6135_v28, 0  ;;  %v6612_v28 = vld [vmem:[#allocation2 + $0x1e4] sm:$0x30] }
 0x1c0   :  { %v2056_v62 = vpop.f32.mrf.mxu2 }
 0x1c1   :  { %v2069_v35 = vpop.f32.mrf.mxu3  ;;  %v7483_v60 = vpop.f32.mrf.mxu0  ;;  %v1883_v62 = vsel %vm439_vm0, %v6127_v51, 0  ;;  %v6147_v51 = vor.u32 %v6613_v20, %v6146_v11 }
 0x1c2   :  { %v7485_v50 = vpop.f32.mrf.mxu1  ;;  %v6140_v35 = vld [vmem:[#allocation2 + $0x1e8] sm:$0x30] }
 0x1c4   :  { %6212 = vmatmul.msk.bf16.vlgmr.msrb.gmra.mxu0 %vm435_vm1, %v7263_v47  ;;  %6213 = vmatmul.msk.bf16.vlgmr.msrb.gmra.mxu1 %vm435_vm1, %v7263_v47 }
 0x1c5   :  { %6214 = vmatmul.msk.bf16.vlgmr.msrb.gmra.mxu2 %vm435_vm1, %v7263_v47  ;;  %2598 = vmatpush.bf16.msrb.mxu0 %v1880_v45 }
 0x1c6   :  { %6215 = vmatmul.msk.bf16.vlgmr.msrb.gmra.mxu3 %vm435_vm1, %v7263_v47  ;;  %2624 = vmatpush.bf16.msrb.mxu2 %v1886_v57  ;;  %v6151_v57 = vor.u32 %v6581_v16, %v6148_v25 }
 0x1c7   :  { %2637 = vmatpush.bf16.msrb.mxu3 %v1889_v43  ;;  %2611 = vmatpush.bf16.msrb.mxu1 %v1883_v62  ;;  %v6139_v43 = vor.u32 %v6612_v28, %v6138_v52  ;;  %v6143_v62 = vor.u32 %v6580_v22, %v6140_v35  ;;  %v6162_v52 = vld [vmem:[#allocation2 + $0xf8] sm:$0xf]  ;;  %v6615_v28 = vld [vmem:[#allocation2 + $0x1fc] sm:$0x30]  ;;  %v6583_v22 = vld [vmem:[#allocation2 + $0xfc] sm:$0xf] }
 0x1c8   :  { %v7499_v21 = vpop.f32.mrf.mxu2  ;;  %v6164_v35 = vld [vmem:[#allocation2 + $0x200] sm:$0x30] }
 0x1c9   :  { %v7501_v12 = vpop.f32.mrf.mxu3  ;;  %v2082_v7 = vpop.f32.mrf.mxu0  ;;  %v1892_v5 = vsel %vm439_vm0, %v6139_v43, 0  ;;  %v6582_v43 = vld [vmem:[#allocation2 + $0xf4] sm:$0xf] }
 0x1ca   :  { %v2095_v10 = vpop.f32.mrf.mxu1  ;;  %v1898_v7 = vsel %vm439_vm0, %v6147_v51, 0  ;;  %v6154_v51 = vld [vmem:[#allocation2 + $0xf0] sm:$0xf] }
 0x1cb   :  { %v1901_v10 = vsel %vm439_vm0, %v6151_v57, 0  ;;  %v6614_v57 = vld [vmem:[#allocation2 + $0x1f4] sm:$0x30] }
 0x1d0   :  { %v2108_v18 = vpop.f32.mrf.mxu2 }
 0x1d1   :  { %v2121_v45 = vpop.f32.mrf.mxu3  ;;  %v7503_v17 = vpop.f32.mrf.mxu0  ;;  %v1895_v18 = vsel %vm439_vm0, %v6143_v62, 0  ;;  %v6163_v62 = vor.u32 %v6615_v28, %v6162_v52 }
 0x1d2   :  { %v7505_v9 = vpop.f32.mrf.mxu1  ;;  %v6156_v45 = vld [vmem:[#allocation2 + $0x1f8] sm:$0x30] }
 0x1d4   :  { %6216 = vmatmul.msk.bf16.vlgmr.msra.gmra.mxu0 %vm435_vm1, %v7263_v47  ;;  %6217 = vmatmul.msk.bf16.vlgmr.msra.gmra.mxu1 %vm435_vm1, %v7263_v47 }
 0x1d5   :  { %6218 = vmatmul.msk.bf16.vlgmr.msra.gmra.mxu2 %vm435_vm1, %v7263_v47  ;;  %2650 = vmatpush.bf16.msra.mxu0 %v1892_v5 }
 0x1d6   :  { %6219 = vmatmul.msk.bf16.vlgmr.msra.gmra.mxu3 %vm435_vm1, %v7263_v47  ;;  %2676 = vmatpush.bf16.msra.mxu2 %v1898_v7  ;;  %v6167_v7 = vor.u32 %v6583_v22, %v6164_v35 }
 0x1d7   :  { %2689 = vmatpush.bf16.msra.mxu3 %v1901_v10  ;;  %2663 = vmatpush.bf16.msra.mxu1 %v1895_v18  ;;  %v6155_v10 = vor.u32 %v6614_v57, %v6154_v51  ;;  %v6159_v18 = vor.u32 %v6582_v43, %v6156_v45  ;;  %v6242_v51 = vld [vmem:[#allocation2 + $0x10] sm:$0xf]  ;;  %v6713_v57 = vld [vmem:[#allocation2 + $0x114] sm:$0x30]  ;;  %v6681_v43 = vld [vmem:[#allocation2 + $0x14] sm:$0xf] }
 0x1d8   :  { %v7519_v11 = vpop.f32.mrf.mxu2  ;;  %v6244_v45 = vld [vmem:[#allocation2 + $0x118] sm:$0x30] }
 0x1d9   :  { %v7521_v20 = vpop.f32.mrf.mxu3  ;;  %v2134_v16 = vpop.f32.mrf.mxu0  ;;  %v1904_v27 = vsel %vm439_vm0, %v6155_v10, 0  ;;  %v6680_v10 = vld [vmem:[#allocation2 + $0xc] sm:$0xf] }
 0x1da   :  { %v2147_v25 = vpop.f32.mrf.mxu1  ;;  %v1910_v16 = vsel %vm439_vm0, %v6163_v62, 0  ;;  %v6234_v62 = vld [vmem:[#allocation2 + $0x8] sm:$0xf] }
 0x1db   :  { %v1913_v25 = vsel %vm439_vm0, %v6167_v7, 0  ;;  %v6712_v7 = vld [vmem:[#allocation2 + $0x10c] sm:$0x30] }
 0x1e0   :  { %v2160_v41 = vpop.f32.mrf.mxu2 }
 0x1e1   :  { %v2173_v5 = vpop.f32.mrf.mxu3  ;;  %v7523_v40 = vpop.f32.mrf.mxu0  ;;  %v1907_v41 = vsel %vm439_vm0, %v6159_v18, 0  ;;  %v6243_v18 = vor.u32 %v6713_v57, %v6242_v51 }
 0x1e2   :  { %v7525_v29 = vpop.f32.mrf.mxu1  ;;  %v6236_v5 = vld [vmem:[#allocation2 + $0x110] sm:$0x30] }
 0x1e4   :  { %6220 = vmatmul.msk.bf16.vlgmr.msrb.gmra.mxu0 %vm435_vm1, %v7263_v47  ;;  %6221 = vmatmul.msk.bf16.vlgmr.msrb.gmra.mxu1 %vm435_vm1, %v7263_v47 }
 0x1e5   :  { %6222 = vmatmul.msk.bf16.vlgmr.msrb.gmra.mxu2 %vm435_vm1, %v7263_v47  ;;  %2702 = vmatpush.bf16.msrb.mxu0 %v1904_v27 }
 0x1e6   :  { %6223 = vmatmul.msk.bf16.vlgmr.msrb.gmra.mxu3 %vm435_vm1, %v7263_v47  ;;  %2728 = vmatpush.bf16.msrb.mxu2 %v1910_v16  ;;  %v6247_v16 = vor.u32 %v6681_v43, %v6244_v45 }
 0x1e7   :  { %2741 = vmatpush.bf16.msrb.mxu3 %v1913_v25  ;;  %2715 = vmatpush.bf16.msrb.mxu1 %v1907_v41  ;;  %v6235_v25 = vor.u32 %v6712_v7, %v6234_v62  ;;  %v6239_v41 = vor.u32 %v6680_v10, %v6236_v5  ;;  %v6258_v62 = vld [vmem:[#allocation2 + $0x20] sm:$0xf]  ;;  %v6715_v7 = vld [vmem:[#allocation2 + $0x124] sm:$0x30]  ;;  %v6683_v10 = vld [vmem:[#allocation2 + $0x24] sm:$0xf] }
 0x1e8   :  { %v7539_v52 = vpop.f32.mrf.mxu2  ;;  %v6260_v5 = vld [vmem:[#allocation2 + $0x128] sm:$0x30] }
 0x1e9   :  { %9577 = vst [vmem:[#allocation53_spill] sm:$0xff] %v7539_v52  ;;  %v7541_v28 = vpop.f32.mrf.mxu3  ;;  %v2186_v22 = vpop.f32.mrf.mxu0 }
 0x1ea   :  { %9578 = vst [vmem:[#allocation54_spill] sm:$0xff] %v7541_v28  ;;  %v2199_v35 = vpop.f32.mrf.mxu1  ;;  %v3079_v22 = vsel %vm439_vm0, %v6243_v18, 0  ;;  %v3073_v28 = vsel %vm439_vm0, %v6235_v25, 0  ;;  %v6250_v18 = vld [vmem:[#allocation2 + $0x18] sm:$0xf] }
 0x1eb   :  { %v3082_v35 = vsel %vm439_vm0, %v6247_v16, 0  ;;  %v6714_v16 = vld [vmem:[#allocation2 + $0x11c] sm:$0x30]  ;;  %v6682_v25 = vld [vmem:[#allocation2 + $0x1c] sm:$0xf] }
 0x1f0   :  { %v2212_v4 = vpop.f32.mrf.mxu2 }
 0x1f1   :  { %v2225_v27 = vpop.f32.mrf.mxu3  ;;  %v7543_v1 = vpop.f32.mrf.mxu0  ;;  %v3076_v4 = vsel %vm439_vm0, %v6239_v41, 0  ;;  %v6259_v41 = vor.u32 %v6715_v7, %v6258_v62 }
 0x1f2   :  { %9579 = vst [vmem:[#allocation55_spill] sm:$0xff] %v7543_v1  ;;  %v7545_v52 = vpop.f32.mrf.mxu1  ;;  %v6252_v27 = vld [vmem:[#allocation2 + $0x120] sm:$0x30] }
 0x1f3   :  { %9580 = vst [vmem:[#allocation56_spill] sm:$0xff] %v7545_v52 }
 0x1f4   :  { %6224 = vmatmul.msk.bf16.vlgmr.msra.gmra.mxu0 %vm435_vm1, %v7263_v47  ;;  %6225 = vmatmul.msk.bf16.vlgmr.msra.gmra.mxu1 %vm435_vm1, %v7263_v47 }
 0x1f5   :  { %6226 = vmatmul.msk.bf16.vlgmr.msra.gmra.mxu2 %vm435_vm1, %v7263_v47  ;;  %3271 = vmatpush.bf16.msra.mxu0 %v3073_v28 }
 0x1f6   :  { %6227 = vmatmul.msk.bf16.vlgmr.msra.gmra.mxu3 %vm435_vm1, %v7263_v47  ;;  %3297 = vmatpush.bf16.msra.mxu2 %v3079_v22  ;;  %v6263_v22 = vor.u32 %v6683_v10, %v6260_v5 }
 0x1f7   :  { %3310 = vmatpush.bf16.msra.mxu3 %v3082_v35  ;;  %3284 = vmatpush.bf16.msra.mxu1 %v3076_v4  ;;  %v6251_v35 = vor.u32 %v6714_v16, %v6250_v18  ;;  %v6255_v4 = vor.u32 %v6682_v25, %v6252_v27  ;;  %v6274_v16 = vld [vmem:[#allocation2 + $0x30] sm:$0xf]  ;;  %v6717_v25 = vld [vmem:[#allocation2 + $0x134] sm:$0x30]  ;;  %v6685_v27 = vld [vmem:[#allocation2 + $0x34] sm:$0xf] }
 0x1f8   :  { %v7559_v51 = vpop.f32.mrf.mxu2 }
 0x1f9   :  { %9581 = vst [vmem:[#allocation57_spill] sm:$0xff] %v7559_v51  ;;  %v7561_v57 = vpop.f32.mrf.mxu3  ;;  %v2238_v43 = vpop.f32.mrf.mxu0  ;;  %v3091_v51 = vsel %vm439_vm0, %v6259_v41, 0  ;;  %v3085_v62 = vsel %vm439_vm0, %v6251_v35, 0  ;;  %v3088_v7 = vsel %vm439_vm0, %v6255_v4, 0  ;;  %v6276_v41 = vld [vmem:[#allocation2 + $0x138] sm:$0x30] }
 0x1fa   :  { %9582 = vst [vmem:[#allocation58_spill] sm:$0xff] %v7561_v57  ;;  %v2251_v45 = vpop.f32.mrf.mxu1  ;;  %v4160_v43 = vld [vmem:[%s9533_s2] sm:$0xff]  ;;  %v6967_v57 = vmov 0   ;;  %v6716_v35 = vld [vmem:[#allocation2 + $0x12c] sm:$0x30]  ;;  %s6968_s2 = smov [#allocation7]  }
 0x1fb   :  { %6752 = vset.pattern.permute.xlu0 %v6967_v57  ;;  %v6268_v4 = vld [vmem:[#allocation2 + $0x130] sm:$0x30]  ;;  %s5579_s26 = sshll.u32 %s6968_s2, 4  ;;  %s5580_s26 = int_to_ptr.vmem [resolvable:$true] %s5579_s26 }
 0x1fc   :  { %4163 = vperm.xlu0 %6752, %v4160_v43   ;;  %v6275_v43 = vor.u32 %v6717_v25, %v6274_v16 }
 0x200   :  { %v2264_v52 = vpop.f32.mrf.mxu2 }
 0x201   :  { %v2277_v28 = vpop.f32.mrf.mxu3  ;;  %v7563_v1 = vpop.f32.mrf.mxu0  ;;  %v3094_v52 = vsel %vm439_vm0, %v6263_v22, 0  ;;  %v6266_v22 = vld [vmem:[#allocation2 + $0x28] sm:$0xf] }
 0x202   :  { %9583 = vst [vmem:[#allocation59_spill] sm:$0xff] %v7563_v1  ;;  %v7568_v45 = vpop.f32.mrf.mxu1  ;;  %v6684_v28 = vld [vmem:[#allocation2 + $0x2c] sm:$0xf] }
 0x203   :  { %9584 = vst [vmem:[#allocation60_spill] sm:$0xff] %v7568_v45 }
 0x204   :  { %6228 = vmatmul.msk.bf16.vlgmr.msrb.gmra.mxu0 %vm435_vm1, %v7263_v47  ;;  %6229 = vmatmul.msk.bf16.vlgmr.msrb.gmra.mxu1 %vm435_vm1, %v7263_v47 }
 0x205   :  { %6230 = vmatmul.msk.bf16.vlgmr.msrb.gmra.mxu2 %vm435_vm1, %v7263_v47  ;;  %3323 = vmatpush.bf16.msrb.mxu0 %v3085_v62 }
 0x206   :  { %6231 = vmatmul.msk.bf16.vlgmr.msrb.gmra.mxu3 %vm435_vm1, %v7263_v47  ;;  %3349 = vmatpush.bf16.msrb.mxu2 %v3091_v51  ;;  %v6279_v51 = vor.u32 %v6685_v27, %v6276_v41 }
 0x207   :  { %3362 = vmatpush.bf16.msrb.mxu3 %v3094_v52  ;;  %3336 = vmatpush.bf16.msrb.mxu1 %v3088_v7  ;;  %v6267_v52 = vor.u32 %v6716_v35, %v6266_v22  ;;  %v7588_v7 = vld [vmem:[#allocation5 + $0x8] sm:$0xf] }
 0x208   :  { %v7582_v57 = vpop.f32.mrf.mxu2 }
 0x209   :  { %9585 = vst [vmem:[#allocation61_spill] sm:$0xff] %v7582_v57  ;;  %v7584_v10 = vpop.f32.mrf.mxu3  ;;  %v2290_v5 = vpop.f32.mrf.mxu0  ;;  %v3106_v57 = vsel %vm439_vm0, %v6279_v51, 0  ;;  %v3097_v16 = vsel %vm439_vm0, %v6267_v52, 0  ;;  %v6282_v51 = vld [vmem:[#allocation2 + $0x38] sm:$0xf] }
 0x20a   :  { %9586 = vst [vmem:[#allocation62_spill] sm:$0xff] %v7584_v10  ;;  %v2303_v18 = vpop.f32.mrf.mxu1  ;;  %v6271_v10 = vor.u32 %v6684_v28, %v6268_v4  ;;  %v6290_v28 = vld [vmem:[#allocation2 + $0x40] sm:$0xf]  ;;  %v6719_v4 = vld [vmem:[#allocation2 + $0x144] sm:$0x30] }
 0x20b   :  { %v3103_v18 = vsel %vm439_vm0, %v6275_v43, 0  ;;  %v6687_v43 = vld [vmem:[#allocation2 + $0x44] sm:$0xf]  ;;  %v6718_v52 = vld [vmem:[#allocation2 + $0x13c] sm:$0x30] }
 0x20c   :  { %v3100_v25 = vsel %vm439_vm0, %v6271_v10, 0  ;;  %v6686_v10 = vld [vmem:[#allocation2 + $0x3c] sm:$0xf] }
 0x210   :  { %v2316_v47 = vpop.f32.mrf.mxu2 }
 0x211   :  { %v2329_v62 = vpop.f32.mrf.mxu3  ;;  %v7586_v45 = vpop.f32.mrf.mxu0  ;;  %v6292_v47 = vld [vmem:[#allocation2 + $0x148] sm:$0x30] }
 0x212   :  { %9587 = vst [vmem:[#allocation63_spill] sm:$0xff] %v7586_v45  ;;  %v7590_v5 = vpop.f32.mrf.mxu1  ;;  %v6284_v62 = vld [vmem:[#allocation2 + $0x140] sm:$0x30] }
 0x213   :  { %9588 = vst [vmem:[#allocation64_spill] sm:$0xff] %v7590_v5  ;;  %v6291_v5 = vor.u32 %v6719_v4, %v6290_v28 }
 0x214   :  { %6488 = vmatmul.msk.bf16.vlgmr.msra.gmra.mxu0 %vm435_vm1, %v7588_v7  ;;  %6489 = vmatmul.msk.bf16.vlgmr.msra.gmra.mxu1 %vm435_vm1, %v7588_v7 }
 0x215   :  { %6490 = vmatmul.msk.bf16.vlgmr.msra.gmra.mxu2 %vm435_vm1, %v7588_v7  ;;  %3375 = vmatpush.bf16.msra.mxu0 %v3097_v16 }
 0x216   :  { %6491 = vmatmul.msk.bf16.vlgmr.msra.gmra.mxu3 %vm435_vm1, %v7588_v7  ;;  %3401 = vmatpush.bf16.msra.mxu2 %v3103_v18  ;;  %v6295_v18 = vor.u32 %v6687_v43, %v6292_v47  ;;  %v6306_v47 = vld [vmem:[#allocation2 + $0x50] sm:$0xf] }
 0x217   :  { %3414 = vmatpush.bf16.msra.mxu3 %v3106_v57  ;;  %3388 = vmatpush.bf16.msra.mxu1 %v3100_v25  ;;  %v6283_v57 = vor.u32 %v6718_v52, %v6282_v51  ;;  %v6287_v25 = vor.u32 %v6686_v10, %v6284_v62  ;;  %v6721_v51 = vld [vmem:[#allocation2 + $0x154] sm:$0x30]  ;;  %v6689_v52 = vld [vmem:[#allocation2 + $0x54] sm:$0xf]  ;;  %v6308_v10 = vld [vmem:[#allocation2 + $0x158] sm:$0x30] }
 0x218   :  { %v7604_v27 = vpop.f32.mrf.mxu2  ;;  %v6298_v62 = vld [vmem:[#allocation2 + $0x48] sm:$0xf] }
 0x219   :  { %9589 = vst [vmem:[#allocation65_spill] sm:$0xff] %v7604_v27  ;;  %v7606_v41 = vpop.f32.mrf.mxu3  ;;  %v2342_v22 = vpop.f32.mrf.mxu0 }
 0x21a   :  { %9590 = vst [vmem:[#allocation66_spill] sm:$0xff] %v7606_v41  ;;  %v2355_v35 = vpop.f32.mrf.mxu1  ;;  %v3115_v22 = vsel %vm439_vm0, %v6291_v5, 0  ;;  %v3109_v41 = vsel %vm439_vm0, %v6283_v57, 0  ;;  %v6688_v57 = vld [vmem:[#allocation2 + $0x4c] sm:$0xf] }
 0x21b   :  { %v3118_v35 = vsel %vm439_vm0, %v6295_v18, 0  ;;  %v6720_v18 = vld [vmem:[#allocation2 + $0x14c] sm:$0x30] }
 0x220   :  { %v2368_v45 = vpop.f32.mrf.mxu2 }
 0x221   :  { %v2381_v16 = vpop.f32.mrf.mxu3  ;;  %v7608_v1 = vpop.f32.mrf.mxu0  ;;  %v3112_v45 = vsel %vm439_vm0, %v6287_v25, 0  ;;  %v6307_v25 = vor.u32 %v6721_v51, %v6306_v47 }
 0x222   :  { %9591 = vst [vmem:[#allocation67_spill] sm:$0xff] %v7608_v1  ;;  %v7610_v27 = vpop.f32.mrf.mxu1  ;;  %v6300_v16 = vld [vmem:[#allocation2 + $0x150] sm:$0x30] }
 0x223   :  { %9592 = vst [vmem:[#allocation68_spill] sm:$0xff] %v7610_v27 }
 0x224   :  { %6492 = vmatmul.msk.bf16.vlgmr.msrb.gmra.mxu0 %vm435_vm1, %v7588_v7  ;;  %6493 = vmatmul.msk.bf16.vlgmr.msrb.gmra.mxu1 %vm435_vm1, %v7588_v7 }
 0x225   :  { %6494 = vmatmul.msk.bf16.vlgmr.msrb.gmra.mxu2 %vm435_vm1, %v7588_v7  ;;  %3427 = vmatpush.bf16.msrb.mxu0 %v3109_v41 }
 0x226   :  { %6495 = vmatmul.msk.bf16.vlgmr.msrb.gmra.mxu3 %vm435_vm1, %v7588_v7  ;;  %3453 = vmatpush.bf16.msrb.mxu2 %v3115_v22  ;;  %v6311_v22 = vor.u32 %v6689_v52, %v6308_v10 }
 0x227   :  { %3466 = vmatpush.bf16.msrb.mxu3 %v3118_v35  ;;  %3440 = vmatpush.bf16.msrb.mxu1 %v3112_v45  ;;  %v6299_v35 = vor.u32 %v6720_v18, %v6298_v62  ;;  %v6303_v45 = vor.u32 %v6688_v57, %v6300_v16  ;;  %v6322_v62 = vld [vmem:[#allocation2 + $0x60] sm:$0xf]  ;;  %v6723_v18 = vld [vmem:[#allocation2 + $0x164] sm:$0x30]  ;;  %v6691_v57 = vld [vmem:[#allocation2 + $0x64] sm:$0xf] }
 0x228   :  { %v7624_v5 = vpop.f32.mrf.mxu2  ;;  %v6324_v16 = vld [vmem:[#allocation2 + $0x168] sm:$0x30] }
 0x229   :  { %9593 = vst [vmem:[#allocation69_spill] sm:$0xff] %v7624_v5  ;;  %v7626_v28 = vpop.f32.mrf.mxu3  ;;  %v2394_v4 = vpop.f32.mrf.mxu0 }
 0x22a   :  { %9594 = vst [vmem:[#allocation70_spill] sm:$0xff] %v7626_v28  ;;  %v2407_v43 = vpop.f32.mrf.mxu1  ;;  %v3127_v4 = vsel %vm439_vm0, %v6307_v25, 0  ;;  %v3121_v28 = vsel %vm439_vm0, %v6299_v35, 0  ;;  %v6314_v25 = vld [vmem:[#allocation2 + $0x58] sm:$0xf] }
 0x22b   :  { %v3130_v43 = vsel %vm439_vm0, %v6311_v22, 0  ;;  %v6722_v22 = vld [vmem:[#allocation2 + $0x15c] sm:$0x30]  ;;  %v6690_v35 = vld [vmem:[#allocation2 + $0x5c] sm:$0xf] }
 0x230   :  { %v2420_v27 = vpop.f32.mrf.mxu2 }
 0x231   :  { %v2433_v41 = vpop.f32.mrf.mxu3  ;;  %v7628_v1 = vpop.f32.mrf.mxu0  ;;  %v3124_v27 = vsel %vm439_vm0, %v6303_v45, 0  ;;  %v6323_v45 = vor.u32 %v6723_v18, %v6322_v62 }
 0x232   :  { %9595 = vst [vmem:[#allocation71_spill] sm:$0xff] %v7628_v1  ;;  %v7630_v5 = vpop.f32.mrf.mxu1  ;;  %v6316_v41 = vld [vmem:[#allocation2 + $0x160] sm:$0x30] }
 0x233   :  { %9596 = vst [vmem:[#allocation72_spill] sm:$0xff] %v7630_v5 }
 0x234   :  { %6496 = vmatmul.msk.bf16.vlgmr.msra.gmra.mxu0 %vm435_vm1, %v7588_v7  ;;  %6497 = vmatmul.msk.bf16.vlgmr.msra.gmra.mxu1 %vm435_vm1, %v7588_v7 }
 0x235   :  { %6498 = vmatmul.msk.bf16.vlgmr.msra.gmra.mxu2 %vm435_vm1, %v7588_v7  ;;  %3479 = vmatpush.bf16.msra.mxu0 %v3121_v28 }
 0x236   :  { %6499 = vmatmul.msk.bf16.vlgmr.msra.gmra.mxu3 %vm435_vm1, %v7588_v7  ;;  %3505 = vmatpush.bf16.msra.mxu2 %v3127_v4  ;;  %v6327_v4 = vor.u32 %v6691_v57, %v6324_v16 }
 0x237   :  { %3518 = vmatpush.bf16.msra.mxu3 %v3130_v43  ;;  %3492 = vmatpush.bf16.msra.mxu1 %v3124_v27  ;;  %v6315_v43 = vor.u32 %v6722_v22, %v6314_v25  ;;  %v6319_v27 = vor.u32 %v6690_v35, %v6316_v41  ;;  %v6338_v25 = vld [vmem:[#allocation2 + $0x70] sm:$0xf]  ;;  %v6725_v22 = vld [vmem:[#allocation2 + $0x174] sm:$0x30]  ;;  %v6693_v35 = vld [vmem:[#allocation2 + $0x74] sm:$0xf] }
 0x238   :  { %v7644_v47 = vpop.f32.mrf.mxu2  ;;  %v6340_v41 = vld [vmem:[#allocation2 + $0x178] sm:$0x30] }
 0x239   :  { %9597 = vst [vmem:[#allocation73_spill] sm:$0xff] %v7644_v47  ;;  %v7646_v51 = vpop.f32.mrf.mxu3  ;;  %v2446_v52 = vpop.f32.mrf.mxu0 }
 0x23a   :  { %9598 = vst [vmem:[#allocation74_spill] sm:$0xff] %v7646_v51  ;;  %v2459_v10 = vpop.f32.mrf.mxu1  ;;  %v3139_v52 = vsel %vm439_vm0, %v6323_v45, 0  ;;  %v3133_v51 = vsel %vm439_vm0, %v6315_v43, 0  ;;  %v6330_v45 = vld [vmem:[#allocation2 + $0x68] sm:$0xf] }
 0x23b   :  { %v3142_v10 = vsel %vm439_vm0, %v6327_v4, 0  ;;  %v6724_v4 = vld [vmem:[#allocation2 + $0x16c] sm:$0x30]  ;;  %v6692_v43 = vld [vmem:[#allocation2 + $0x6c] sm:$0xf] }
 0x240   :  { %v2472_v5 = vpop.f32.mrf.mxu2 }
 0x241   :  { %v2485_v28 = vpop.f32.mrf.mxu3  ;;  %v7648_v1 = vpop.f32.mrf.mxu0  ;;  %v3136_v5 = vsel %vm439_vm0, %v6319_v27, 0  ;;  %v6339_v27 = vor.u32 %v6725_v22, %v6338_v25 }
 0x242   :  { %9599 = vst [vmem:[#allocation75_spill] sm:$0xff] %v7648_v1  ;;  %v7650_v47 = vpop.f32.mrf.mxu1  ;;  %v6332_v28 = vld [vmem:[#allocation2 + $0x170] sm:$0x30] }
 0x243   :  { %9600 = vst [vmem:[#allocation76_spill] sm:$0xff] %v7650_v47 }
 0x244   :  { %6500 = vmatmul.msk.bf16.vlgmr.msrb.gmra.mxu0 %vm435_vm1, %v7588_v7  ;;  %6501 = vmatmul.msk.bf16.vlgmr.msrb.gmra.mxu1 %vm435_vm1, %v7588_v7 }
 0x245   :  { %6502 = vmatmul.msk.bf16.vlgmr.msrb.gmra.mxu2 %vm435_vm1, %v7588_v7  ;;  %3531 = vmatpush.bf16.msrb.mxu0 %v3133_v51 }
 0x246   :  { %6503 = vmatmul.msk.bf16.vlgmr.msrb.gmra.mxu3 %vm435_vm1, %v7588_v7  ;;  %3557 = vmatpush.bf16.msrb.mxu2 %v3139_v52  ;;  %v6343_v52 = vor.u32 %v6693_v35, %v6340_v41 }
 0x247   :  { %3570 = vmatpush.bf16.msrb.mxu3 %v3142_v10  ;;  %3544 = vmatpush.bf16.msrb.mxu1 %v3136_v5  ;;  %v6331_v10 = vor.u32 %v6724_v4, %v6330_v45  ;;  %v6335_v5 = vor.u32 %v6692_v43, %v6332_v28  ;;  %v6354_v45 = vld [vmem:[#allocation2 + $0x80] sm:$0xf]  ;;  %v6727_v4 = vld [vmem:[#allocation2 + $0x184] sm:$0x30]  ;;  %v6695_v43 = vld [vmem:[#allocation2 + $0x84] sm:$0xf] }
 0x248   :  { %v7664_v62 = vpop.f32.mrf.mxu2  ;;  %v6356_v28 = vld [vmem:[#allocation2 + $0x188] sm:$0x30] }
 0x249   :  { %9601 = vst [vmem:[#allocation77_spill] sm:$0xff] %v7664_v62  ;;  %v7666_v18 = vpop.f32.mrf.mxu3  ;;  %v2498_v57 = vpop.f32.mrf.mxu0 }
 0x24a   :  { %9602 = vst [vmem:[#allocation78_spill] sm:$0xff] %v7666_v18  ;;  %v2511_v16 = vpop.f32.mrf.mxu1  ;;  %v3151_v57 = vsel %vm439_vm0, %v6339_v27, 0  ;;  %v3145_v18 = vsel %vm439_vm0, %v6331_v10, 0  ;;  %v6346_v27 = vld [vmem:[#allocation2 + $0x78] sm:$0xf] }
 0x24b   :  { %v3154_v16 = vsel %vm439_vm0, %v6343_v52, 0  ;;  %v6726_v52 = vld [vmem:[#allocation2 + $0x17c] sm:$0x30]  ;;  %v6694_v10 = vld [vmem:[#allocation2 + $0x7c] sm:$0xf] }
 0x250   :  { %v2524_v47 = vpop.f32.mrf.mxu2 }
 0x251   :  { %v2537_v51 = vpop.f32.mrf.mxu3  ;;  %v7668_v1 = vpop.f32.mrf.mxu0  ;;  %v3148_v47 = vsel %vm439_vm0, %v6335_v5, 0  ;;  %v6355_v5 = vor.u32 %v6727_v4, %v6354_v45 }
 0x252   :  { %9603 = vst [vmem:[#allocation79_spill] sm:$0xff] %v7668_v1  ;;  %v7670_v62 = vpop.f32.mrf.mxu1  ;;  %v6348_v51 = vld [vmem:[#allocation2 + $0x180] sm:$0x30] }
 0x253   :  { %9604 = vst [vmem:[#allocation80_spill] sm:$0xff] %v7670_v62 }
 0x254   :  { %6504 = vmatmul.msk.bf16.vlgmr.msra.gmra.mxu0 %vm435_vm1, %v7588_v7  ;;  %6505 = vmatmul.msk.bf16.vlgmr.msra.gmra.mxu1 %vm435_vm1, %v7588_v7 }
 0x255   :  { %6506 = vmatmul.msk.bf16.vlgmr.msra.gmra.mxu2 %vm435_vm1, %v7588_v7  ;;  %3583 = vmatpush.bf16.msra.mxu0 %v3145_v18 }
 0x256   :  { %6507 = vmatmul.msk.bf16.vlgmr.msra.gmra.mxu3 %vm435_vm1, %v7588_v7  ;;  %3609 = vmatpush.bf16.msra.mxu2 %v3151_v57  ;;  %v6359_v57 = vor.u32 %v6695_v43, %v6356_v28 }
 0x257   :  { %3622 = vmatpush.bf16.msra.mxu3 %v3154_v16  ;;  %3596 = vmatpush.bf16.msra.mxu1 %v3148_v47  ;;  %v6347_v16 = vor.u32 %v6726_v52, %v6346_v27  ;;  %v6351_v47 = vor.u32 %v6694_v10, %v6348_v51  ;;  %v6370_v27 = vld [vmem:[#allocation2 + $0x90] sm:$0xf]  ;;  %v6729_v52 = vld [vmem:[#allocation2 + $0x194] sm:$0x30]  ;;  %v6697_v10 = vld [vmem:[#allocation2 + $0x94] sm:$0xf] }
 0x258   :  { %v7684_v25 = vpop.f32.mrf.mxu2  ;;  %v6372_v51 = vld [vmem:[#allocation2 + $0x198] sm:$0x30] }
 0x259   :  { %9605 = vst [vmem:[#allocation81_spill] sm:$0xff] %v7684_v25  ;;  %v7686_v22 = vpop.f32.mrf.mxu3  ;;  %v2550_v35 = vpop.f32.mrf.mxu0 }
 0x25a   :  { %9606 = vst [vmem:[#allocation82_spill] sm:$0xff] %v7686_v22  ;;  %v2563_v41 = vpop.f32.mrf.mxu1  ;;  %v3163_v35 = vsel %vm439_vm0, %v6355_v5, 0  ;;  %v3157_v22 = vsel %vm439_vm0, %v6347_v16, 0  ;;  %v6362_v5 = vld [vmem:[#allocation2 + $0x88] sm:$0xf] }
 0x25b   :  { %v3166_v41 = vsel %vm439_vm0, %v6359_v57, 0  ;;  %v6728_v57 = vld [vmem:[#allocation2 + $0x18c] sm:$0x30]  ;;  %v6696_v16 = vld [vmem:[#allocation2 + $0x8c] sm:$0xf] }
 0x260   :  { %v2576_v62 = vpop.f32.mrf.mxu2 }
 0x261   :  { %v2589_v18 = vpop.f32.mrf.mxu3  ;;  %v7688_v1 = vpop.f32.mrf.mxu0  ;;  %v3160_v62 = vsel %vm439_vm0, %v6351_v47, 0  ;;  %v6371_v47 = vor.u32 %v6729_v52, %v6370_v27 }
 0x262   :  { %9607 = vst [vmem:[#allocation83_spill] sm:$0xff] %v7688_v1  ;;  %v7690_v25 = vpop.f32.mrf.mxu1  ;;  %v6364_v18 = vld [vmem:[#allocation2 + $0x190] sm:$0x30] }
 0x263   :  { %9608 = vst [vmem:[#allocation84_spill] sm:$0xff] %v7690_v25 }
 0x264   :  { %6508 = vmatmul.msk.bf16.vlgmr.msrb.gmra.mxu0 %vm435_vm1, %v7588_v7  ;;  %6509 = vmatmul.msk.bf16.vlgmr.msrb.gmra.mxu1 %vm435_vm1, %v7588_v7 }
 0x265   :  { %6510 = vmatmul.msk.bf16.vlgmr.msrb.gmra.mxu2 %vm435_vm1, %v7588_v7  ;;  %3635 = vmatpush.bf16.msrb.mxu0 %v3157_v22 }
 0x266   :  { %6511 = vmatmul.msk.bf16.vlgmr.msrb.gmra.mxu3 %vm435_vm1, %v7588_v7  ;;  %3661 = vmatpush.bf16.msrb.mxu2 %v3163_v35  ;;  %v6375_v35 = vor.u32 %v6697_v10, %v6372_v51 }
 0x267   :  { %3674 = vmatpush.bf16.msrb.mxu3 %v3166_v41  ;;  %3648 = vmatpush.bf16.msrb.mxu1 %v3160_v62  ;;  %v6363_v41 = vor.u32 %v6728_v57, %v6362_v5  ;;  %v6367_v62 = vor.u32 %v6696_v16, %v6364_v18  ;;  %v6386_v5 = vld [vmem:[#allocation2 + $0xa0] sm:$0xf]  ;;  %v6731_v57 = vld [vmem:[#allocation2 + $0x1a4] sm:$0x30]  ;;  %v6699_v16 = vld [vmem:[#allocation2 + $0xa4] sm:$0xf] }
 0x268   :  { %v7704_v45 = vpop.f32.mrf.mxu2  ;;  %v6388_v18 = vld [vmem:[#allocation2 + $0x1a8] sm:$0x30] }
 0x269   :  { %9609 = vst [vmem:[#allocation85_spill] sm:$0xff] %v7704_v45  ;;  %v7706_v4 = vpop.f32.mrf.mxu3  ;;  %v2602_v43 = vpop.f32.mrf.mxu0 }
 0x26a   :  { %9610 = vst [vmem:[#allocation86_spill] sm:$0xff] %v7706_v4  ;;  %v2615_v28 = vpop.f32.mrf.mxu1  ;;  %v3175_v43 = vsel %vm439_vm0, %v6371_v47, 0  ;;  %v3169_v4 = vsel %vm439_vm0, %v6363_v41, 0  ;;  %v6387_v47 = vor.u32 %v6731_v57, %v6386_v5  ;;  %v6730_v41 = vld [vmem:[#allocation2 + $0x19c] sm:$0x30] }
 0x26b   :  { %v3178_v28 = vsel %vm439_vm0, %v6375_v35, 0  ;;  %v6378_v35 = vld [vmem:[#allocation2 + $0x98] sm:$0xf] }
 0x270   :  { %v2628_v25 = vpop.f32.mrf.mxu2 }
 0x271   :  { %v2641_v22 = vpop.f32.mrf.mxu3  ;;  %v7708_v1 = vpop.f32.mrf.mxu0  ;;  %v3172_v25 = vsel %vm439_vm0, %v6367_v62, 0 }
 0x272   :  { %9611 = vst [vmem:[#allocation87_spill] sm:$0xff] %v7708_v1  ;;  %v7710_v45 = vpop.f32.mrf.mxu1  ;;  %v6698_v22 = vld [vmem:[#allocation2 + $0x9c] sm:$0xf] }
 0x273   :  { %9612 = vst [vmem:[#allocation88_spill] sm:$0xff] %v7710_v45  ;;  %v6391_v45 = vor.u32 %v6699_v16, %v6388_v18 }
 0x274   :  { %6512 = vmatmul.msk.bf16.vlgmr.msra.gmra.mxu0 %vm435_vm1, %v7588_v7  ;;  %6513 = vmatmul.msk.bf16.vlgmr.msra.gmra.mxu1 %vm435_vm1, %v7588_v7 }
 0x275   :  { %6514 = vmatmul.msk.bf16.vlgmr.msra.gmra.mxu2 %vm435_vm1, %v7588_v7  ;;  %3687 = vmatpush.bf16.msra.mxu0 %v3169_v4 }
 0x276   :  { %6515 = vmatmul.msk.bf16.vlgmr.msra.gmra.mxu3 %vm435_vm1, %v7588_v7  ;;  %3713 = vmatpush.bf16.msra.mxu2 %v3175_v43  ;;  %v6379_v43 = vor.u32 %v6730_v41, %v6378_v35  ;;  %v6402_v35 = vld [vmem:[#allocation2 + $0xb0] sm:$0xf]  ;;  %v6733_v41 = vld [vmem:[#allocation2 + $0x1b4] sm:$0x30] }
 0x277   :  { %3726 = vmatpush.bf16.msra.mxu3 %v3178_v28  ;;  %3700 = vmatpush.bf16.msra.mxu1 %v3172_v25  ;;  %v6380_v28 = vld [vmem:[#allocation2 + $0x1a0] sm:$0x30] }
 0x278   :  { %v7724_v27 = vpop.f32.mrf.mxu2  ;;  %v6383_v25 = vor.u32 %v6698_v22, %v6380_v28  ;;  %v3181_v5 = vsel %vm439_vm0, %v6379_v43, 0  ;;  %v6701_v22 = vld [vmem:[#allocation2 + $0xb4] sm:$0xf]  ;;  %v6403_v28 = vor.u32 %v6733_v41, %v6402_v35  ;;  %v1990_v35 = vadd.f32 %v7445_v30, %v7123_v8 }
 0x279   :  { %9613 = vst [vmem:[#allocation89_spill] sm:$0xff] %v7724_v27  ;;  %v7726_v52 = vpop.f32.mrf.mxu3  ;;  %v2654_v10 = vpop.f32.mrf.mxu0  ;;  %v7790_v8 = vadd.f32 %v7465_v37, %v7143_v33  ;;  %v7794_v30 = vadd.f32 %v7479_v13, %v7157_v38  ;;  %v7808_v33 = vadd.f32 %v7485_v50, %v7163_v61  ;;  %v7812_v38 = vadd.f32 %v7499_v21, %v7177_v2  ;;  %v9626_v21 = vld [vmem:[#allocation55_spill] sm:$0xff] }
 0x27a   :  { %9614 = vst [vmem:[#allocation90_spill] sm:$0xff] %v7726_v52  ;;  %v2667_v51 = vpop.f32.mrf.mxu1  ;;  %v3187_v10 = vsel %vm439_vm0, %v6387_v47, 0  ;;  %v3184_v57 = vsel %vm439_vm0, %v6383_v25, 0  ;;  %v1938_v25 = vadd.f32 %v7425_v63, %v7103_v48  ;;  %v7830_v2 = vadd.f32 %v7519_v11, %v7197_v32  ;;  %v9623_v32 = vld [vmem:[#allocation12_spill] sm:$0xff] }
 0x27b   :  { %v3190_v51 = vsel %vm439_vm0, %v6391_v45, 0  ;;  %v7834_v50 = vadd.f32 %v7521_v20, %v7199_v34 }
 0x280   :  { %v2680_v62 = vpop.f32.mrf.mxu2 }
 0x281   :  { %v2693_v4 = vpop.f32.mrf.mxu3  ;;  %v7728_v1 = vpop.f32.mrf.mxu0  ;;  %v1925_v62 = vadd.f32 %v7423_v36, %v7101_v46  ;;  %v3199_v46 = vsel %vm439_vm0, %v6403_v28, 0  ;;  %v9632_v28 = vld [vmem:[#allocation58_spill] sm:$0xff] }
 0x282   :  { %9615 = vst [vmem:[#allocation91_spill] sm:$0xff] %v7728_v1  ;;  %v7730_v27 = vpop.f32.mrf.mxu1  ;;  %v6404_v4 = vld [vmem:[#allocation2 + $0x1b8] sm:$0x30]  ;;  %v6396_v1 = vld [vmem:[#allocation2 + $0x1b0] sm:$0x30] }
 0x283   :  { %9616 = vst [vmem:[#allocation92_spill] sm:$0xff] %v7730_v27 }
 0x284   :  { %6516 = vmatmul.msk.bf16.vlgmr.msrb.gmra.mxu0 %vm435_vm1, %v7588_v7  ;;  %6517 = vmatmul.msk.bf16.vlgmr.msrb.gmra.mxu1 %vm435_vm1, %v7588_v7 }
 0x285   :  { %6518 = vmatmul.msk.bf16.vlgmr.msrb.gmra.mxu2 %vm435_vm1, %v7588_v7  ;;  %3739 = vmatpush.bf16.msrb.mxu0 %v3181_v5  ;;  %v6407_v5 = vor.u32 %v6701_v22, %v6404_v4  ;;  %v7778_v22 = vadd.f32 %v7459_v0, %v7137_v14  ;;  %v7798_v14 = vadd.f32 %v7481_v55, %v7159_v39  ;;  %v9625_v55 = vld [vmem:[#allocation13_spill] sm:$0xff] }
 0x286   :  { %6519 = vmatmul.msk.bf16.vlgmr.msrb.gmra.mxu3 %vm435_vm1, %v7588_v7  ;;  %3765 = vmatpush.bf16.msrb.mxu2 %v3187_v10  ;;  %v7817_v39 = vadd.f32 %v7501_v12, %v7179_v3  ;;  %v7821_v0 = vadd.f32 %v7503_v17, %v7181_v24  ;;  %v7838_v3 = vadd.f32 %v7523_v40, %v7201_v56  ;;  %v9622_v17 = vld [vmem:[#allocation53_spill] sm:$0xff]  ;;  %v9627_v40 = vld [vmem:[#allocation14_spill] sm:$0xff]  ;;  %v9628_v12 = vld [vmem:[#allocation56_spill] sm:$0xff] }
 0x287   :  { %3778 = vmatpush.bf16.msrb.mxu3 %v3190_v51  ;;  %3752 = vmatpush.bf16.msrb.mxu1 %v3184_v57  ;;  %v6394_v57 = vld [vmem:[#allocation2 + $0xa8] sm:$0xf]  ;;  %v3202_v48 = vsel %vm439_vm0, %v6407_v5, 0  ;;  %v7858_v56 = vadd.f32 %v9626_v21, %v9625_v55  ;;  %v7862_v11 = vadd.f32 %v9628_v12, %v9627_v40  ;;  %v9635_v5 = vld [vmem:[#allocation18_spill] sm:$0xff] }
 0x288   :  { %v7744_v16 = vpop.f32.mrf.mxu2 }
 0x289   :  { %9617 = vst [vmem:[#allocation93_spill] sm:$0xff] %v7744_v16  ;;  %v7746_v45 = vpop.f32.mrf.mxu3  ;;  %v2706_v18 = vpop.f32.mrf.mxu0  ;;  %v6732_v16 = vld [vmem:[#allocation2 + $0x1ac] sm:$0x30] }
 0x28a   :  { %9618 = vst [vmem:[#allocation94_spill] sm:$0xff] %v7746_v45  ;;  %v2719_v47 = vpop.f32.mrf.mxu1  ;;  %v6700_v45 = vld [vmem:[#allocation2 + $0xac] sm:$0xf]  ;;  %v6395_v27 = vor.u32 %v6732_v16, %v6394_v57  ;;  %v9636_v57 = vld [vmem:[#allocation60_spill] sm:$0xff] }
 0x28b   :  { %v6399_v36 = vor.u32 %v6700_v45, %v6396_v1  ;;  %v1951_v1 = vadd.f32 %v7439_v42, %v7117_v53  ;;  %v1977_v45 = vadd.f32 %v7443_v44, %v7121_v6  ;;  %v7782_v53 = vadd.f32 %v7461_v23, %v7139_v15  ;;  %v7800_v15 = vpop.permute.xlu0 %4163  ;;  %v9624_v23 = vld [vmem:[#allocation54_spill] sm:$0xff] }
 0x28c   :  { %v3193_v63 = vsel %vm439_vm0, %v6395_v27, 0  ;;  %v1964_v27 = vadd.f32 %v7441_v19, %v7119_v54  ;;  %v7786_v42 = vadd.f32 %v7463_v49, %v7141_v31  ;;  %v7804_v49 = vadd.f32 %v7483_v60, %v7161_v59 }
 0x28d   :  { %v3196_v16 = vsel %vm439_vm0, %v6399_v36, 0  ;;  %v7825_v59 = vadd.f32 %v7505_v9, %v7183_v26  ;;  %v7844_v26 = vadd.f32 %v7525_v29, %v7203_v58  ;;  %v9621_v9 = vld [vmem:[#allocation11_spill] sm:$0xff]  ;;  %v7852_v13 = vadd.f32 %v9624_v23, %v9623_v32  ;;  %v9630_v29 = vld [vmem:[#allocation57_spill] sm:$0xff] }
 0x28e   :  { %v7848_v60 = vadd.f32 %v9622_v17, %v9621_v9  ;;  %v9629_v58 = vld [vmem:[#allocation15_spill] sm:$0xff]  ;;  %v9645_v9 = vld [vmem:[#allocation64_spill] sm:$0xff]  ;;  %v9648_v23 = vld [vmem:[#allocation65_spill] sm:$0xff] }
 0x28f   :  { %v7866_v20 = vadd.f32 %v9630_v29, %v9629_v58  ;;  %v9647_v32 = vld [vmem:[#allocation23_spill] sm:$0xff]  ;;  %v9650_v58 = vld [vmem:[#allocation24_spill] sm:$0xff]  ;;  %v9651_v29 = vld [vmem:[#allocation66_spill] sm:$0xff] }
 0x290   :  { %v2732_v43 = vpop.f32.mrf.mxu2  ;;  %v7902_v55 = vadd.f32 %v9648_v23, %v9647_v32  ;;  %v6735_v23 = vld [vmem:[#allocation2 + $0x1c4] sm:$0x30] }
 0x291   :  { %v2745_v10 = vpop.f32.mrf.mxu3  ;;  %v3273_v51 = vpop.f32.mrf.mxu0  ;;  %v9631_v43 = vld [vmem:[#allocation16_spill] sm:$0xff] }
 0x292   :  { %v7752_v18 = vadd.f32 %v3273_v51, %v1925_v62  ;;  %v3286_v47 = vpop.f32.mrf.mxu1  ;;  %v7872_v4 = vadd.f32 %v9632_v28, %v9631_v43  ;;  %v9634_v10 = vld [vmem:[#allocation59_spill] sm:$0xff]  ;;  %9649 = vst [vmem:[#allocation12_spill] sm:$0xff] %v7902_v55  ;;  %v7906_v43 = vadd.f32 %v9651_v29, %v9650_v58  ;;  %v9653_v28 = vld [vmem:[#allocation25_spill] sm:$0xff] }
 0x293   :  { %v7754_v52 = vadd.f32 %v3286_v47, %v1938_v25  ;;  %v9633_v25 = vld [vmem:[#allocation17_spill] sm:$0xff]  ;;  %v7880_v47 = vadd.f32 %v9636_v57, %v9635_v5 }
 0x294   :  { %9619 = vst [vmem:[#allocation95_spill] sm:$0xff] %v7752_v18  ;;  %6520 = vmatmul.msk.bf16.vlgmr.msra.gmra.mxu0 %vm435_vm1, %v7588_v7  ;;  %6521 = vmatmul.msk.bf16.vlgmr.msra.gmra.mxu1 %vm435_vm1, %v7588_v7  ;;  %v7876_v51 = vadd.f32 %v9634_v10, %v9633_v25  ;;  %v9654_v25 = vld [vmem:[#allocation67_spill] sm:$0xff]  ;;  %v6412_v18 = vld [vmem:[#allocation2 + $0x1c0] sm:$0x30] }
 0x295   :  { %9620 = vst [vmem:[#allocation96_spill] sm:$0xff] %v7754_v52  ;;  %6522 = vmatmul.msk.bf16.vlgmr.msra.gmra.mxu2 %vm435_vm1, %v7588_v7  ;;  %3791 = vmatpush.bf16.msra.mxu0 %v3193_v63  ;;  %v9638_v63 = vld [vmem:[#allocation61_spill] sm:$0xff]  ;;  %v7910_v10 = vadd.f32 %v9654_v25, %v9653_v28  ;;  %v6703_v25 = vld [vmem:[#allocation2 + $0xc4] sm:$0xf] }
 0x296   :  { %6523 = vmatmul.msk.bf16.vlgmr.msra.gmra.mxu3 %vm435_vm1, %v7588_v7  ;;  %3817 = vmatpush.bf16.msra.mxu2 %v3199_v46  ;;  %9652 = vst [vmem:[#allocation54_spill] sm:$0xff] %v7906_v43 }
 0x297   :  { %3830 = vmatpush.bf16.msra.mxu3 %v3202_v48  ;;  %3804 = vmatpush.bf16.msra.mxu1 %v3196_v16  ;;  %v9637_v48 = vld [vmem:[#allocation19_spill] sm:$0xff]  ;;  %9655 = vst [vmem:[#allocation13_spill] sm:$0xff] %v7910_v10 }
 0x298   :  { %v3299_v41 = vpop.f32.mrf.mxu2  ;;  %v7886_v16 = vadd.f32 %v9638_v63, %v9637_v48  ;;  %v9657_v48 = vld [vmem:[#allocation68_spill] sm:$0xff] }
 0x299   :  { %v4098_v54 = vadd.f32 %v3299_v41, %v1951_v1  ;;  %v3312_v19 = vpop.f32.mrf.mxu3  ;;  %v3275_v6 = vpop.f32.mrf.mxu0  ;;  %v9639_v1 = vld [vmem:[#allocation20_spill] sm:$0xff] }
 0x29a   :  { %v4099_v44 = vadd.f32 %v3312_v19, %v1964_v27  ;;  %v3288_v31 = vpop.f32.mrf.mxu1  ;;  %v9640_v27 = vld [vmem:[#allocation62_spill] sm:$0xff]  ;;  %v9642_v19 = vld [vmem:[#allocation63_spill] sm:$0xff] }
 0x29b   :  { %v4168_v37 = vadd.f32 %v7800_v15, %v4098_v54  ;;  %v7890_v41 = vadd.f32 %v9640_v27, %v9639_v1  ;;  %v9641_v54 = vld [vmem:[#allocation21_spill] sm:$0xff]  ;;  %v9659_v1 = vld [vmem:[#allocation27_spill] sm:$0xff] }
 0x29c   :  { %v4169_v61 = vadd.f32 %v7800_v15, %v4099_v44  ;;  %v7894_v6 = vadd.f32 %v9642_v19, %v9641_v54  ;;  %v9660_v27 = vld [vmem:[#allocation69_spill] sm:$0xff] }
 0x29d   :  { %v7840_v24 = vmax.f32 %v4168_v37, 0.0  ;;  %v7918_v54 = vadd.f32 %v9660_v27, %v9659_v1 }
 0x29e   :  { %v7854_v34 = vmax.f32 %v4169_v61, 0.0  ;;  %9643 = vst [vmem:[#allocation11_spill] sm:$0xff] %v7894_v6  ;;  %v9644_v61 = vld [vmem:[#allocation22_spill] sm:$0xff] }
 0x29f   :  { %v4296_v62 = vmul.f32 %v7840_v24, %v7840_v24  ;;  %v7898_v17 = vadd.f32 %v9645_v9, %v9644_v61  ;;  %9661 = vst [vmem:[#allocation14_spill] sm:$0xff] %v7918_v54 }
 0x2a0   :  { %v4297_v46 = vmul.f32 %v7854_v34, %v7854_v34  ;;  %v3301_v36 = vpop.f32.mrf.mxu2 }
 0x2a1   :  { %v4370_v44 = vrot.slane %v4296_v62, 4  ;;  %v3314_v31 = vpop.f32.mrf.mxu3  ;;  %v3325_v37 = vpop.f32.mrf.mxu0  ;;  %9646 = vst [vmem:[#allocation53_spill] sm:$0xff] %v7898_v17  ;;  %v9656_v36 = vld [vmem:[#allocation26_spill] sm:$0xff] }
 0x2a2   :  { %v4376_v21 = vrot.slane %v4297_v46, 4  ;;  %v4100_v40 = vadd.f32 %v3325_v37, %v1977_v45  ;;  %v3338_v12 = vpop.f32.mrf.mxu1  ;;  %v7914_v63 = vadd.f32 %v9657_v48, %v9656_v36  ;;  %v9662_v31 = vld [vmem:[#allocation28_spill] sm:$0xff]  ;;  %v9663_v37 = vld [vmem:[#allocation70_spill] sm:$0xff]  ;;  %v9671_v36 = vld [vmem:[#allocation31_spill] sm:$0xff] }
 0x2a3   :  { %v4371_v5 = vadd.f32 %v4370_v44, %v4296_v62  ;;  %v4101_v57 = vadd.f32 %v3338_v12, %v1990_v35  ;;  %v7925_v61 = vadd.f32 %v9663_v37, %v9662_v31  ;;  %v9665_v62 = vld [vmem:[#allocation29_spill] sm:$0xff]  ;;  %v9666_v35 = vld [vmem:[#allocation71_spill] sm:$0xff] }
 0x2a4   :  { %9658 = vst [vmem:[#allocation55_spill] sm:$0xff] %v7914_v63  ;;  %v4377_v45 = vadd.f32 %v4376_v21, %v4297_v46  ;;  %v4170_v19 = vadd.f32 %v7800_v15, %v4100_v40  ;;  %6524 = vmatmul.msk.bf16.vlgmr.msrb.gmra.mxu0 %vm435_vm1, %v7588_v7  ;;  %v7929_v44 = vadd.f32 %v9666_v35, %v9665_v62  ;;  %v6418_v46 = vld [vmem:[#allocation2 + $0xc0] sm:$0xf]  ;;  %v9668_v21 = vld [vmem:[#allocation30_spill] sm:$0xff]  ;;  %v9669_v40 = vld [vmem:[#allocation72_spill] sm:$0xff] }
 0x2a5   :  { %9664 = vst [vmem:[#allocation56_spill] sm:$0xff] %v7925_v61  ;;  %v4372_v9 = vrot.slane %v4371_v5, 2  ;;  %v4171_v32 = vadd.f32 %v7800_v15, %v4101_v57  ;;  %6525 = vmatmul.msk.bf16.vlgmr.msrb.gmra.mxu1 %vm435_vm1, %v7588_v7  ;;  %6526 = vmatmul.msk.bf16.vlgmr.msrb.gmra.mxu2 %vm435_vm1, %v7588_v7  ;;  %v7938_v12 = vadd.f32 %v9669_v40, %v9668_v21  ;;  %v6420_v57 = vld [vmem:[#allocation2 + $0x1c8] sm:$0x30]  ;;  %v6410_v62 = vld [vmem:[#allocation2 + $0xb8] sm:$0xf] }
 0x2a6   :  { %9667 = vst [vmem:[#allocation15_spill] sm:$0xff] %v7929_v44  ;;  %v4378_v58 = vrot.slane %v4377_v45, 2  ;;  %v7940_v29 = vmax.f32 %v4170_v19, 0.0  ;;  %6527 = vmatmul.msk.bf16.vlgmr.msrb.gmra.mxu3 %vm435_vm1, %v7588_v7  ;;  %v6419_v28 = vor.u32 %v6735_v23, %v6418_v46  ;;  %v9672_v48 = vld [vmem:[#allocation73_spill] sm:$0xff]  ;;  %v6423_v37 = vor.u32 %v6703_v25, %v6420_v57  ;;  %v6734_v35 = vld [vmem:[#allocation2 + $0x1bc] sm:$0x30] }
 0x2a7   :  { %9670 = vst [vmem:[#allocation57_spill] sm:$0xff] %v7938_v12  ;;  %v7946_v1 = vadd.f32 %v9672_v48, %v9671_v36  ;;  %v4373_v27 = vadd.f32 %v4372_v9, %v4371_v5  ;;  %v7948_v31 = vmax.f32 %v4171_v32, 0.0  ;;  %v6411_v46 = vor.u32 %v6734_v35, %v6410_v62  ;;  %v6702_v23 = vld [vmem:[#allocation2 + $0xbc] sm:$0xf] }
 0x2a8   :  { %v4379_v21 = vadd.f32 %v4378_v58, %v4377_v45  ;;  %v4298_v19 = vmul.f32 %v7940_v29, %v7940_v29  ;;  %v3351_v40 = vpop.f32.mrf.mxu2  ;;  %v3211_v52 = vsel %vm439_vm0, %v6419_v28, 0  ;;  %v3214_v45 = vsel %vm439_vm0, %v6423_v37, 0 }
 0x2a9   :  { %9673 = vst [vmem:[#allocation16_spill] sm:$0xff] %v7946_v1  ;;  %v4374_v12 = vrot.slane %v4373_v27, 1  ;;  %v4299_v36 = vmul.f32 %v7948_v31, %v7948_v31  ;;  %v4102_v5 = vadd.f32 %v3351_v40, %v7778_v22  ;;  %v3364_v9 = vpop.f32.mrf.mxu3  ;;  %v3327_v32 = vpop.f32.mrf.mxu0  ;;  %3869 = vmatpush.bf16.msrb.mxu2 %v3211_v52  ;;  %3882 = vmatpush.bf16.msrb.mxu3 %v3214_v45  ;;  %v3205_v28 = vsel %vm439_vm0, %v6411_v46, 0  ;;  %v9674_v22 = vld [vmem:[#allocation32_spill] sm:$0xff]  ;;  %v9675_v40 = vld [vmem:[#allocation74_spill] sm:$0xff]  ;;  %v9678_v46 = vld [vmem:[#allocation75_spill] sm:$0xff] }
 0x2aa   :  { %v4380_v58 = vrot.slane %v4379_v21, 1  ;;  %v4382_v25 = vrot.slane %v4298_v19, 4  ;;  %v4103_v57 = vadd.f32 %v3364_v9, %v7782_v53  ;;  %v3340_v48 = vpop.f32.mrf.mxu1  ;;  %3843 = vmatpush.bf16.msrb.mxu0 %v3205_v28  ;;  %v6415_v44 = vor.u32 %v6702_v23, %v6412_v18 }
 0x2ab   :  { %v4375_v62 = vadd.f32 %v4374_v12, %v4373_v27  ;;  %v4388_v35 = vrot.slane %v4299_v36, 4  ;;  %v4172_v1 = vadd.f32 %v7800_v15, %v4102_v5  ;;  %v7962_v32 = vadd.f32 %v9675_v40, %v9674_v22  ;;  %v9677_v27 = vld [vmem:[#allocation33_spill] sm:$0xff] }
 0x2ac   :  { %v4381_v52 = vadd.f32 %v4380_v58, %v4379_v21  ;;  %v4383_v37 = vadd.f32 %v4382_v25, %v4298_v19  ;;  %v4173_v61 = vadd.f32 %v7800_v15, %v4103_v57  ;;  %v3208_v12 = vsel %vm439_vm0, %v6415_v44, 0  ;;  %v9680_v21 = vld [vmem:[#allocation34_spill] sm:$0xff]  ;;  %v9681_v19 = vld [vmem:[#allocation76_spill] sm:$0xff]  ;;  %v9684_v25 = vld [vmem:[#allocation77_spill] sm:$0xff] }
 0x2ad   :  { %9676 = vst [vmem:[#allocation58_spill] sm:$0xff] %v7962_v32  ;;  %v7965_v54 = vadd.f32 1e-06, %v4375_v62  ;;  %v4389_v53 = vadd.f32 %v4388_v35, %v4299_v36  ;;  %v7967_v9 = vmax.f32 %v4172_v1, 0.0  ;;  %v7972_v5 = vadd.f32 %v9678_v46, %v9677_v27  ;;  %3856 = vmatpush.bf16.msrb.mxu1 %v3208_v12  ;;  %v9683_v36 = vld [vmem:[#allocation35_spill] sm:$0xff]  ;;  %v9686_v62 = vld [vmem:[#allocation36_spill] sm:$0xff] }
 0x2ae   :  { %v7974_v18 = vadd.f32 1e-06, %v4381_v52  ;;  %v4384_v23 = vrot.slane %v4383_v37, 2  ;;  %v7976_v45 = vmax.f32 %v4173_v61, 0.0  ;;  %v7980_v58 = vadd.f32 %v9681_v19, %v9680_v21  ;;  %v9687_v35 = vld [vmem:[#allocation78_spill] sm:$0xff]  ;;  %v9689_v40 = vld [vmem:[#allocation37_spill] sm:$0xff] }
 0x2af   :  { %9679 = vst [vmem:[#allocation17_spill] sm:$0xff] %v7972_v5  ;;  %6753 = vrsqrt.f32 %v7965_v54  ;;  %v4390_v1 = vrot.slane %v4389_v53, 2  ;;  %v4300_v44 = vmul.f32 %v7967_v9, %v7967_v9  ;;  %v7987_v57 = vadd.f32 %v9684_v25, %v9683_v36  ;;  %v9690_v52 = vld [vmem:[#allocation79_spill] sm:$0xff]  ;;  %v9692_v36 = vld [vmem:[#allocation38_spill] sm:$0xff]  ;;  %v9693_v25 = vld [vmem:[#allocation80_spill] sm:$0xff] }
 0x2b0   :  { %9682 = vst [vmem:[#allocation59_spill] sm:$0xff] %v7980_v58  ;;  %6755 = vrsqrt.f32 %v7974_v18  ;;  %v4385_v48 = vadd.f32 %v4384_v23, %v4383_v37  ;;  %v4301_v61 = vmul.f32 %v7976_v45, %v7976_v45  ;;  %v3353_v28 = vpop.f32.mrf.mxu2  ;;  %v7994_v22 = vadd.f32 %v9687_v35, %v9686_v62  ;;  %v9695_v5 = vld [vmem:[#allocation39_spill] sm:$0xff]  ;;  %v9696_v62 = vld [vmem:[#allocation81_spill] sm:$0xff] }
 0x2b1   :  { %9685 = vst [vmem:[#allocation18_spill] sm:$0xff] %v7987_v57  ;;  %v7998_v12 = vadd.f32 %v9690_v52, %v9689_v40  ;;  %v4391_v27 = vadd.f32 %v4390_v1, %v4389_v53  ;;  %v4394_v46 = vrot.slane %v4300_v44, 4  ;;  %v3366_v21 = vpop.f32.mrf.mxu3  ;;  %v3377_v19 = vpop.f32.mrf.mxu0  ;;  %v8002_v57 = vadd.f32 %v9693_v25, %v9692_v36  ;;  %v9698_v1 = vld [vmem:[#allocation40_spill] sm:$0xff]  ;;  %v9699_v52 = vld [vmem:[#allocation82_spill] sm:$0xff]  ;;  %v9702_v36 = vld [vmem:[#allocation83_spill] sm:$0xff] }
 0x2b2   :  { %9688 = vst [vmem:[#allocation60_spill] sm:$0xff] %v7994_v22  ;;  %v4386_v37 = vrot.slane %v4385_v48, 1  ;;  %v4400_v23 = vrot.slane %v4301_v61, 4  ;;  %v4104_v28 = vadd.f32 %v3377_v19, %v7786_v42  ;;  %v3390_v58 = vpop.f32.mrf.mxu1  ;;  %v8007_v35 = vadd.f32 %v9696_v62, %v9695_v5  ;;  %v9704_v5 = vld [vmem:[#allocation42_spill] sm:$0xff]  ;;  %v9705_v19 = vld [vmem:[#allocation84_spill] sm:$0xff] }
 0x2b3   :  { %9691 = vst [vmem:[#allocation19_spill] sm:$0xff] %v7998_v12  ;;  %v4392_v22 = vrot.slane %v4391_v27, 1  ;;  %v4395_v40 = vadd.f32 %v4394_v46, %v4300_v44  ;;  %v4105_v53 = vadd.f32 %v3390_v58, %v7790_v8  ;;  %v8012_v21 = vadd.f32 %v9699_v52, %v9698_v1  ;;  %v9701_v12 = vld [vmem:[#allocation41_spill] sm:$0xff] }
 0x2b4   :  { %9694 = vst [vmem:[#allocation61_spill] sm:$0xff] %v8002_v57  ;;  %v8016_v25 = vadd.f32 %v9702_v36, %v9701_v12  ;;  %v4387_v57 = vadd.f32 %v4386_v37, %v4385_v48  ;;  %v4401_v32 = vadd.f32 %v4400_v23, %v4301_v61  ;;  %6528 = vmatmul.msk.bf16.vlgmr.msra.gmra.mxu0 %vm435_vm1, %v7588_v7  ;;  %vm4832_vm2 = vweird.f32 %v7965_v54 }
 0x2b5   :  { %9697 = vst [vmem:[#allocation20_spill] sm:$0xff] %v8007_v35  ;;  %v8020_v42 = vpop.eup %6753  ;;  %v8024_v44 = vadd.f32 %v9705_v19, %v9704_v5  ;;  %v4393_v8 = vadd.f32 %v4392_v22, %v4391_v27  ;;  %v4396_v58 = vrot.slane %v4395_v40, 2  ;;  %v4174_v46 = vadd.f32 %v7800_v15, %v4104_v28  ;;  %6529 = vmatmul.msk.bf16.vlgmr.msra.gmra.mxu1 %vm435_vm1, %v7588_v7 }
 0x2b6   :  { %9700 = vst [vmem:[#allocation62_spill] sm:$0xff] %v8012_v21  ;;  %6530 = vmatmul.msk.bf16.vlgmr.msra.gmra.mxu2 %vm435_vm1, %v7588_v7  ;;  %v8031_v48 = vpop.eup %6755  ;;  %v4827_v61 = vmul.f32 %v8020_v42, %v7965_v54  ;;  %v8035_v12 = vadd.f32 1e-06, %v4387_v57  ;;  %v4402_v37 = vrot.slane %v4401_v32, 2  ;;  %v4175_v23 = vadd.f32 %v7800_v15, %v4105_v53  ;;  %6531 = vmatmul.msk.bf16.vlgmr.msra.gmra.mxu3 %vm435_vm1, %v7588_v7 }
 0x2b7   :  { %9703 = vst [vmem:[#allocation21_spill] sm:$0xff] %v8016_v25  ;;  %v4837_v22 = vmul.f32 %v8031_v48, %v7974_v18  ;;  %v8043_v27 = vadd.f32 1e-06, %v4393_v8  ;;  %v4397_v28 = vadd.f32 %v4396_v58, %v4395_v40  ;;  %vm4842_vm3 = vweird.f32 %v7974_v18 }
 0x2b8   :  { %9706 = vst [vmem:[#allocation63_spill] sm:$0xff] %v8024_v44  ;;  %v4828_v62 = vmul.f32 %v8020_v42, %v4827_v61  ;;  %6757 = vrsqrt.f32 %v8035_v12  ;;  %v4403_v57 = vadd.f32 %v4402_v37, %v4401_v32  ;;  %v3403_v1 = vpop.f32.mrf.mxu2  ;;  %vm4833_vm4 = vweird.f32 %v8020_v42 }
 0x2b9   :  { %v4838_v53 = vmul.f32 %v8031_v48, %v4837_v22  ;;  %6759 = vrsqrt.f32 %v8043_v27  ;;  %v4398_v52 = vrot.slane %v4397_v28, 1  ;;  %v3416_v36 = vpop.f32.mrf.mxu3  ;;  %v3379_v5 = vpop.f32.mrf.mxu0  ;;  %v8051_v40 = vmax.f32 %v4174_v46, 0.0  ;;  %vm4834_vm6 = vmor %vm4832_vm2, %vm4833_vm4 }
 0x2ba   :  { %v4829_v19 = vmul.f32 0.5, %v4828_v62  ;;  %v4404_v8 = vrot.slane %v4403_v57, 1  ;;  %v8053_v58 = vmax.f32 %v4175_v23, 0.0  ;;  %v3392_v61 = vpop.f32.mrf.mxu1  ;;  %v4106_v32 = vadd.f32 %v3403_v1, %v7794_v30 }
 0x2bb   :  { %v4839_v44 = vmul.f32 0.5, %v4838_v53  ;;  %v4399_v25 = vadd.f32 %v4398_v52, %v4397_v28  ;;  %v4107_v37 = vadd.f32 %v3416_v36, %v7798_v14  ;;  %v4302_v35 = vmul.f32 %v8051_v40, %v8051_v40 }
 0x2bc   :  { %v4830_v21 = vsub.f32 1.5, %v4829_v19  ;;  %v4405_v22 = vadd.f32 %v4404_v8, %v4403_v57  ;;  %v4303_v62 = vmul.f32 %v8053_v58, %v8053_v58  ;;  %vm4843_vm5 = vweird.f32 %v8031_v48 }
 0x2bd   :  { %v4840_v5 = vsub.f32 1.5, %v4839_v44  ;;  %v8062_v46 = vadd.f32 1e-06, %v4399_v25  ;;  %v4176_v23 = vadd.f32 %v7800_v15, %v4106_v32  ;;  %v4406_v57 = vrot.slane %v4302_v35, 4  ;;  %vm4844_vm8 = vmor %vm4842_vm3, %vm4843_vm5 }
 0x2be   :  { %v8065_v28 = vpop.eup %6757  ;;  %v4831_v30 = vmul.f32 %v8020_v42, %v4830_v21  ;;  %v8068_v14 = vadd.f32 1e-06, %v4405_v22  ;;  %v4177_v1 = vadd.f32 %v7800_v15, %v4107_v37  ;;  %vm4852_vm7 = vweird.f32 %v8035_v12 }
 0x2bf   :  { %v8071_v53 = vpop.eup %6759  ;;  %v4841_v25 = vmul.f32 %v8031_v48, %v4840_v5  ;;  %v4847_v44 = vmul.f32 %v8065_v28, %v8035_v12  ;;  %6761 = vrsqrt.f32 %v8062_v46  ;;  %v4412_v21 = vrot.slane %v4303_v62, 4 }
 0x2c0   :  { %v4835_v52 = vsel %vm4834_vm6, %v8020_v42, %v4831_v30  ;;  %vm4853_vm9 = vweird.f32 %v8065_v28  ;;  %v4857_v54 = vmul.f32 %v8071_v53, %v8043_v27  ;;  %vm4862_vm10 = vweird.f32 %v8043_v27  ;;  %v3405_v36 = vpop.f32.mrf.mxu2 }
 0x2c1   :  { %v5448_v19 = vmul.f32 %v4835_v52, %v7840_v24  ;;  %v4845_v8 = vsel %vm4844_vm8, %v8031_v48, %v4841_v25  ;;  %v4848_v61 = vmul.f32 %v8065_v28, %v4847_v44  ;;  %6763 = vrsqrt.f32 %v8068_v14  ;;  %v3418_v42 = vpop.f32.mrf.mxu3  ;;  %v3429_v32 = vpop.f32.mrf.mxu0  ;;  %vm4854_vm14 = vmor %vm4852_vm7, %vm4853_vm9 }
 0x2c2   :  { %v5449_v18 = vmul.f32 %v4845_v8, %v7854_v34  ;;  %v4858_v37 = vmul.f32 %v8071_v53, %v4857_v54  ;;  %vm4863_vm11 = vweird.f32 %v8071_v53  ;;  %v4407_v22 = vadd.f32 %v4406_v57, %v4302_v35  ;;  %v8098_v5 = vpop.f32.mrf.mxu1 }
 0x2c3   :  { %v4849_v30 = vmul.f32 0.5, %v4848_v61  ;;  %v4413_v36 = vadd.f32 %v4412_v21, %v4303_v62  ;;  %v8100_v24 = vmax.f32 %v4176_v23, 0.0  ;;  %v8102_v48 = vmax.f32 %v4177_v1, 0.0  ;;  %v8113_v23 = vld [vmem:[#allocation5 + $0x8] sm:$0xf]  ;;  %vm4864_vm2 = vmor %vm4862_vm10, %vm4863_vm11 }
 0x2c4   :  { %v5511_v25 = vpack.c.bf16 %v5449_v18, %v5448_v19  ;;  %v4859_v44 = vmul.f32 0.5, %v4858_v37  ;;  %v4408_v52 = vrot.slane %v4407_v22, 2  ;;  %v4108_v42 = vadd.f32 %v3429_v32, %v7804_v49  ;;  %6532 = vmatmul.msk.bf16.vlgmr.msrb.gmra.mxu0 %vm435_vm1, %v7588_v7 }
 0x2c5   :  { %v8107_v34 = vpop.eup %6761  ;;  %v4850_v54 = vsub.f32 1.5, %v4849_v30  ;;  %v4414_v35 = vrot.slane %v4413_v36, 2  ;;  %v4304_v57 = vmul.f32 %v8100_v24, %v8100_v24  ;;  %v4305_v62 = vmul.f32 %v8102_v48, %v8102_v48  ;;  %6533 = vmatmul.msk.bf16.vlgmr.msrb.gmra.mxu1 %vm435_vm1, %v8113_v23 }
 0x2c6   :  { %6534 = vmatmul.msk.bf16.vlgmr.msrb.gmra.mxu2 %vm435_vm1, %v8113_v23  ;;  %5543 = vst [vmem:[#allocation7 + $0x8] sm:$0xff] %v5511_v25  ;;  %v4860_v7 = vsub.f32 1.5, %v4859_v44  ;;  %v4867_v49 = vmul.f32 %v8107_v34, %v8062_v46  ;;  %vm4872_vm12 = vweird.f32 %v8062_v46  ;;  %vm4873_vm13 = vweird.f32 %v8107_v34  ;;  %6535 = vmatmul.msk.bf16.vlgmr.msrb.gmra.mxu3 %vm435_vm1, %v8113_v23 }
 0x2c7   :  { %v4409_v1 = vadd.f32 %v4408_v52, %v4407_v22  ;;  %v8125_v21 = vpop.eup %6763  ;;  %v4851_v19 = vmul.f32 %v8065_v28, %v4850_v54  ;;  %v4415_v8 = vadd.f32 %v4414_v35, %v4413_v36  ;;  %v4418_v61 = vrot.slane %v4304_v57, 4  ;;  %vm4874_vm3 = vmor %vm4872_vm12, %vm4873_vm13 }
 0x2c8   :  { %v4424_v32 = vrot.slane %v4305_v62, 4  ;;  %v4861_v18 = vmul.f32 %v8071_v53, %v4860_v7  ;;  %v4868_v37 = vmul.f32 %v8107_v34, %v4867_v49  ;;  %v4877_v22 = vmul.f32 %v8125_v21, %v8068_v14  ;;  %v8137_v30 = vpop.f32.mrf.mxu2 }
 0x2c9   :  { %vm4883_vm15 = vweird.f32 %v8125_v21  ;;  %v4855_v36 = vsel %vm4854_vm14, %v8065_v28, %v4851_v19  ;;  %v4410_v12 = vrot.slane %v4409_v1, 1  ;;  %v4416_v25 = vrot.slane %v4415_v8, 1  ;;  %v8144_v52 = vpop.f32.mrf.mxu3  ;;  %v3431_v54 = vpop.f32.mrf.mxu0 }
 0x2ca   :  { %v4419_v44 = vadd.f32 %v4418_v61, %v4304_v57  ;;  %v5450_v35 = vmul.f32 %v4855_v36, %v7940_v29  ;;  %v4865_v7 = vsel %vm4864_vm2, %v8071_v53, %v4861_v18  ;;  %v4869_v49 = vmul.f32 0.5, %v4868_v37  ;;  %v3444_v10 = vpop.f32.mrf.mxu1  ;;  %v6434_v18 = vld [vmem:[#allocation2 + $0xd0] sm:$0xf] }
 0x2cb   :  { %v4878_v63 = vmul.f32 %v8125_v21, %v4877_v22  ;;  %v5451_v28 = vmul.f32 %v4865_v7, %v7948_v31  ;;  %v4411_v19 = vadd.f32 %v4410_v12, %v4409_v1  ;;  %v4417_v43 = vadd.f32 %v4416_v25, %v4415_v8  ;;  %v6737_v1 = vld [vmem:[#allocation2 + $0x1d4] sm:$0x30]  ;;  %v9707_v8 = vld [vmem:[#allocation43_spill] sm:$0xff]  ;;  %v9708_v36 = vld [vmem:[#allocation85_spill] sm:$0xff] }
 0x2cc   :  { %v4420_v27 = vrot.slane %v4419_v44, 2  ;;  %v4870_v55 = vsub.f32 1.5, %v4869_v49  ;;  %v4425_v6 = vadd.f32 %v4424_v32, %v4305_v62  ;;  %v4178_v57 = vadd.f32 %v7800_v15, %v4108_v42 }
 0x2cd   :  { %v4879_v17 = vmul.f32 0.5, %v4878_v63  ;;  %v5512_v61 = vpack.c.bf16 %v5451_v28, %v5450_v35  ;;  %v8151_v54 = vadd.f32 1e-06, %v4411_v19  ;;  %v8153_v29 = vadd.f32 1e-06, %v4417_v43 }
 0x2ce   :  { %v4421_v53 = vadd.f32 %v4420_v27, %v4419_v44  ;;  %v4871_v37 = vmul.f32 %v8107_v34, %v4870_v55  ;;  %v4426_v22 = vrot.slane %v4425_v6, 2  ;;  %v8156_v31 = vmax.f32 %v4178_v57, 0.0  ;;  %v6436_v43 = vld [vmem:[#allocation2 + $0x1d8] sm:$0x30] }
 0x2cf   :  { %v4880_v10 = vsub.f32 1.5, %v4879_v17  ;;  %v8160_v63 = vadd.f32 %v9708_v36, %v9707_v8  ;;  %5544 = vst [vmem:[#allocation7 + $0x10] sm:$0xff] %v5512_v61  ;;  %vm4882_vm4 = vweird.f32 %v8068_v14  ;;  %6765 = vrsqrt.f32 %v8151_v54  ;;  %v6705_v17 = vld [vmem:[#allocation2 + $0xd4] sm:$0xf] }
 0x2d0   :  { %v4422_v55 = vrot.slane %v4421_v53, 1  ;;  %v4875_v42 = vsel %vm4874_vm3, %v8107_v34, %v4871_v37  ;;  %6767 = vrsqrt.f32 %v8153_v29  ;;  %v4427_v32 = vadd.f32 %v4426_v22, %v4425_v6  ;;  %v3457_v12 = vpop.f32.mrf.mxu2  ;;  %vm4884_vm5 = vmor %vm4882_vm4, %vm4883_vm15 }
 0x2d1   :  { %v4881_v62 = vmul.f32 %v8125_v21, %v4880_v10  ;;  %v5452_v25 = vmul.f32 %v4875_v42, %v7967_v9  ;;  %v4306_v14 = vmul.f32 %v8156_v31, %v8156_v31  ;;  %v4109_v44 = vadd.f32 %v8098_v5, %v7808_v33  ;;  %v3470_v35 = vpop.f32.mrf.mxu3  ;;  %v8178_v34 = vpop.f32.mrf.mxu0  ;;  %v9710_v10 = vld [vmem:[#allocation86_spill] sm:$0xff]  ;;  %v6426_v42 = vld [vmem:[#allocation2 + $0xc8] sm:$0xf] }
 0x2d2   :  { %v4423_v46 = vadd.f32 %v4422_v55, %v4421_v53  ;;  %v4428_v49 = vrot.slane %v4427_v32, 1  ;;  %v6435_v6 = vor.u32 %v6737_v1, %v6434_v18  ;;  %v6439_v28 = vor.u32 %v6705_v17, %v6436_v43  ;;  %v8181_v19 = vpop.f32.mrf.mxu1  ;;  %v9709_v18 = vld [vmem:[#allocation44_spill] sm:$0xff] }
 0x2d3   :  { %v4885_v7 = vsel %vm4884_vm5, %v8125_v21, %v4881_v62  ;;  %v4430_v57 = vrot.slane %v4306_v14, 4  ;;  %v4179_v61 = vadd.f32 %v7800_v15, %v4109_v44  ;;  %v4110_v21 = vadd.f32 %v8137_v30, %v7812_v38  ;;  %v6736_v62 = vld [vmem:[#allocation2 + $0x1cc] sm:$0x30] }
 0x2d4   :  { %v5453_v9 = vmul.f32 %v4885_v7, %v7976_v45  ;;  %v8184_v27 = vadd.f32 1e-06, %v4423_v46  ;;  %v4429_v53 = vadd.f32 %v4428_v49, %v4427_v32  ;;  %v3223_v33 = vsel %vm439_vm0, %v6435_v6, 0  ;;  %v6704_v7 = vld [vmem:[#allocation2 + $0xcc] sm:$0xf] }
 0x2d5   :  { %v3226_v5 = vsel %vm439_vm0, %v6439_v28, 0  ;;  %v8191_v37 = vpop.eup %6765  ;;  %v8195_v22 = vadd.f32 %v9710_v10, %v9709_v18  ;;  %v4431_v1 = vadd.f32 %v4430_v57, %v4306_v14  ;;  %3921 = vmatpush.bf16.msra.mxu2 %v3223_v33  ;;  %vm4892_vm6 = vweird.f32 %v8151_v54  ;;  %v6428_v49 = vld [vmem:[#allocation2 + $0x1d0] sm:$0x30] }
 0x2d6   :  { %v5513_v45 = vpack.c.bf16 %v5453_v9, %v5452_v25  ;;  %6769 = vrsqrt.f32 %v8184_v27  ;;  %3934 = vmatpush.bf16.msra.mxu3 %v3226_v5  ;;  %v8198_v8 = vpop.eup %6767  ;;  %v4887_v36 = vmul.f32 %v8191_v37, %v8151_v54  ;;  %v8203_v38 = vadd.f32 1e-06, %v4429_v53 }
 0x2d7   :  { %v8205_v30 = vmax.f32 %v4179_v61, 0.0  ;;  %v4897_v55 = vmul.f32 %v8198_v8, %v8153_v29  ;;  %vm4902_vm7 = vweird.f32 %v8153_v29  ;;  %v4432_v17 = vrot.slane %v4431_v1, 2 }
 0x2d8   :  { %5545 = vst [vmem:[#allocation7 + $0x18] sm:$0xff] %v5513_v45  ;;  %v4180_v43 = vadd.f32 %v7800_v15, %v4110_v21  ;;  %v4888_v32 = vmul.f32 %v8191_v37, %v4887_v36  ;;  %vm4893_vm8 = vweird.f32 %v8191_v37  ;;  %6771 = vrsqrt.f32 %v8203_v38  ;;  %6538 = vmatmul.msk.bf16.vlgmr.msra.gmra.mxu2 %vm435_vm1, %v8113_v23  ;;  %v8220_v25 = vpop.f32.mrf.mxu2 }
 0x2d9   :  { %v4307_v12 = vmul.f32 %v8205_v30, %v8205_v30  ;;  %6539 = vmatmul.msk.bf16.vlgmr.msra.gmra.mxu3 %vm435_vm1, %v8113_v23  ;;  %v4898_v46 = vmul.f32 %v8198_v8, %v4897_v55  ;;  %v4433_v14 = vadd.f32 %v4432_v17, %v4431_v1  ;;  %v4111_v35 = vadd.f32 %v8144_v52, %v7817_v39  ;;  %v8227_v6 = vpop.f32.mrf.mxu3  ;;  %v3483_v28 = vpop.f32.mrf.mxu0  ;;  %vm4894_vm12 = vmor %vm4892_vm6, %vm4893_vm8 }
 0x2da   :  { %v8223_v44 = vmax.f32 %v4180_v43, 0.0  ;;  %v4889_v9 = vmul.f32 0.5, %v4888_v32  ;;  %vm4903_vm9 = vweird.f32 %v8198_v8  ;;  %v6427_v61 = vor.u32 %v6736_v62, %v6426_v42  ;;  %v3496_v53 = vpop.f32.mrf.mxu1 }
 0x2db   :  { %v4436_v57 = vrot.slane %v4307_v12, 4  ;;  %v4899_v5 = vmul.f32 0.5, %v4898_v46  ;;  %v4434_v21 = vrot.slane %v4433_v14, 1  ;;  %v4181_v39 = vadd.f32 %v7800_v15, %v4111_v35  ;;  %vm4904_vm13 = vmor %vm4902_vm7, %vm4903_vm9 }
 0x2dc   :  { %v8230_v33 = vpop.eup %6769  ;;  %v4308_v18 = vmul.f32 %v8223_v44, %v8223_v44  ;;  %v4890_v52 = vsub.f32 1.5, %v4889_v9  ;;  %vm4912_vm10 = vweird.f32 %v8184_v27  ;;  %v6431_v1 = vor.u32 %v6704_v7, %v6428_v49 }
 0x2dd   :  { %v4907_v10 = vmul.f32 %v8230_v33, %v8184_v27  ;;  %v4437_v45 = vadd.f32 %v4436_v57, %v4307_v12  ;;  %v4900_v36 = vsub.f32 1.5, %v4899_v5  ;;  %vm4913_vm11 = vweird.f32 %v8230_v33 }
 0x2de   :  { %v4435_v55 = vadd.f32 %v4434_v21, %v4433_v14  ;;  %v4442_v17 = vrot.slane %v4308_v18, 4  ;;  %v8239_v43 = vpop.eup %6771  ;;  %v4891_v42 = vmul.f32 %v8191_v37, %v4890_v52  ;;  %v3217_v46 = vsel %vm439_vm0, %v6427_v61, 0  ;;  %vm8282_vm15 = vmor %vm4912_vm10, %vm4913_vm11 }
 0x2df   :  { %v4908_v62 = vmul.f32 %v8230_v33, %v4907_v10  ;;  %v4438_v32 = vrot.slane %v4437_v45, 2  ;;  %v4901_v12 = vmul.f32 %v8198_v8, %v4900_v36  ;;  %v4917_v14 = vmul.f32 %v8239_v43, %v8203_v38  ;;  %3895 = vmatpush.bf16.msra.mxu0 %v3217_v46 }
 0x2e0   :  { %v8251_v35 = vadd.f32 1e-06, %v4435_v55  ;;  %v8253_v7 = vmax.f32 %v4181_v39, 0.0  ;;  %v4895_v49 = vsel %vm4894_vm12, %v8191_v37, %v4891_v42  ;;  %v4443_v9 = vadd.f32 %v4442_v17, %v4308_v18  ;;  %v3509_v57 = vpop.f32.mrf.mxu2  ;;  %v6450_v18 = vld [vmem:[#allocation2 + $0xe0] sm:$0xf] }
 0x2e1   :  { %v4909_v28 = vmul.f32 0.5, %v4908_v62  ;;  %v4439_v54 = vadd.f32 %v4438_v32, %v4437_v45  ;;  %v5454_v61 = vmul.f32 %v4895_v49, %v8051_v40  ;;  %v4905_v53 = vsel %vm4904_vm13, %v8198_v8, %v4901_v12  ;;  %v3522_v21 = vpop.f32.mrf.mxu3  ;;  %v8264_v39 = vpop.f32.mrf.mxu0  ;;  %v6739_v55 = vld [vmem:[#allocation2 + $0x1e4] sm:$0x30] }
 0x2e2   :  { %v4918_v5 = vmul.f32 %v8239_v43, %v4917_v14  ;;  %6773 = vrsqrt.f32 %v8251_v35  ;;  %v5455_v37 = vmul.f32 %v4905_v53, %v8053_v58  ;;  %vm4923_vm14 = vweird.f32 %v8239_v43  ;;  %6536 = vmatmul.msk.bf16.vlgmr.msra.gmra.mxu0 %vm435_vm1, %v8113_v23  ;;  %v8270_v40 = vpop.f32.mrf.mxu1 }
 0x2e3   :  { %v4910_v52 = vsub.f32 1.5, %v4909_v28  ;;  %v4440_v29 = vrot.slane %v4439_v54, 1  ;;  %v4444_v10 = vrot.slane %v4443_v9, 2  ;;  %v4309_v45 = vmul.f32 %v8253_v7, %v8253_v7 }
 0x2e4   :  { %v4919_v8 = vmul.f32 0.5, %v4918_v5  ;;  %v3220_v36 = vsel %vm439_vm0, %v6431_v1, 0  ;;  %v5514_v17 = vpack.c.bf16 %v5455_v37, %v5454_v61  ;;  %v4112_v62 = vadd.f32 %v8178_v34, %v7821_v0  ;;  %v6452_v5 = vld [vmem:[#allocation2 + $0x1e8] sm:$0x30] }
 0x2e5   :  { %v4911_v58 = vmul.f32 %v8230_v33, %v4910_v52  ;;  %v4441_v42 = vadd.f32 %v4440_v29, %v4439_v54  ;;  %3908 = vmatpush.bf16.msra.mxu1 %v3220_v36  ;;  %v4445_v12 = vadd.f32 %v4444_v10, %v4443_v9  ;;  %v4448_v1 = vrot.slane %v4309_v45, 4 }
 0x2e6   :  { %v4920_v46 = vsub.f32 1.5, %v4919_v8  ;;  %v4113_v14 = vadd.f32 %v8181_v19, %v7825_v59  ;;  %5546 = vst [vmem:[#allocation7 + $0x20] sm:$0xff] %v5514_v17  ;;  %v4182_v34 = vadd.f32 %v7800_v15, %v4112_v62  ;;  %v6451_v27 = vor.u32 %v6739_v55, %v6450_v18  ;;  %v9713_v59 = vld [vmem:[#allocation45_spill] sm:$0xff]  ;;  %v9714_v19 = vld [vmem:[#allocation87_spill] sm:$0xff] }
 0x2e7   :  { %v4915_v49 = vsel %vm8282_vm15, %v8230_v33, %v4911_v58  ;;  %v8291_v0 = vadd.f32 1e-06, %v4441_v42  ;;  %vm4922_vm2 = vweird.f32 %v8203_v38  ;;  %v4446_v9 = vrot.slane %v4445_v12, 1  ;;  %v6707_v38 = vld [vmem:[#allocation2 + $0xe4] sm:$0xf] }
 0x2e8   :  { %v8294_v28 = vpop.eup %6773  ;;  %v4921_v54 = vmul.f32 %v8239_v43, %v4920_v46  ;;  %v4449_v57 = vadd.f32 %v4448_v1, %v4309_v45  ;;  %6537 = vmatmul.msk.bf16.vlgmr.msra.gmra.mxu1 %vm435_vm1, %v8113_v23  ;;  %v8302_v61 = vadd.f32 %v9714_v19, %v9713_v59  ;;  %v5456_v33 = vmul.f32 %v4915_v49, %v8100_v24  ;;  %vm4924_vm3 = vmor %vm4922_vm2, %vm4923_vm14  ;;  %v8310_v21 = vpop.f32.mrf.mxu2  ;;  %v6442_v49 = vld [vmem:[#allocation2 + $0xd8] sm:$0xf]  ;;  %v6738_v59 = vld [vmem:[#allocation2 + $0x1dc] sm:$0x30] }
 0x2e9   :  { %v4927_v53 = vmul.f32 %v8294_v28, %v8251_v35  ;;  %6775 = vrsqrt.f32 %v8291_v0  ;;  %v4447_v52 = vadd.f32 %v4446_v9, %v4445_v12  ;;  %v8313_v18 = vmax.f32 %v4182_v34, 0.0  ;;  %v8315_v8 = vpop.f32.mrf.mxu3  ;;  %v3535_v24 = vpop.f32.mrf.mxu0 }
 0x2ea   :  { %v4925_v37 = vsel %vm4924_vm3, %v8239_v43, %v4921_v54  ;;  %v4450_v29 = vrot.slane %v4449_v57, 2  ;;  %v4183_v36 = vadd.f32 %v7800_v15, %v4113_v14  ;;  %v3235_v55 = vsel %vm439_vm0, %v6451_v27, 0  ;;  %v3548_v17 = vpop.f32.mrf.mxu1 }
 0x2eb   :  { %v5457_v10 = vmul.f32 %v4925_v37, %v8102_v48  ;;  %v4928_v45 = vmul.f32 %v8294_v28, %v4927_v53  ;;  %v8321_v58 = vadd.f32 1e-06, %v4447_v52  ;;  %v4310_v43 = vmul.f32 %v8313_v18, %v8313_v18  ;;  %3973 = vmatpush.bf16.msrb.mxu2 %v3235_v55 }
 0x2ec   :  { %v4451_v42 = vadd.f32 %v4450_v29, %v4449_v57  ;;  %v6455_v62 = vor.u32 %v6707_v38, %v6452_v5  ;;  %v8325_v12 = vmax.f32 %v4183_v36, 0.0  ;;  %v4114_v48 = vadd.f32 %v8220_v25, %v7830_v2 }
 0x2ed   :  { %v5515_v32 = vpack.c.bf16 %v5457_v10, %v5456_v33  ;;  %v4929_v46 = vmul.f32 0.5, %v4928_v45  ;;  %vm4933_vm4 = vweird.f32 %v8294_v28  ;;  %6777 = vrsqrt.f32 %v8321_v58 }
 0x2ee   :  { %v4452_v1 = vrot.slane %v4451_v42, 1  ;;  %v4454_v14 = vrot.slane %v4310_v43, 4  ;;  %v4311_v54 = vmul.f32 %v8325_v12, %v8325_v12  ;;  %v3238_v9 = vsel %vm439_vm0, %v6455_v62, 0  ;;  %6542 = vmatmul.msk.bf16.vlgmr.msrb.gmra.mxu2 %vm435_vm1, %v8113_v23 }
 0x2ef   :  { %v8331_v34 = vpop.eup %6775  ;;  %5547 = vst [vmem:[#allocation7 + $0x28] sm:$0xff] %v5515_v32  ;;  %v4930_v27 = vsub.f32 1.5, %v4929_v46  ;;  %v4184_v57 = vadd.f32 %v7800_v15, %v4114_v48  ;;  %vm4932_vm5 = vweird.f32 %v8251_v35  ;;  %3986 = vmatpush.bf16.msrb.mxu3 %v3238_v9  ;;  %v4115_v5 = vadd.f32 %v8227_v6, %v7834_v50 }
 0x2f0   :  { %v4937_v2 = vmul.f32 %v8331_v34, %v8291_v0  ;;  %v4453_v25 = vadd.f32 %v4452_v1, %v4451_v42  ;;  %v4455_v19 = vadd.f32 %v4454_v14, %v4310_v43  ;;  %v4460_v53 = vrot.slane %v4311_v54, 4  ;;  %v3561_v37 = vpop.f32.mrf.mxu2  ;;  %vm8349_vm6 = vmor %vm4932_vm5, %vm4933_vm4  ;;  %v6706_v43 = vld [vmem:[#allocation2 + $0xdc] sm:$0xf] }
 0x2f1   :  { %v4931_v33 = vmul.f32 %v8294_v28, %v4930_v27  ;;  %v8343_v38 = vmax.f32 %v4184_v57, 0.0  ;;  %v6443_v10 = vor.u32 %v6738_v59, %v6442_v49  ;;  %v3574_v45 = vpop.f32.mrf.mxu3  ;;  %v4185_v6 = vadd.f32 %v7800_v15, %v4115_v5 }
 0x2f2   :  { %v4938_v35 = vmul.f32 %v8331_v34, %v4937_v2  ;;  %v8354_v29 = vadd.f32 1e-06, %v4453_v25  ;;  %v4456_v24 = vrot.slane %v4455_v19, 2  ;;  %v4461_v55 = vadd.f32 %v4460_v53, %v4311_v54  ;;  %6543 = vmatmul.msk.bf16.vlgmr.msrb.gmra.mxu3 %vm435_vm1, %v8113_v23  ;;  %v8375_v54 = vpop.f32.mrf.mxu0  ;;  %v8377_v9 = vpop.f32.mrf.mxu1 }
 0x2f3   :  { %v4935_v36 = vsel %vm8349_vm6, %v8294_v28, %v4931_v33  ;;  %v4312_v50 = vmul.f32 %v8343_v38, %v8343_v38  ;;  %v8364_v17 = vpop.eup %6777  ;;  %vm4942_vm7 = vweird.f32 %v8291_v0  ;;  %vm4943_vm8 = vweird.f32 %v8331_v34  ;;  %v6444_v28 = vld [vmem:[#allocation2 + $0x1e0] sm:$0x30] }
 0x2f4   :  { %v4939_v42 = vmul.f32 0.5, %v4938_v35  ;;  %6779 = vrsqrt.f32 %v8354_v29  ;;  %v5458_v62 = vmul.f32 %v4935_v36, %v8156_v31  ;;  %v4947_v32 = vmul.f32 %v8364_v17, %v8321_v58  ;;  %vm4944_vm9 = vmor %vm4942_vm7, %vm4943_vm8 }
 0x2f5   :  { %v4457_v46 = vadd.f32 %v4456_v24, %v4455_v19  ;;  %v4462_v48 = vrot.slane %v4461_v55, 2  ;;  %v4466_v14 = vrot.slane %v4312_v50, 4  ;;  %v8372_v49 = vmax.f32 %v4185_v6, 0.0 }
 0x2f6   :  { %v4940_v1 = vsub.f32 1.5, %v4939_v42  ;;  %v3229_v27 = vsel %vm439_vm0, %v6443_v10, 0  ;;  %v4948_v57 = vmul.f32 %v8364_v17, %v4947_v32  ;;  %v6447_v31 = vor.u32 %v6706_v43, %v6444_v28 }
 0x2f7   :  { %v4458_v59 = vrot.slane %v4457_v46, 1  ;;  %v4463_v2 = vadd.f32 %v4462_v48, %v4461_v55  ;;  %3947 = vmatpush.bf16.msrb.mxu0 %v3229_v27  ;;  %v4467_v19 = vadd.f32 %v4466_v14, %v4312_v50  ;;  %v4313_v33 = vmul.f32 %v8372_v49, %v8372_v49  ;;  %v6741_v48 = vld [vmem:[#allocation2 + $0x1f4] sm:$0x30]  ;;  %v6709_v27 = vld [vmem:[#allocation2 + $0xf4] sm:$0xf] }
 0x2f8   :  { %v4941_v25 = vmul.f32 %v8331_v34, %v4940_v1  ;;  %v4116_v53 = vadd.f32 %v8264_v39, %v7838_v3  ;;  %v4949_v5 = vmul.f32 0.5, %v4948_v57  ;;  %v3232_v35 = vsel %vm439_vm0, %v6447_v31, 0 }
 0x2f9   :  { %v4459_v37 = vadd.f32 %v4458_v59, %v4457_v46  ;;  %v4464_v52 = vrot.slane %v4463_v2, 1  ;;  %v4468_v45 = vrot.slane %v4467_v19, 2  ;;  %v4472_v36 = vrot.slane %v4313_v33, 4  ;;  %3960 = vmatpush.bf16.msrb.mxu1 %v3232_v35 }
 0x2fa   :  { %v8390_v24 = vpop.eup %6779  ;;  %v4945_v10 = vsel %vm4944_vm9, %v8331_v34, %v4941_v25  ;;  %v4186_v55 = vadd.f32 %v7800_v15, %v4116_v53  ;;  %6540 = vmatmul.msk.bf16.vlgmr.msrb.gmra.mxu0 %vm435_vm1, %v8113_v23  ;;  %v4950_v39 = vsub.f32 1.5, %v4949_v5  ;;  %vm4953_vm10 = vweird.f32 %v8364_v17  ;;  %v3600_v57 = vpop.f32.mrf.mxu1  ;;  %v6468_v25 = vld [vmem:[#allocation2 + $0x1f8] sm:$0x30] }
 0x2fb   :  { %v5459_v3 = vmul.f32 %v4945_v10, %v8205_v30  ;;  %v4957_v0 = vmul.f32 %v8390_v24, %v8354_v29  ;;  %v8400_v50 = vadd.f32 1e-06, %v4459_v37  ;;  %v4465_v6 = vadd.f32 %v4464_v52, %v4463_v2  ;;  %v6466_v30 = vld [vmem:[#allocation2 + $0xf0] sm:$0xf]  ;;  %v8428_v5 = vpop.f32.mrf.mxu3 }
 0x2fc   :  { %v4469_v34 = vadd.f32 %v4468_v45, %v4467_v19  ;;  %v4473_v42 = vadd.f32 %v4472_v36, %v4313_v33  ;;  %v4951_v28 = vmul.f32 %v8364_v17, %v4950_v39  ;;  %v8404_v46 = vmax.f32 %v4186_v55, 0.0  ;;  %6541 = vmatmul.msk.bf16.vlgmr.msrb.gmra.mxu1 %vm435_vm1, %v8113_v23  ;;  %v8421_v19 = vpop.f32.mrf.mxu2 }
 0x2fd   :  { %v5516_v43 = vpack.c.bf16 %v5459_v3, %v5458_v62  ;;  %v4958_v32 = vmul.f32 %v8390_v24, %v4957_v0  ;;  %vm4952_vm11 = vweird.f32 %v8321_v58  ;;  %6781 = vrsqrt.f32 %v8400_v50  ;;  %v3587_v62 = vpop.f32.mrf.mxu0 }
 0x2fe   :  { %v8410_v1 = vadd.f32 1e-06, %v4465_v6  ;;  %v4470_v14 = vrot.slane %v4469_v34, 1  ;;  %vm8414_vm12 = vmor %vm4952_vm11, %vm4953_vm10  ;;  %vm4962_vm13 = vweird.f32 %v8354_v29  ;;  %v4474_v31 = vrot.slane %v4473_v42, 2 }
 0x2ff   :  { %5548 = vst [vmem:[#allocation7 + $0x30] sm:$0xff] %v5516_v43  ;;  %v4959_v2 = vmul.f32 0.5, %v4958_v32  ;;  %v4314_v58 = vmul.f32 %v8404_v46, %v8404_v46  ;;  %v4955_v33 = vsel %vm8414_vm12, %v8364_v17, %v4951_v28  ;;  %vm4963_vm14 = vweird.f32 %v8390_v24 }
 0x300   :  { %6783 = vrsqrt.f32 %v8410_v1  ;;  %v4471_v53 = vadd.f32 %v4470_v14, %v4469_v34  ;;  %v4475_v52 = vadd.f32 %v4474_v31, %v4473_v42  ;;  %v4117_v10 = vadd.f32 %v8270_v40, %v7844_v26  ;;  %vm4964_vm15 = vmor %vm4962_vm13, %vm4963_vm14 }
 0x301   :  { %v4960_v37 = vsub.f32 1.5, %v4959_v2  ;;  %v4478_v35 = vrot.slane %v4314_v58, 4  ;;  %v6467_v36 = vor.u32 %v6741_v48, %v6466_v30  ;;  %v6471_v55 = vor.u32 %v6709_v27, %v6468_v25  ;;  %v6458_v25 = vld [vmem:[#allocation2 + $0xe8] sm:$0xf] }
 0x302   :  { %v8432_v45 = vadd.f32 1e-06, %v4471_v53  ;;  %v4118_v17 = vadd.f32 %v8310_v21, %v7848_v60  ;;  %v4476_v39 = vrot.slane %v4475_v52, 1  ;;  %v4187_v6 = vadd.f32 %v7800_v15, %v4117_v10  ;;  %v6740_v10 = vld [vmem:[#allocation2 + $0x1ec] sm:$0x30] }
 0x303   :  { %v4961_v3 = vmul.f32 %v8390_v24, %v4960_v37  ;;  %v4479_v0 = vadd.f32 %v4478_v35, %v4314_v58  ;;  %v8438_v34 = vpop.eup %6781  ;;  %v5460_v42 = vmul.f32 %v4955_v33, %v8223_v44  ;;  %v3247_v26 = vsel %vm439_vm0, %v6467_v36, 0  ;;  %v3626_v2 = vpop.f32.mrf.mxu3 }
 0x304   :  { %6785 = vrsqrt.f32 %v8432_v45  ;;  %v3250_v60 = vsel %vm439_vm0, %v6471_v55, 0  ;;  %v4967_v21 = vmul.f32 %v8438_v34, %v8400_v50  ;;  %vm4972_vm2 = vweird.f32 %v8400_v50  ;;  %4025 = vmatpush.bf16.msra.mxu2 %v3247_v26  ;;  %v3613_v27 = vpop.f32.mrf.mxu2 }
 0x305   :  { %v4965_v40 = vsel %vm4964_vm15, %v8390_v24, %v4961_v3  ;;  %v4477_v43 = vadd.f32 %v4476_v39, %v4475_v52  ;;  %4038 = vmatpush.bf16.msra.mxu3 %v3250_v60  ;;  %v4480_v28 = vrot.slane %v4479_v0, 2  ;;  %v8455_v32 = vmax.f32 %v4187_v6, 0.0 }
 0x306   :  { %v8452_v44 = vpop.eup %6783  ;;  %v5461_v29 = vmul.f32 %v4965_v40, %v8253_v7  ;;  %v4188_v30 = vadd.f32 %v7800_v15, %v4118_v17  ;;  %v4968_v48 = vmul.f32 %v8438_v34, %v4967_v21  ;;  %vm4982_vm3 = vweird.f32 %v8410_v1 }
 0x307   :  { %v4977_v24 = vmul.f32 %v8452_v44, %v8410_v1  ;;  %v8462_v14 = vadd.f32 1e-06, %v4477_v43  ;;  %v4481_v57 = vadd.f32 %v4480_v28, %v4479_v0  ;;  %v4315_v7 = vmul.f32 %v8455_v32, %v8455_v32  ;;  %6546 = vmatmul.msk.bf16.vlgmr.msra.gmra.mxu2 %vm435_vm1, %v8113_v23 }
 0x308   :  { %v5517_v62 = vpack.c.bf16 %v5461_v29, %v5460_v42  ;;  %v8466_v59 = vmax.f32 %v4188_v30, 0.0  ;;  %6547 = vmatmul.msk.bf16.vlgmr.msra.gmra.mxu3 %vm435_vm1, %v8113_v23  ;;  %v4969_v31 = vmul.f32 0.5, %v4968_v48  ;;  %vm4973_vm4 = vweird.f32 %v8438_v34 }
 0x309   :  { %v4978_v58 = vmul.f32 %v8452_v44, %v4977_v24  ;;  %6787 = vrsqrt.f32 %v8462_v14  ;;  %v4482_v53 = vrot.slane %v4481_v57, 1  ;;  %v4484_v37 = vrot.slane %v4315_v7, 4  ;;  %vm4974_vm6 = vmor %vm4972_vm2, %vm4973_vm4 }
 0x30a   :  { %v8475_v33 = vpop.eup %6785  ;;  %5549 = vst [vmem:[#allocation7 + $0x38] sm:$0xff] %v5517_v62  ;;  %v4316_v52 = vmul.f32 %v8466_v59, %v8466_v59  ;;  %v4119_v35 = vadd.f32 %v8315_v8, %v7852_v13  ;;  %v4970_v36 = vsub.f32 1.5, %v4969_v31  ;;  %vm4983_vm5 = vweird.f32 %v8452_v44  ;;  %v8487_v13 = vpop.f32.mrf.mxu0 }
 0x30b   :  { %v4979_v55 = vmul.f32 0.5, %v4978_v58  ;;  %v4987_v17 = vmul.f32 %v8475_v33, %v8432_v45  ;;  %v4483_v3 = vadd.f32 %v4482_v53, %v4481_v57  ;;  %v4485_v39 = vadd.f32 %v4484_v37, %v4315_v7  ;;  %v8489_v8 = vpop.f32.mrf.mxu1  ;;  %vm4984_vm7 = vmor %vm4982_vm3, %vm4983_vm5  ;;  %v6460_v7 = vld [vmem:[#allocation2 + $0x1f0] sm:$0x30] }
 0x30c   :  { %v4490_v0 = vrot.slane %v4316_v52, 4  ;;  %v4189_v6 = vadd.f32 %v7800_v15, %v4119_v35  ;;  %v4971_v42 = vmul.f32 %v8438_v34, %v4970_v36  ;;  %v6459_v40 = vor.u32 %v6740_v10, %v6458_v25 }
 0x30d   :  { %v4980_v26 = vsub.f32 1.5, %v4979_v55  ;;  %v4988_v60 = vmul.f32 %v8475_v33, %v4987_v17  ;;  %v8495_v21 = vadd.f32 1e-06, %v4483_v3  ;;  %v4486_v43 = vrot.slane %v4485_v39, 2  ;;  %v8524_v17 = vpop.f32.mrf.mxu2  ;;  %v8526_v3 = vpop.f32.mrf.mxu3 }
 0x30e   :  { %v4491_v29 = vadd.f32 %v4490_v0, %v4316_v52  ;;  %v8497_v28 = vmax.f32 %v4189_v6, 0.0  ;;  %v4975_v48 = vsel %vm4974_vm6, %v8438_v34, %v4971_v42  ;;  %v3241_v62 = vsel %vm439_vm0, %v6459_v40, 0  ;;  %v6708_v34 = vld [vmem:[#allocation2 + $0xec] sm:$0xf] }
 0x30f   :  { %v8499_v30 = vpop.eup %6787  ;;  %v4981_v24 = vmul.f32 %v8452_v44, %v4980_v26  ;;  %v4989_v27 = vmul.f32 0.5, %v4988_v60  ;;  %v5462_v57 = vmul.f32 %v4975_v48, %v8313_v18  ;;  %vm4992_vm8 = vweird.f32 %v8432_v45  ;;  %3999 = vmatpush.bf16.msra.mxu0 %v3241_v62 }
 0x310   :  { %v4997_v50 = vmul.f32 %v8499_v30, %v8462_v14  ;;  %6789 = vrsqrt.f32 %v8495_v21  ;;  %vm4993_vm9 = vweird.f32 %v8475_v33  ;;  %v4487_v18 = vadd.f32 %v4486_v43, %v4485_v39  ;;  %v6742_v39 = vld [vmem:[#allocation2 + $0x1fc] sm:$0x30] }
 0x311   :  { %v4985_v2 = vsel %vm4984_vm7, %v8452_v44, %v4981_v24  ;;  %v4990_v31 = vsub.f32 1.5, %v4989_v27  ;;  %v4492_v25 = vrot.slane %v4491_v29, 2  ;;  %v4317_v53 = vmul.f32 %v8497_v28, %v8497_v28  ;;  %vm8532_vm10 = vmor %vm4992_vm8, %vm4993_vm9 }
 0x312   :  { %v5463_v58 = vmul.f32 %v4985_v2, %v8325_v12  ;;  %v4998_v1 = vmul.f32 %v8499_v30, %v4997_v50  ;;  %v4488_v52 = vrot.slane %v4487_v18, 1  ;;  %v6463_v35 = vor.u32 %v6708_v34, %v6460_v7  ;;  %6544 = vmatmul.msk.bf16.vlgmr.msra.gmra.mxu0 %vm435_vm1, %v8113_v23  ;;  %v3639_v6 = vpop.f32.mrf.mxu0  ;;  %v6482_v50 = vld [vmem:[#allocation2 + $0x100] sm:$0xf]  ;;  %v6743_v34 = vld [vmem:[#allocation2 + $0x204] sm:$0x30] }
 0x313   :  { %v4991_v37 = vmul.f32 %v8475_v33, %v4990_v31  ;;  %v4120_v10 = vadd.f32 %v8375_v54, %v7858_v56  ;;  %v4493_v55 = vadd.f32 %v4492_v25, %v4491_v29  ;;  %v4496_v12 = vrot.slane %v4317_v53, 4  ;;  %v3652_v42 = vpop.f32.mrf.mxu1 }
 0x314   :  { %v5518_v44 = vpack.c.bf16 %v5463_v58, %v5462_v57  ;;  %v4999_v36 = vmul.f32 0.5, %v4998_v1  ;;  %vm5003_vm11 = vweird.f32 %v8499_v30  ;;  %v4489_v56 = vadd.f32 %v4488_v52, %v4487_v18 }
 0x315   :  { %v3244_v54 = vsel %vm439_vm0, %v6463_v35, 0  ;;  %v4190_v0 = vadd.f32 %v7800_v15, %v4120_v10  ;;  %v4995_v45 = vsel %vm8532_vm10, %v8475_v33, %v4991_v37  ;;  %v4494_v40 = vrot.slane %v4493_v55, 1  ;;  %v6484_v37 = vld [vmem:[#allocation2 + $0x208] sm:$0x30]  ;;  %v3678_v10 = vpop.f32.mrf.mxu3 }
 0x316   :  { %v8539_v26 = vpop.eup %6789  ;;  %5550 = vst [vmem:[#allocation7 + $0x40] sm:$0xff] %v5518_v44  ;;  %v5000_v60 = vsub.f32 1.5, %v4999_v36  ;;  %v4497_v43 = vadd.f32 %v4496_v12, %v4317_v53  ;;  %4012 = vmatpush.bf16.msra.mxu1 %v3244_v54  ;;  %vm5002_vm12 = vweird.f32 %v8462_v14  ;;  %v8547_v48 = vadd.f32 1e-06, %v4489_v56  ;;  %v6711_v53 = vld [vmem:[#allocation2 + $0x104] sm:$0xf] }
 0x317   :  { %v5007_v29 = vmul.f32 %v8539_v26, %v8495_v21  ;;  %v8549_v24 = vmax.f32 %v4190_v0, 0.0  ;;  %v4495_v62 = vadd.f32 %v4494_v40, %v4493_v55  ;;  %v4121_v33 = vadd.f32 %v8377_v9, %v7862_v11  ;;  %vm5004_vm13 = vmor %vm5002_vm12, %vm5003_vm11 }
 0x318   :  { %v5001_v27 = vmul.f32 %v8499_v30, %v5000_v60  ;;  %v4498_v57 = vrot.slane %v4497_v43, 2  ;;  %v5464_v7 = vmul.f32 %v4995_v45, %v8343_v38  ;;  %6791 = vrsqrt.f32 %v8547_v48 }
 0x319   :  { %v5008_v14 = vmul.f32 %v8539_v26, %v5007_v29  ;;  %v4318_v2 = vmul.f32 %v8549_v24, %v8549_v24  ;;  %6545 = vmatmul.msk.bf16.vlgmr.msra.gmra.mxu1 %vm435_vm1, %v8113_v23  ;;  %v8564_v11 = vadd.f32 1e-06, %v4495_v62  ;;  %v4191_v38 = vadd.f32 %v7800_v15, %v4121_v33 }
 0x31a   :  { %v5005_v31 = vsel %vm5004_vm13, %v8499_v30, %v5001_v27  ;;  %v4499_v9 = vadd.f32 %v4498_v57, %v4497_v43  ;;  %v6483_v25 = vor.u32 %v6743_v34, %v6482_v50  ;;  %vm5013_vm14 = vweird.f32 %v8539_v26  ;;  %v3665_v30 = vpop.f32.mrf.mxu2  ;;  %v8593_v62 = vpop.f32.mrf.mxu0 }
 0x31b   :  { %v5465_v18 = vmul.f32 %v5005_v31, %v8372_v49  ;;  %v5009_v58 = vmul.f32 0.5, %v5008_v14  ;;  %v4502_v1 = vrot.slane %v4318_v2, 4  ;;  %6793 = vrsqrt.f32 %v8564_v11  ;;  %v6474_v49 = vld [vmem:[#allocation2 + $0xf8] sm:$0xf] }
 0x31c   :  { %v4500_v52 = vrot.slane %v4499_v9, 1  ;;  %v8570_v35 = vmax.f32 %v4191_v38, 0.0  ;;  %v3259_v12 = vsel %vm439_vm0, %v6483_v25, 0  ;;  %v6487_v0 = vor.u32 %v6711_v53, %v6484_v37 }
 0x31d   :  { %v5519_v44 = vpack.c.bf16 %v5465_v18, %v5464_v7  ;;  %v5010_v36 = vsub.f32 1.5, %v5009_v58  ;;  %v4503_v55 = vadd.f32 %v4502_v1, %v4318_v2  ;;  %4077 = vmatpush.bf16.msrb.mxu2 %v3259_v12  ;;  %v4122_v6 = vadd.f32 %v8421_v19, %v7866_v20  ;;  %v6476_v7 = vld [vmem:[#allocation2 + $0x200] sm:$0x30] }
 0x31e   :  { %v4501_v56 = vadd.f32 %v4500_v52, %v4499_v9  ;;  %v4319_v54 = vmul.f32 %v8570_v35, %v8570_v35  ;;  %v8577_v42 = vpop.eup %6791  ;;  %vm5012_vm15 = vweird.f32 %v8495_v21  ;;  %v4123_v40 = vadd.f32 %v8428_v5, %v7872_v4  ;;  %v8595_v21 = vpop.f32.mrf.mxu1  ;;  %v6882_v52 = vld [vmem:[#allocation5 + $0x8] sm:$0xf] }
 0x31f   :  { %5551 = vst [vmem:[#allocation7 + $0x48] sm:$0xff] %v5519_v44  ;;  %v5011_v45 = vmul.f32 %v8539_v26, %v5010_v36  ;;  %v4504_v60 = vrot.slane %v4503_v55, 2  ;;  %vm8585_vm2 = vmor %vm5012_vm15, %vm5013_vm14  ;;  %v5017_v20 = vmul.f32 %v8577_v42, %v8547_v48  ;;  %v6475_v27 = vor.u32 %v6742_v39, %v6474_v49 }
 0x320   :  { %v8591_v19 = vadd.f32 1e-06, %v4501_v56  ;;  %v4508_v29 = vrot.slane %v4319_v54, 4  ;;  %v3262_v57 = vsel %vm439_vm0, %v6487_v0, 0  ;;  %v4192_v33 = vadd.f32 %v7800_v15, %v4122_v6  ;;  %6550 = vmatmul.msk.bf16.vlgmr.msrb.gmra.mxu2 %vm435_vm1, %v8113_v23 }
 0x321   :  { %v5015_v4 = vsel %vm8585_vm2, %v8539_v26, %v5011_v45  ;;  %v4505_v5 = vadd.f32 %v4504_v60, %v4503_v55  ;;  %v8604_v50 = vpop.eup %6793  ;;  %v5018_v34 = vmul.f32 %v8577_v42, %v5017_v20  ;;  %vm5022_vm3 = vweird.f32 %v8547_v48  ;;  %4090 = vmatpush.bf16.msrb.mxu3 %v3262_v57  ;;  %v6710_v26 = vld [vmem:[#allocation2 + $0xfc] sm:$0xf]  ;;  %v8651_v57 = vpop.f32.mrf.mxu3 }
 0x322   :  { %vm5023_vm4 = vweird.f32 %v8577_v42  ;;  %6795 = vrsqrt.f32 %v8591_v19  ;;  %v5466_v14 = vmul.f32 %v5015_v4, %v8404_v46  ;;  %v5027_v2 = vmul.f32 %v8604_v50, %v8564_v11 }
 0x323   :  { %v4506_v31 = vrot.slane %v4505_v5, 1  ;;  %v4509_v23 = vadd.f32 %v4508_v29, %v4319_v54  ;;  %v5019_v9 = vmul.f32 0.5, %v5018_v34  ;;  %v8613_v38 = vmax.f32 %v4192_v33, 0.0 }
 0x324   :  { %v4193_v18 = vadd.f32 %v7800_v15, %v4123_v40  ;;  %v3253_v58 = vsel %vm439_vm0, %v6475_v27, 0  ;;  %v5028_v1 = vmul.f32 %v8604_v50, %v5027_v2  ;;  %v6479_v37 = vor.u32 %v6710_v26, %v6476_v7  ;;  %6551 = vmatmul.msk.bf16.vlgmr.msrb.gmra.mxu3 %vm435_vm1, %v6882_v52 }
 0x325   :  { %v4507_v25 = vadd.f32 %v4506_v31, %v4505_v5  ;;  %v4510_v53 = vrot.slane %v4509_v23, 2  ;;  %4051 = vmatpush.bf16.msrb.mxu0 %v3253_v58  ;;  %v5020_v46 = vsub.f32 1.5, %v5019_v9  ;;  %v4320_v30 = vmul.f32 %v8613_v38, %v8613_v38  ;;  %v8649_v5 = vpop.f32.mrf.mxu2 }
 0x326   :  { %v8621_v10 = vmax.f32 %v4193_v18, 0.0  ;;  %v4124_v44 = vadd.f32 %v8487_v13, %v7876_v51  ;;  %v5029_v36 = vmul.f32 0.5, %v5028_v1  ;;  %v3256_v49 = vsel %vm439_vm0, %v6479_v37, 0  ;;  %v3691_v51 = vpop.f32.mrf.mxu0  ;;  %v3704_v13 = vpop.f32.mrf.mxu1  ;;  %vm5024_vm0 = vmor %vm5022_vm3, %vm5023_vm4 }
 0x327   :  { %v8625_v55 = vadd.f32 1e-06, %v4507_v25  ;;  %v4511_v12 = vadd.f32 %v4510_v53, %v4509_v23  ;;  %v5021_v56 = vmul.f32 %v8577_v42, %v5020_v46  ;;  %v4514_v54 = vrot.slane %v4320_v30, 4  ;;  %4064 = vmatpush.bf16.msrb.mxu1 %v3256_v49 }
 0x328   :  { %v8628_v39 = vpop.eup %6795  ;;  %v4321_v0 = vmul.f32 %v8621_v10, %v8621_v10  ;;  %v4194_v6 = vadd.f32 %v7800_v15, %v4124_v44  ;;  %6548 = vmatmul.msk.bf16.vlgmr.msrb.gmra.mxu0 %vm435_vm1, %v6882_v52  ;;  %v5030_v45 = vsub.f32 1.5, %v5029_v36  ;;  %vm5033_vm5 = vweird.f32 %v8604_v50 }
 0x329   :  { %v5037_v60 = vmul.f32 %v8628_v39, %v8591_v19  ;;  %6797 = vrsqrt.f32 %v8625_v55  ;;  %v5025_v40 = vsel %vm5024_vm0, %v8577_v42, %v5021_v56  ;;  %vm5032_vm6 = vweird.f32 %v8564_v11  ;;  %v3730_v56 = vpop.f32.mrf.mxu3 }
 0x32a   :  { %v4512_v43 = vrot.slane %v4511_v12, 1  ;;  %v4515_v20 = vadd.f32 %v4514_v54, %v4320_v30  ;;  %v5467_v29 = vmul.f32 %v5025_v40, %v8455_v32  ;;  %v5031_v27 = vmul.f32 %v8604_v50, %v5030_v45  ;;  %6549 = vmatmul.msk.bf16.vlgmr.msrb.gmra.mxu1 %vm435_vm1, %v6882_v52  ;;  %vm8653_vm7 = vmor %vm5032_vm6, %vm5033_vm5 }
 0x32b   :  { %v5038_v48 = vmul.f32 %v8628_v39, %v5037_v60  ;;  %v4520_v4 = vrot.slane %v4321_v0, 4  ;;  %v8657_v34 = vmax.f32 %v4194_v6, 0.0  ;;  %v4125_v32 = vadd.f32 %v8489_v8, %v7880_v47 }
 0x32c   :  { %v4513_v11 = vadd.f32 %v4512_v43, %v4511_v12  ;;  %v4516_v42 = vrot.slane %v4515_v20, 2  ;;  %v5520_v26 = vpack.c.bf16 %v5467_v29, %v5466_v14  ;;  %v5035_v7 = vsel %vm8653_vm7, %v8604_v50, %v5031_v27  ;;  %v9726_v29 = vld [vmem:[#allocation88_spill] sm:$0xff] }
 0x32d   :  { %v5039_v2 = vmul.f32 0.5, %v5038_v48  ;;  %v4521_v31 = vadd.f32 %v4520_v4, %v4321_v0  ;;  %vm5043_vm1 = vweird.f32 %v8628_v39  ;;  %v4322_v18 = vmul.f32 %v8657_v34, %v8657_v34  ;;  %v3717_v49 = vpop.f32.mrf.mxu2 }
 0x32e   :  { %v8665_v23 = vadd.f32 1e-06, %v4513_v11  ;;  %v4517_v9 = vadd.f32 %v4516_v42, %v4515_v20  ;;  %5552 = vst [vmem:[#allocation7 + $0x50] sm:$0xff] %v5520_v26  ;;  %v4195_v8 = vadd.f32 %v7800_v15, %v4125_v32  ;;  %v4126_v50 = vadd.f32 %v8524_v17, %v7886_v16  ;;  %v8709_v32 = vpop.f32.mrf.mxu0  ;;  %v8711_v26 = vpop.f32.mrf.mxu1  ;;  %v9732_v49 = vld [vmem:[#allocation53_spill] sm:$0xff] }
 0x32f   :  { %v8669_v58 = vpop.eup %6797  ;;  %v5040_v1 = vsub.f32 1.5, %v5039_v2  ;;  %v4522_v47 = vrot.slane %v4521_v31, 2  ;;  %v5468_v14 = vmul.f32 %v5035_v7, %v8466_v59  ;;  %vm5042_vm8 = vweird.f32 %v8591_v19 }
 0x330   :  { %v5047_v25 = vmul.f32 %v8669_v58, %v8625_v55  ;;  %6799 = vrsqrt.f32 %v8665_v23  ;;  %v4518_v37 = vrot.slane %v4517_v9, 1  ;;  %v4526_v46 = vrot.slane %v4322_v18, 4  ;;  %vm5044_vm9 = vmor %vm5042_vm8, %vm5043_vm1 }
 0x331   :  { %v5041_v53 = vmul.f32 %v8628_v39, %v5040_v1  ;;  %v4523_v52 = vadd.f32 %v4522_v47, %v4521_v31  ;;  %v8683_v16 = vmax.f32 %v4195_v8, 0.0  ;;  %v4196_v59 = vadd.f32 %v7800_v15, %v4126_v50  ;;  %v9728_v1 = vld [vmem:[#allocation47_spill] sm:$0xff]  ;;  %v9729_v47 = vld [vmem:[#allocation89_spill] sm:$0xff] }
 0x332   :  { %v5048_v30 = vmul.f32 %v8669_v58, %v5047_v25  ;;  %v4127_v17 = vadd.f32 %v8526_v3, %v7890_v41  ;;  %v4519_v44 = vadd.f32 %v4518_v37, %v4517_v9  ;;  %v4527_v12 = vadd.f32 %v4526_v46, %v4322_v18  ;;  %v9727_v9 = vld [vmem:[#allocation11_spill] sm:$0xff] }
 0x333   :  { %v5045_v19 = vsel %vm5044_vm9, %v8628_v39, %v5041_v53  ;;  %v4524_v36 = vrot.slane %v4523_v52, 1  ;;  %v4323_v6 = vmul.f32 %v8683_v16, %v8683_v16  ;;  %v8692_v51 = vmax.f32 %v4196_v59, 0.0 }
 0x334   :  { %v5469_v54 = vmul.f32 %v5045_v19, %v8497_v28  ;;  %v5049_v0 = vmul.f32 0.5, %v5048_v30  ;;  %v8694_v13 = vadd.f32 1e-06, %v4519_v44  ;;  %v4528_v60 = vrot.slane %v4527_v12, 2  ;;  %v9725_v28 = vld [vmem:[#allocation46_spill] sm:$0xff] }
 0x335   :  { %v4525_v45 = vadd.f32 %v4524_v36, %v4523_v52  ;;  %v4197_v41 = vadd.f32 %v7800_v15, %v4127_v17  ;;  %v4532_v43 = vrot.slane %v4323_v6, 4  ;;  %v4324_v20 = vmul.f32 %v8692_v51, %v8692_v51 }
 0x336   :  { %v6800_v3 = vpop.eup %6799  ;;  %v5521_v39 = vpack.c.bf16 %v5469_v54, %v5468_v14  ;;  %v5050_v40 = vsub.f32 1.5, %v5049_v0  ;;  %v8701_v27 = vadd.f32 %v9726_v29, %v9725_v28  ;;  %vm5053_vm10 = vweird.f32 %v8669_v58  ;;  %v8742_v54 = vpop.f32.mrf.mxu2 }
 0x337   :  { %v5057_v48 = vmul.f32 %v6800_v3, %v8665_v23  ;;  %6801 = vrsqrt.f32 %v8694_v13  ;;  %v8707_v33 = vadd.f32 1e-06, %v4525_v45  ;;  %v4529_v11 = vadd.f32 %v4528_v60, %v4527_v12 }
 0x338   :  { %5553 = vst [vmem:[#allocation7 + $0x58] sm:$0xff] %v5521_v39  ;;  %v5051_v4 = vmul.f32 %v8669_v58, %v5050_v40  ;;  %v4533_v42 = vadd.f32 %v4532_v43, %v4323_v6  ;;  %v4538_v2 = vrot.slane %v4324_v20, 4  ;;  %v8713_v31 = vmax.f32 %v4197_v41, 0.0  ;;  %v3743_v43 = vpop.f32.mrf.mxu0 }
 0x339   :  { %v5058_v7 = vmul.f32 %v6800_v3, %v5057_v48  ;;  %v4128_v18 = vadd.f32 %v8593_v62, %v9727_v9  ;;  %v8719_v8 = vadd.f32 %v9729_v47, %v9728_v1  ;;  %vm5052_vm11 = vweird.f32 %v8625_v55 }
 0x33a   :  { %6803 = vrsqrt.f32 %v8707_v33  ;;  %v4530_v50 = vrot.slane %v4529_v11, 1  ;;  %vm5062_vm12 = vweird.f32 %v8665_v23  ;;  %v4534_v25 = vrot.slane %v4533_v42, 2  ;;  %vm8726_vm13 = vmor %vm5052_vm11, %vm5053_vm10 }
 0x33b   :  { %v5059_v14 = vmul.f32 0.5, %v5058_v7  ;;  %v4539_v53 = vadd.f32 %v4538_v2, %v4324_v20  ;;  %vm5063_vm14 = vweird.f32 %v6800_v3  ;;  %v4325_v52 = vmul.f32 %v8713_v31, %v8713_v31  ;;  %v3756_v20 = vpop.f32.mrf.mxu1 }
 0x33c   :  { %v4531_v62 = vadd.f32 %v4530_v50, %v4529_v11  ;;  %v4198_v55 = vadd.f32 %v7800_v15, %v4128_v18  ;;  %v5055_v30 = vsel %vm8726_vm13, %v8669_v58, %v5051_v4  ;;  %v4535_v17 = vadd.f32 %v4534_v25, %v4533_v42  ;;  %v8746_v58 = vpop.f32.mrf.mxu3  ;;  %vm5064_vm2 = vmor %vm5062_vm12, %vm5063_vm14 }
 0x33d   :  { %v6802_v46 = vpop.eup %6801  ;;  %v5060_v59 = vsub.f32 1.5, %v5059_v14  ;;  %v4540_v19 = vrot.slane %v4539_v53, 2  ;;  %vm5072_vm15 = vweird.f32 %v8694_v13  ;;  %v4544_v12 = vrot.slane %v4325_v52, 4 }
 0x33e   :  { %v5067_v44 = vmul.f32 %v6802_v46, %v8694_v13  ;;  %v8738_v36 = vadd.f32 1e-06, %v4531_v62  ;;  %v4129_v56 = vadd.f32 %v8595_v21, %v9732_v49  ;;  %v4536_v6 = vrot.slane %v4535_v17, 1 }
 0x33f   :  { %v5061_v0 = vmul.f32 %v6800_v3, %v5060_v59  ;;  %v4541_v45 = vadd.f32 %v4540_v19, %v4539_v53  ;;  %v8744_v60 = vmax.f32 %v4198_v55, 0.0  ;;  %v5470_v39 = vmul.f32 %v5055_v30, %v8549_v24  ;;  %v3769_v30 = vpop.f32.mrf.mxu2 }
 0x340   :  { %v6804_v41 = vpop.eup %6803  ;;  %v5068_v40 = vmul.f32 %v6802_v46, %v5067_v44  ;;  %6805 = vrsqrt.f32 %v8738_v36  ;;  %v4545_v21 = vadd.f32 %v4544_v12, %v4325_v52  ;;  %vm5073_vm3 = vweird.f32 %v6802_v46  ;;  %v8788_v20 = vpop.f32.mrf.mxu0 }
 0x341   :  { %v5065_v28 = vsel %vm5064_vm2, %v6800_v3, %v5061_v0  ;;  %v5077_v29 = vmul.f32 %v6804_v41, %v8707_v33  ;;  %v4537_v48 = vadd.f32 %v4536_v6, %v4535_v17  ;;  %v4542_v42 = vrot.slane %v4541_v45, 1  ;;  %vm5074_vm4 = vmor %vm5072_vm15, %vm5073_vm3 }
 0x342   :  { %v5471_v4 = vmul.f32 %v5065_v28, %v8570_v35  ;;  %v5069_v11 = vmul.f32 0.5, %v5068_v40  ;;  %v4546_v24 = vrot.slane %v4545_v21, 2  ;;  %v4326_v23 = vmul.f32 %v8744_v60, %v8744_v60  ;;  %v9733_v35 = vld [vmem:[#allocation12_spill] sm:$0xff] }
 0x343   :  { %v5078_v7 = vmul.f32 %v6804_v41, %v5077_v29  ;;  %v8755_v2 = vadd.f32 1e-06, %v4537_v48  ;;  %v4199_v9 = vadd.f32 %v7800_v15, %v4129_v56  ;;  %v4543_v3 = vadd.f32 %v4542_v42, %v4541_v45  ;;  %v8790_v28 = vpop.f32.mrf.mxu1 }
 0x344   :  { %v5522_v18 = vpack.c.bf16 %v5471_v4, %v5470_v39  ;;  %v5070_v1 = vsub.f32 1.5, %v5069_v11  ;;  %v4547_v47 = vadd.f32 %v4546_v24, %v4545_v21  ;;  %v4550_v14 = vrot.slane %v4326_v23, 4  ;;  %v3782_v19 = vpop.f32.mrf.mxu3  ;;  %v9735_v11 = vld [vmem:[#allocation13_spill] sm:$0xff] }
 0x345   :  { %v5079_v50 = vmul.f32 0.5, %v5078_v7  ;;  %6807 = vrsqrt.f32 %v8755_v2  ;;  %v4130_v25 = vadd.f32 %v8649_v5, %v9733_v35  ;;  %v8765_v62 = vadd.f32 1e-06, %v4543_v3 }
 0x346   :  { %v8763_v53 = vpop.eup %6805  ;;  %5554 = vst [vmem:[#allocation7 + $0x60] sm:$0xff] %v5522_v18  ;;  %v5071_v37 = vmul.f32 %v6802_v46, %v5070_v1  ;;  %v4548_v52 = vrot.slane %v4547_v47, 1  ;;  %v8767_v55 = vmax.f32 %v4199_v9, 0.0  ;;  %vm5083_vm0 = vweird.f32 %v6804_v41 }
 0x347   :  { %v5080_v59 = vsub.f32 1.5, %v5079_v50  ;;  %v5087_v17 = vmul.f32 %v8763_v53, %v8738_v36  ;;  %v4551_v5 = vadd.f32 %v4550_v14, %v4326_v23  ;;  %vm5082_vm5 = vweird.f32 %v8707_v33 }
 0x348   :  { %v5075_v44 = vsel %vm5074_vm4, %v6802_v46, %v5071_v37  ;;  %6809 = vrsqrt.f32 %v8765_v62  ;;  %v4549_v12 = vadd.f32 %v4548_v52, %v4547_v47  ;;  %vm5084_vm6 = vmor %vm5082_vm5, %vm5083_vm0  ;;  %v4327_v45 = vmul.f32 %v8767_v55, %v8767_v55  ;;  %v9734_v46 = vld [vmem:[#allocation54_spill] sm:$0xff] }
 0x349   :  { %v5472_v49 = vmul.f32 %v5075_v44, %v8613_v38  ;;  %v5081_v56 = vmul.f32 %v6804_v41, %v5080_v59  ;;  %v5088_v0 = vmul.f32 %v8763_v53, %v5087_v17  ;;  %v4552_v13 = vrot.slane %v4551_v5, 2 }
 0x34a   :  { %v8778_v6 = vadd.f32 1e-06, %v4549_v12  ;;  %v4200_v39 = vadd.f32 %v7800_v15, %v4130_v25  ;;  %v4131_v33 = vadd.f32 %v8651_v57, %v9734_v46  ;;  %vm5092_vm7 = vweird.f32 %v8738_v36  ;;  %v8837_v46 = vpop.f32.mrf.mxu2 }
 0x34b   :  { %v8785_v40 = vpop.eup %6807  ;;  %v5085_v21 = vsel %vm5084_vm6, %v6804_v41, %v5081_v56  ;;  %v5089_v43 = vmul.f32 0.5, %v5088_v0  ;;  %v4553_v38 = vadd.f32 %v4552_v13, %v4551_v5  ;;  %vm5093_vm1 = vweird.f32 %v8763_v53  ;;  %v3808_v12 = vpop.f32.mrf.mxu1 }
 0x34c   :  { %v5473_v29 = vmul.f32 %v5085_v21, %v8621_v10  ;;  %v5097_v48 = vmul.f32 %v8785_v40, %v8755_v2  ;;  %vm5102_vm8 = vweird.f32 %v8755_v2  ;;  %6811 = vrsqrt.f32 %v8778_v6  ;;  %vm5094_vm11 = vmor %vm5092_vm7, %vm5093_vm1 }
 0x34d   :  { %v5090_v57 = vsub.f32 1.5, %v5089_v43  ;;  %v4554_v41 = vrot.slane %v4553_v38, 1  ;;  %v4556_v4 = vrot.slane %v4327_v45, 4  ;;  %v4132_v42 = vadd.f32 %v8709_v32, %v9735_v11 }
 0x34e   :  { %v8800_v24 = vpop.eup %6809  ;;  %v5523_v7 = vpack.c.bf16 %v5473_v29, %v5472_v49  ;;  %v5098_v10 = vmul.f32 %v8785_v40, %v5097_v48  ;;  %v8803_v23 = vmax.f32 %v4200_v39, 0.0  ;;  %v4201_v9 = vadd.f32 %v7800_v15, %v4131_v33  ;;  %v8842_v48 = vpop.f32.mrf.mxu3 }
 0x34f   :  { %v5091_v18 = vmul.f32 %v8763_v53, %v5090_v57  ;;  %vm5103_vm9 = vweird.f32 %v8785_v40  ;;  %v5107_v1 = vmul.f32 %v8800_v24, %v8765_v62  ;;  %vm5112_vm10 = vweird.f32 %v8765_v62 }
 0x350   :  { %v4555_v3 = vadd.f32 %v4554_v41, %v4553_v38  ;;  %5555 = vst [vmem:[#allocation7 + $0x68] sm:$0xff] %v5523_v7  ;;  %v5099_v32 = vmul.f32 0.5, %v5098_v10  ;;  %v4557_v47 = vadd.f32 %v4556_v4, %v4327_v45  ;;  %v4328_v50 = vmul.f32 %v8803_v23, %v8803_v23  ;;  %vm5104_vm14 = vmor %vm5102_vm8, %vm5103_vm9  ;;  %v9736_v38 = vld [vmem:[#allocation55_spill] sm:$0xff] }
 0x351   :  { %v8817_v14 = vmax.f32 %v4201_v9, 0.0  ;;  %v5095_v35 = vsel %vm5094_vm11, %v8763_v53, %v5091_v18  ;;  %v5108_v25 = vmul.f32 %v8800_v24, %v5107_v1  ;;  %v4202_v52 = vadd.f32 %v7800_v15, %v4132_v42  ;;  %v3795_v53 = vpop.f32.mrf.mxu0  ;;  %v9739_v1 = vld [vmem:[#allocation48_spill] sm:$0xff] }
 0x352   :  { %v8821_v37 = vadd.f32 1e-06, %v4555_v3  ;;  %v6812_v30 = vpop.eup %6811  ;;  %v5100_v59 = vsub.f32 1.5, %v5099_v32  ;;  %vm5113_vm12 = vweird.f32 %v8800_v24  ;;  %v4558_v36 = vrot.slane %v4557_v47, 2  ;;  %v9740_v3 = vld [vmem:[#allocation90_spill] sm:$0xff]  ;;  %v3821_v53 = vpop.f32.mrf.mxu2 }
 0x353   :  { %v4562_v17 = vrot.slane %v4328_v50, 4  ;;  %v5474_v5 = vmul.f32 %v5095_v35, %v8657_v34  ;;  %v5109_v19 = vmul.f32 0.5, %v5108_v25  ;;  %v5117_v44 = vmul.f32 %v6812_v30, %v8778_v6  ;;  %vm8850_vm15 = vmor %vm5112_vm10, %vm5113_vm12 }
 0x354   :  { %6813 = vrsqrt.f32 %v8821_v37  ;;  %v5101_v49 = vmul.f32 %v8785_v40, %v5100_v59  ;;  %vm5123_vm13 = vweird.f32 %v6812_v30  ;;  %v4559_v56 = vadd.f32 %v4558_v36, %v4557_v47 }
 0x355   :  { %v4563_v0 = vadd.f32 %v4562_v17, %v4328_v50  ;;  %v5110_v13 = vsub.f32 1.5, %v5109_v19  ;;  %v5118_v45 = vmul.f32 %v6812_v30, %v5117_v44  ;;  %v4329_v34 = vmul.f32 %v8817_v14, %v8817_v14 }
 0x356   :  { %v8835_v39 = vmax.f32 %v4202_v52, 0.0  ;;  %v5105_v33 = vsel %vm5104_vm14, %v8785_v40, %v5101_v49  ;;  %v4560_v21 = vrot.slane %v4559_v56, 1  ;;  %v4133_v29 = vadd.f32 %v8711_v26, %v9736_v38 }
 0x357   :  { %v4564_v43 = vrot.slane %v4563_v0, 2  ;;  %v5475_v2 = vmul.f32 %v5105_v33, %v8683_v16  ;;  %v5111_v57 = vmul.f32 %v8800_v24, %v5110_v13  ;;  %v5119_v41 = vmul.f32 0.5, %v5118_v45  ;;  %v3834_v13 = vpop.f32.mrf.mxu3 }
 0x358   :  { %v4568_v4 = vrot.slane %v4329_v34, 4  ;;  %v4561_v40 = vadd.f32 %v4560_v21, %v4559_v56  ;;  %v4330_v26 = vmul.f32 %v8835_v39, %v8835_v39  ;;  %v4203_v7 = vadd.f32 %v7800_v15, %v4133_v29  ;;  %v9742_v21 = vld [vmem:[#allocation56_spill] sm:$0xff] }
 0x359   :  { %v4565_v42 = vadd.f32 %v4564_v43, %v4563_v0  ;;  %v5524_v10 = vpack.c.bf16 %v5475_v2, %v5474_v5  ;;  %v5115_v9 = vsel %vm8850_vm15, %v8800_v24, %v5111_v57  ;;  %v5120_v18 = vsub.f32 1.5, %v5119_v41 }
 0x35a   :  { %v8857_v16 = vpop.eup %6813  ;;  %v4569_v62 = vadd.f32 %v4568_v4, %v4329_v34  ;;  %v8864_v32 = vadd.f32 %v9740_v3, %v9739_v1  ;;  %vm5122_vm2 = vweird.f32 %v8778_v6  ;;  %v8869_v50 = vadd.f32 1e-06, %v4561_v40  ;;  %v9747_v3 = vld [vmem:[#allocation50_spill] sm:$0xff] }
 0x35b   :  { %v5127_v47 = vmul.f32 %v8857_v16, %v8821_v37  ;;  %5556 = vst [vmem:[#allocation7 + $0x70] sm:$0xff] %v5524_v10  ;;  %v5121_v35 = vmul.f32 %v6812_v30, %v5120_v18  ;;  %v4566_v25 = vrot.slane %v4565_v42, 1  ;;  %v4574_v59 = vrot.slane %v4330_v26, 4  ;;  %vm5124_vm3 = vmor %vm5122_vm2, %vm5123_vm13  ;;  %v9744_v10 = vld [vmem:[#allocation91_spill] sm:$0xff] }
 0x35c   :  { %v4570_v52 = vrot.slane %v4569_v62, 2  ;;  %v5476_v24 = vmul.f32 %v5115_v9, %v8692_v51  ;;  %6815 = vrsqrt.f32 %v8869_v50  ;;  %v8875_v17 = vmax.f32 %v4203_v7, 0.0  ;;  %v9741_v51 = vld [vmem:[#allocation14_spill] sm:$0xff]  ;;  %v9743_v7 = vld [vmem:[#allocation49_spill] sm:$0xff] }
 0x35d   :  { %v5128_v36 = vmul.f32 %v8857_v16, %v5127_v47  ;;  %v5125_v6 = vsel %vm5124_vm3, %v6812_v30, %v5121_v35  ;;  %v4567_v5 = vadd.f32 %v4566_v25, %v4565_v42  ;;  %v4575_v44 = vadd.f32 %v4574_v59, %v4330_v26  ;;  %v9748_v47 = vld [vmem:[#allocation92_spill] sm:$0xff] }
 0x35e   :  { %v4571_v19 = vadd.f32 %v4570_v52, %v4569_v62  ;;  %v5477_v12 = vmul.f32 %v5125_v6, %v8713_v31  ;;  %v4331_v56 = vmul.f32 %v8875_v17, %v8875_v17  ;;  %v4134_v0 = vadd.f32 %v8742_v54, %v9741_v51 }
 0x35f   :  { %v5129_v49 = vmul.f32 0.5, %v5128_v36  ;;  %v8882_v45 = vadd.f32 1e-06, %v4567_v5  ;;  %v4576_v33 = vrot.slane %v4575_v44, 2  ;;  %v4135_v30 = vadd.f32 %v8746_v58, %v9742_v21  ;;  %v8921_v5 = vpop.f32.mrf.mxu0 }
 0x360   :  { %v4572_v34 = vrot.slane %v4571_v19, 1  ;;  %v5525_v43 = vpack.c.bf16 %v5477_v12, %v5476_v24  ;;  %v4580_v29 = vrot.slane %v4331_v56, 4  ;;  %v4204_v31 = vadd.f32 %v7800_v15, %v4134_v0 }
 0x361   :  { %v5130_v38 = vsub.f32 1.5, %v5129_v49  ;;  %vm5133_vm4 = vweird.f32 %v8857_v16  ;;  %6817 = vrsqrt.f32 %v8882_v45  ;;  %v4577_v57 = vadd.f32 %v4576_v33, %v4575_v44 }
 0x362   :  { %v4573_v2 = vadd.f32 %v4572_v34, %v4571_v19  ;;  %v6816_v54 = vpop.eup %6815  ;;  %5557 = vst [vmem:[#allocation7 + $0x78] sm:$0xff] %v5525_v43  ;;  %v4581_v4 = vadd.f32 %v4580_v29, %v4331_v56  ;;  %v8890_v11 = vmax.f32 %v4204_v31, 0.0  ;;  %v4205_v58 = vadd.f32 %v7800_v15, %v4135_v30  ;;  %v8923_v19 = vpop.f32.mrf.mxu1  ;;  %v9750_v43 = vld [vmem:[#allocation57_spill] sm:$0xff] }
 0x363   :  { %v5131_v41 = vmul.f32 %v8857_v16, %v5130_v38  ;;  %vm5132_vm0 = vweird.f32 %v8821_v37  ;;  %v5137_v40 = vmul.f32 %v6816_v54, %v8869_v50  ;;  %v4578_v26 = vrot.slane %v4577_v57, 1 }
 0x364   :  { %v8895_v42 = vadd.f32 1e-06, %v4573_v2  ;;  %v8899_v9 = vadd.f32 %v9744_v10, %v9743_v7  ;;  %vm8903_vm5 = vmor %vm5132_vm0, %vm5133_vm4  ;;  %v4582_v62 = vrot.slane %v4581_v4, 2  ;;  %v4332_v1 = vmul.f32 %v8890_v11, %v8890_v11 }
 0x365   :  { %v8909_v37 = vmax.f32 %v4205_v58, 0.0  ;;  %v8913_v35 = vadd.f32 %v9748_v47, %v9747_v3  ;;  %v5135_v25 = vsel %vm8903_vm5, %v8857_v16, %v5131_v41  ;;  %v5138_v52 = vmul.f32 %v6816_v54, %v5137_v40  ;;  %v9749_v16 = vld [vmem:[#allocation15_spill] sm:$0xff]  ;;  %v8954_v58 = vpop.f32.mrf.mxu2  ;;  %v8956_v40 = vpop.f32.mrf.mxu3 }
 0x366   :  { %6819 = vrsqrt.f32 %v8895_v42  ;;  %v4579_v59 = vadd.f32 %v4578_v26, %v4577_v57  ;;  %v4583_v24 = vadd.f32 %v4582_v62, %v4581_v4  ;;  %v4586_v36 = vrot.slane %v4332_v1, 4 }
 0x367   :  { %v4333_v6 = vmul.f32 %v8909_v37, %v8909_v37  ;;  %v8925_v44 = vpop.eup %6817  ;;  %v5139_v53 = vmul.f32 0.5, %v5138_v52  ;;  %vm5142_vm6 = vweird.f32 %v8869_v50  ;;  %vm5143_vm7 = vweird.f32 %v6816_v54  ;;  %v3847_v3 = vpop.f32.mrf.mxu0 }
 0x368   :  { %v4136_v12 = vadd.f32 %v8788_v20, %v9749_v16  ;;  %v5478_v49 = vmul.f32 %v5135_v25, %v8744_v60  ;;  %v5147_v56 = vmul.f32 %v8925_v44, %v8882_v45  ;;  %vm5152_vm1 = vweird.f32 %v8882_v45  ;;  %vm5144_vm8 = vmor %vm5142_vm6, %vm5143_vm7 }
 0x369   :  { %v8934_v51 = vadd.f32 1e-06, %v4579_v59  ;;  %v4584_v0 = vrot.slane %v4583_v24, 1  ;;  %v5140_v13 = vsub.f32 1.5, %v5139_v53  ;;  %v4587_v34 = vadd.f32 %v4586_v36, %v4332_v1 }
 0x36a   :  { %v4592_v33 = vrot.slane %v4333_v6, 4  ;;  %v4206_v21 = vadd.f32 %v7800_v15, %v4136_v12  ;;  %v5148_v30 = vmul.f32 %v8925_v44, %v5147_v56  ;;  %v4137_v60 = vadd.f32 %v8790_v28, %v9750_v43  ;;  %v3860_v47 = vpop.f32.mrf.mxu1 }
 0x36b   :  { %6821 = vrsqrt.f32 %v8934_v51  ;;  %v4585_v20 = vadd.f32 %v4584_v0, %v4583_v24  ;;  %v5141_v29 = vmul.f32 %v6816_v54, %v5140_v13  ;;  %v4588_v31 = vrot.slane %v4587_v34, 2  ;;  %v9751_v24 = vld [vmem:[#allocation16_spill] sm:$0xff] }
 0x36c   :  { %v8941_v38 = vpop.eup %6819  ;;  %v4593_v2 = vadd.f32 %v4592_v33, %v4333_v6  ;;  %v8943_v57 = vmax.f32 %v4206_v21, 0.0  ;;  %v5149_v41 = vmul.f32 0.5, %v5148_v30  ;;  %vm5153_vm9 = vweird.f32 %v8925_v44 }
 0x36d   :  { %v5157_v4 = vmul.f32 %v8941_v38, %v8895_v42  ;;  %vm5162_vm10 = vweird.f32 %v8895_v42  ;;  %v8952_v28 = vadd.f32 1e-06, %v4585_v20  ;;  %v5145_v26 = vsel %vm5144_vm8, %v6816_v54, %v5141_v29  ;;  %vm8973_vm11 = vmor %vm5152_vm1, %vm5153_vm9 }
 0x36e   :  { %v4589_v7 = vadd.f32 %v4588_v31, %v4587_v34  ;;  %v4594_v10 = vrot.slane %v4593_v2, 2  ;;  %v4334_v50 = vmul.f32 %v8943_v57, %v8943_v57  ;;  %v5479_v18 = vmul.f32 %v5145_v26, %v8767_v55  ;;  %v3873_v31 = vpop.f32.mrf.mxu2 }
 0x36f   :  { %v5150_v62 = vsub.f32 1.5, %v5149_v41  ;;  %v5158_v1 = vmul.f32 %v8941_v38, %v5157_v4  ;;  %6823 = vrsqrt.f32 %v8952_v28  ;;  %v4138_v54 = vadd.f32 %v8837_v46, %v9751_v24 }
 0x370   :  { %v4590_v25 = vrot.slane %v4589_v7, 1  ;;  %v4595_v52 = vadd.f32 %v4594_v10, %v4593_v2  ;;  %v4598_v59 = vrot.slane %v4334_v50, 4  ;;  %v5526_v6 = vpack.c.bf16 %v5479_v18, %v5478_v49  ;;  %v3886_v2 = vpop.f32.mrf.mxu3 }
 0x371   :  { %v8965_v36 = vpop.eup %6821  ;;  %v5151_v53 = vmul.f32 %v8925_v44, %v5150_v62  ;;  %v5159_v16 = vmul.f32 0.5, %v5158_v1  ;;  %v4207_v55 = vadd.f32 %v7800_v15, %v4137_v60  ;;  %vm5163_vm12 = vweird.f32 %v8941_v38  ;;  %v9009_v1 = vpop.f32.mrf.mxu0 }
 0x372   :  { %v5167_v46 = vmul.f32 %v8965_v36, %v8934_v51  ;;  %v4591_v56 = vadd.f32 %v4590_v25, %v4589_v7  ;;  %v4596_v49 = vrot.slane %v4595_v52, 1  ;;  %5558 = vst [vmem:[#allocation7 + $0x80] sm:$0xff] %v5526_v6  ;;  %v4599_v34 = vadd.f32 %v4598_v59, %v4334_v50  ;;  %vm5164_vm14 = vmor %vm5162_vm10, %vm5163_vm12  ;;  %v9011_v3 = vpop.f32.mrf.mxu1 }
 0x373   :  { %v5155_v0 = vsel %vm8973_vm11, %v8925_v44, %v5151_v53  ;;  %v5160_v13 = vsub.f32 1.5, %v5159_v16  ;;  %v8983_v33 = vmax.f32 %v4207_v55, 0.0  ;;  %vm5172_vm13 = vweird.f32 %v8934_v51  ;;  %v9756_v53 = vld [vmem:[#allocation58_spill] sm:$0xff]  ;;  %v9757_v55 = vld [vmem:[#allocation17_spill] sm:$0xff] }
 0x374   :  { %v5168_v45 = vmul.f32 %v8965_v36, %v5167_v46  ;;  %v8987_v21 = vadd.f32 1e-06, %v4591_v56  ;;  %v4597_v30 = vadd.f32 %v4596_v49, %v4595_v52  ;;  %v4600_v60 = vrot.slane %v4599_v34, 2 }
 0x375   :  { %v8989_v20 = vpop.eup %6823  ;;  %v5161_v43 = vmul.f32 %v8941_v38, %v5160_v13  ;;  %v4335_v29 = vmul.f32 %v8983_v33, %v8983_v33  ;;  %v4208_v44 = vadd.f32 %v7800_v15, %v4138_v54  ;;  %v5480_v41 = vmul.f32 %v5155_v0, %v8803_v23 }
 0x376   :  { %v5169_v4 = vmul.f32 0.5, %v5168_v45  ;;  %v5177_v26 = vmul.f32 %v8989_v20, %v8952_v28  ;;  %6825 = vrsqrt.f32 %v8987_v21  ;;  %vm5173_vm15 = vweird.f32 %v8965_v36 }
 0x377   :  { %v5165_v7 = vsel %vm5164_vm14, %v8941_v38, %v5161_v43  ;;  %v9005_v10 = vadd.f32 1e-06, %v4597_v30  ;;  %v4601_v50 = vadd.f32 %v4600_v60, %v4599_v34  ;;  %v4604_v42 = vrot.slane %v4335_v29, 4  ;;  %vm9022_vm3 = vmor %vm5172_vm13, %vm5173_vm15 }
 0x378   :  { %v5481_v23 = vmul.f32 %v5165_v7, %v8817_v14  ;;  %v5170_v18 = vsub.f32 1.5, %v5169_v4  ;;  %v5178_v62 = vmul.f32 %v8989_v20, %v5177_v26  ;;  %vm5182_vm2 = vweird.f32 %v8952_v28  ;;  %v9046_v60 = vpop.f32.mrf.mxu3 }
 0x379   :  { %6827 = vrsqrt.f32 %v9005_v10  ;;  %v4602_v38 = vrot.slane %v4601_v50, 1  ;;  %v9015_v47 = vmax.f32 %v4208_v44, 0.0  ;;  %v4605_v14 = vadd.f32 %v4604_v42, %v4335_v29  ;;  %v3899_v26 = vpop.f32.mrf.mxu0 }
 0x37a   :  { %v5527_v25 = vpack.c.bf16 %v5481_v23, %v5480_v41  ;;  %v5171_v52 = vmul.f32 %v8965_v36, %v5170_v18  ;;  %v5179_v59 = vmul.f32 0.5, %v5178_v62  ;;  %v4139_v16 = vadd.f32 %v8842_v48, %v9756_v53  ;;  %v9758_v48 = vld [vmem:[#allocation59_spill] sm:$0xff]  ;;  %v3912_v7 = vpop.f32.mrf.mxu1 }
 0x37b   :  { %v4603_v54 = vadd.f32 %v4602_v38, %v4601_v50  ;;  %v4336_v6 = vmul.f32 %v9015_v47, %v9015_v47  ;;  %v4140_v12 = vadd.f32 %v8921_v5, %v9757_v55  ;;  %vm5183_vm4 = vweird.f32 %v8989_v20 }
 0x37c   :  { %v6826_v46 = vpop.eup %6825  ;;  %5559 = vst [vmem:[#allocation7 + $0x88] sm:$0xff] %v5527_v25  ;;  %v5175_v51 = vsel %vm9022_vm3, %v8965_v36, %v5171_v52  ;;  %v5180_v56 = vsub.f32 1.5, %v5179_v59  ;;  %v4606_v49 = vrot.slane %v4605_v14, 2  ;;  %vm5192_vm0 = vweird.f32 %v8987_v21  ;;  %v9044_v36 = vpop.f32.mrf.mxu2  ;;  %vm5184_vm5 = vmor %vm5182_vm2, %vm5183_vm4 }
 0x37d   :  { %v5187_v0 = vmul.f32 %v6826_v46, %v8987_v21  ;;  %v9038_v13 = vadd.f32 1e-06, %v4603_v54  ;;  %v4141_v34 = vadd.f32 %v8923_v19, %v9758_v48  ;;  %v4610_v30 = vrot.slane %v4336_v6, 4 }
 0x37e   :  { %v5181_v5 = vmul.f32 %v8989_v20, %v5180_v56  ;;  %v4607_v45 = vadd.f32 %v4606_v49, %v4605_v14  ;;  %v4209_v43 = vadd.f32 %v7800_v15, %v4139_v16  ;;  %v5482_v44 = vmul.f32 %v5175_v51, %v8835_v39 }
 0x37f   :  { %v6828_v29 = vpop.eup %6827  ;;  %v5188_v31 = vmul.f32 %v6826_v46, %v5187_v0  ;;  %6829 = vrsqrt.f32 %v9038_v13  ;;  %v4210_v19 = vadd.f32 %v7800_v15, %v4140_v12  ;;  %vm5193_vm6 = vweird.f32 %v6826_v46  ;;  %v9759_v12 = vld [vmem:[#allocation18_spill] sm:$0xff] }
 0x380   :  { %v5185_v2 = vsel %vm5184_vm5, %v8989_v20, %v5181_v5  ;;  %v5197_v41 = vmul.f32 %v6828_v29, %v9005_v10  ;;  %v4608_v4 = vrot.slane %v4607_v45, 1  ;;  %v4611_v39 = vadd.f32 %v4610_v30, %v4336_v6  ;;  %vm5194_vm7 = vmor %vm5192_vm0, %vm5193_vm6  ;;  %v3938_v48 = vpop.f32.mrf.mxu3 }
 0x381   :  { %v5483_v50 = vmul.f32 %v5185_v2, %v8875_v17  ;;  %v5189_v23 = vmul.f32 0.5, %v5188_v31  ;;  %v9056_v18 = vmax.f32 %v4209_v43, 0.0  ;;  %v9058_v42 = vmax.f32 %v4210_v19, 0.0 }
 0x382   :  { %v5198_v28 = vmul.f32 %v6828_v29, %v5197_v41  ;;  %v4609_v62 = vadd.f32 %v4608_v4, %v4607_v45  ;;  %v4211_v38 = vadd.f32 %v7800_v15, %v4141_v34  ;;  %v4612_v52 = vrot.slane %v4611_v39, 2 }
 0x383   :  { %v5528_v25 = vpack.c.bf16 %v5483_v50, %v5482_v44  ;;  %v5190_v20 = vsub.f32 1.5, %v5189_v23  ;;  %v4337_v59 = vmul.f32 %v9056_v18, %v9056_v18  ;;  %v4338_v17 = vmul.f32 %v9058_v42, %v9058_v42 }
 0x384   :  { %v5199_v14 = vmul.f32 0.5, %v5198_v28  ;;  %v9063_v24 = vadd.f32 1e-06, %v4609_v62  ;;  %v9067_v54 = vmax.f32 %v4211_v38, 0.0  ;;  %v4613_v16 = vadd.f32 %v4612_v52, %v4611_v39  ;;  %v3925_v0 = vpop.f32.mrf.mxu2 }
 0x385   :  { %v9069_v6 = vpop.eup %6829  ;;  %5560 = vst [vmem:[#allocation7 + $0x90] sm:$0xff] %v5528_v25  ;;  %v5191_v53 = vmul.f32 %v6826_v46, %v5190_v20  ;;  %v4616_v55 = vrot.slane %v4337_v59, 4  ;;  %v4142_v51 = vadd.f32 %v8954_v58, %v9759_v12  ;;  %vm5203_vm1 = vweird.f32 %v6828_v29 }
 0x386   :  { %v5200_v56 = vsub.f32 1.5, %v5199_v14  ;;  %v5207_v49 = vmul.f32 %v9069_v6, %v9038_v13  ;;  %6831 = vrsqrt.f32 %v9063_v24  ;;  %vm5202_vm8 = vweird.f32 %v9005_v10  ;;  %v9760_v10 = vld [vmem:[#allocation60_spill] sm:$0xff] }
 0x387   :  { %v5195_v34 = vsel %vm5194_vm7, %v6826_v46, %v5191_v53  ;;  %v4614_v5 = vrot.slane %v4613_v16, 1  ;;  %v4617_v45 = vadd.f32 %v4616_v55, %v4337_v59  ;;  %v4622_v43 = vrot.slane %v4338_v17, 4  ;;  %vm5204_vm9 = vmor %vm5202_vm8, %vm5203_vm1 }
 0x388   :  { %v5484_v58 = vmul.f32 %v5195_v34, %v8890_v11  ;;  %v5201_v30 = vmul.f32 %v6828_v29, %v5200_v56  ;;  %v5208_v21 = vmul.f32 %v9069_v6, %v5207_v49  ;;  %v4339_v19 = vmul.f32 %v9067_v54, %v9067_v54  ;;  %v9111_v34 = vpop.f32.mrf.mxu0 }
 0x389   :  { %v4615_v44 = vadd.f32 %v4614_v5, %v4613_v16  ;;  %v4618_v31 = vrot.slane %v4617_v45, 2  ;;  %v4212_v2 = vadd.f32 %v7800_v15, %v4142_v51  ;;  %v4623_v4 = vadd.f32 %v4622_v43, %v4338_v17  ;;  %v9763_v51 = vld [vmem:[#allocation19_spill] sm:$0xff]  ;;  %v9113_v5 = vpop.f32.mrf.mxu1 }
 0x38a   :  { %v5205_v41 = vsel %vm5204_vm9, %v6828_v29, %v5201_v30  ;;  %v5209_v46 = vmul.f32 0.5, %v5208_v21  ;;  %v4143_v26 = vadd.f32 %v8956_v40, %v9760_v10  ;;  %v4628_v23 = vrot.slane %v4339_v19, 4 }
 0x38b   :  { %v5485_v11 = vmul.f32 %v5205_v41, %v8909_v37  ;;  %v9088_v7 = vadd.f32 1e-06, %v4615_v44  ;;  %v4619_v50 = vadd.f32 %v4618_v31, %v4617_v45  ;;  %v4624_v62 = vrot.slane %v4623_v4, 2  ;;  %v9764_v31 = vld [vmem:[#allocation61_spill] sm:$0xff] }
 0x38c   :  { %v6832_v39 = vpop.eup %6831  ;;  %v5210_v28 = vsub.f32 1.5, %v5209_v46  ;;  %v9090_v38 = vmax.f32 %v4212_v2, 0.0  ;;  %v4213_v25 = vadd.f32 %v7800_v15, %v4143_v26  ;;  %vm5213_vm10 = vweird.f32 %v9069_v6 }
 0x38d   :  { %v5529_v20 = vpack.c.bf16 %v5485_v11, %v5484_v58  ;;  %v5217_v29 = vmul.f32 %v6832_v39, %v9063_v24  ;;  %6833 = vrsqrt.f32 %v9088_v7  ;;  %vm5212_vm11 = vweird.f32 %v9038_v13 }
 0x38e   :  { %v5211_v37 = vmul.f32 %v9069_v6, %v5210_v28  ;;  %v4620_v40 = vrot.slane %v4619_v50, 1  ;;  %v4625_v52 = vadd.f32 %v4624_v62, %v4623_v4  ;;  %v4629_v14 = vadd.f32 %v4628_v23, %v4339_v19  ;;  %vm9102_vm12 = vmor %vm5212_vm11, %vm5213_vm10  ;;  %v9766_v23 = vld [vmem:[#allocation93_spill] sm:$0xff] }
 0x38f   :  { %5561 = vst [vmem:[#allocation7 + $0x98] sm:$0xff] %v5529_v20  ;;  %v5218_v59 = vmul.f32 %v6832_v39, %v5217_v29  ;;  %v4340_v17 = vmul.f32 %v9090_v38, %v9090_v38  ;;  %v9100_v53 = vmax.f32 %v4213_v25, 0.0  ;;  %vm5223_vm13 = vweird.f32 %v6832_v39 }
 0x390   :  { %v4621_v55 = vadd.f32 %v4620_v40, %v4619_v50  ;;  %v4626_v12 = vrot.slane %v4625_v52, 1  ;;  %v4144_v13 = vadd.f32 %v9009_v1, %v9763_v51  ;;  %v5215_v56 = vsel %vm9102_vm12, %v9069_v6, %v5211_v37 }
 0x391   :  { %v5219_v49 = vmul.f32 0.5, %v5218_v59  ;;  %v4630_v0 = vrot.slane %v4629_v14, 2  ;;  %v4634_v48 = vrot.slane %v4340_v17, 4  ;;  %v4341_v30 = vmul.f32 %v9100_v53, %v9100_v53 }
 0x392   :  { %v9115_v45 = vadd.f32 1e-06, %v4621_v55  ;;  %v4627_v58 = vadd.f32 %v4626_v12, %v4625_v52  ;;  %v4214_v21 = vadd.f32 %v7800_v15, %v4144_v13  ;;  %v4145_v19 = vadd.f32 %v9011_v3, %v9764_v31  ;;  %v9150_v55 = vpop.f32.mrf.mxu2 }
 0x393   :  { %v9120_v1 = vpop.eup %6833  ;;  %v5220_v43 = vsub.f32 1.5, %v5219_v49  ;;  %v4631_v44 = vadd.f32 %v4630_v0, %v4629_v14  ;;  %v4635_v6 = vadd.f32 %v4634_v48, %v4340_v17  ;;  %v5486_v2 = vmul.f32 %v5215_v56, %v8943_v57  ;;  %v9767_v17 = vld [vmem:[#allocation20_spill] sm:$0xff]  ;;  %v3951_v49 = vpop.f32.mrf.mxu0 }
 0x394   :  { %vm5222_vm14 = vweird.f32 %v9063_v24  ;;  %v5227_v41 = vmul.f32 %v9120_v1, %v9088_v7  ;;  %6835 = vrsqrt.f32 %v9115_v45  ;;  %v9129_v4 = vadd.f32 1e-06, %v4627_v58  ;;  %v9765_v24 = vld [vmem:[#allocation51_spill] sm:$0xff]  ;;  %v3964_v0 = vpop.f32.mrf.mxu1 }
 0x395   :  { %v5221_v46 = vmul.f32 %v6832_v39, %v5220_v43  ;;  %v4632_v10 = vrot.slane %v4631_v44, 1  ;;  %v4636_v26 = vrot.slane %v4635_v6, 2  ;;  %vm5224_vm15 = vmor %vm5222_vm14, %vm5223_vm13  ;;  %v4640_v50 = vrot.slane %v4341_v30, 4 }
 0x396   :  { %v5228_v11 = vmul.f32 %v9120_v1, %v5227_v41  ;;  %v9133_v3 = vmax.f32 %v4214_v21, 0.0  ;;  %v4215_v57 = vadd.f32 %v7800_v15, %v4145_v19  ;;  %v9138_v28 = vadd.f32 %v9766_v23, %v9765_v24 }
 0x397   :  { %v5225_v62 = vsel %vm5224_vm15, %v6832_v39, %v5221_v46  ;;  %6837 = vrsqrt.f32 %v9129_v4  ;;  %v4633_v25 = vadd.f32 %v4632_v10, %v4631_v44  ;;  %v4637_v37 = vadd.f32 %v4636_v26, %v4635_v6  ;;  %v9152_v39 = vpop.f32.mrf.mxu3 }
 0x398   :  { %v5487_v20 = vmul.f32 %v5225_v62, %v8983_v33  ;;  %v5229_v29 = vmul.f32 0.5, %v5228_v11  ;;  %v4641_v40 = vadd.f32 %v4640_v50, %v4341_v30  ;;  %v4342_v59 = vmul.f32 %v9133_v3, %v9133_v3  ;;  %v9770_v11 = vld [vmem:[#allocation62_spill] sm:$0xff] }
 0x399   :  { %v9142_v52 = vadd.f32 1e-06, %v4633_v25  ;;  %v9146_v14 = vmax.f32 %v4215_v57, 0.0  ;;  %v4146_v16 = vadd.f32 %v9044_v36, %v9767_v17  ;;  %v4638_v13 = vrot.slane %v4637_v37, 1 }
 0x39a   :  { %v6836_v12 = vpop.eup %6835  ;;  %v5530_v51 = vpack.c.bf16 %v5487_v20, %v5486_v2  ;;  %v5230_v33 = vsub.f32 1.5, %v5229_v29  ;;  %v4642_v56 = vrot.slane %v4641_v40, 2  ;;  %vm5232_vm2 = vweird.f32 %v9088_v7 }
 0x39b   :  { %vm5233_vm3 = vweird.f32 %v9120_v1  ;;  %v5237_v48 = vmul.f32 %v6836_v12, %v9115_v45  ;;  %6839 = vrsqrt.f32 %v9142_v52  ;;  %v4639_v58 = vadd.f32 %v4638_v13, %v4637_v37  ;;  %v3977_v37 = vpop.f32.mrf.mxu2  ;;  %v9196_v13 = vpop.f32.mrf.mxu0 }
 0x39c   :  { %5562 = vst [vmem:[#allocation7 + $0xa0] sm:$0xff] %v5530_v51  ;;  %v5231_v36 = vmul.f32 %v9120_v1, %v5230_v33  ;;  %v4643_v30 = vadd.f32 %v4642_v56, %v4641_v40  ;;  %v4646_v21 = vrot.slane %v4342_v59, 4  ;;  %vm5242_vm4 = vweird.f32 %v9115_v45  ;;  %vm9174_vm6 = vmor %vm5232_vm2, %vm5233_vm3  ;;  %v9198_v56 = vpop.f32.mrf.mxu1 }
 0x39d   :  { %v9159_v43 = vpop.eup %6837  ;;  %v5238_v44 = vmul.f32 %v6836_v12, %v5237_v48  ;;  %v4343_v6 = vmul.f32 %v9146_v14, %v9146_v14  ;;  %v4216_v31 = vadd.f32 %v7800_v15, %v4146_v16  ;;  %vm5243_vm0 = vweird.f32 %v6836_v12 }
 0x39e   :  { %v5247_v19 = vmul.f32 %v9159_v43, %v9129_v4  ;;  %vm5252_vm5 = vweird.f32 %v9129_v4  ;;  %v9168_v2 = vadd.f32 1e-06, %v4639_v58  ;;  %v4644_v10 = vrot.slane %v4643_v30, 1  ;;  %vm5244_vm1 = vmor %vm5242_vm4, %vm5243_vm0 }
 0x39f   :  { %v5239_v46 = vmul.f32 0.5, %v5238_v44  ;;  %v4647_v26 = vadd.f32 %v4646_v21, %v4342_v59  ;;  %v4147_v50 = vadd.f32 %v9046_v60, %v9770_v11  ;;  %v5235_v57 = vsel %vm9174_vm6, %v9120_v1, %v5231_v36  ;;  %v3990_v40 = vpop.f32.mrf.mxu3 }
 0x3a0   :  { %v5248_v24 = vmul.f32 %v9159_v43, %v5247_v19  ;;  %6841 = vrsqrt.f32 %v9168_v2  ;;  %v4652_v23 = vrot.slane %v4343_v6, 4  ;;  %v4645_v25 = vadd.f32 %v4644_v10, %v4643_v30 }
 0x3a1   :  { %v9185_v7 = vpop.eup %6839  ;;  %v5240_v62 = vsub.f32 1.5, %v5239_v46  ;;  %v4648_v20 = vrot.slane %v4647_v26, 2  ;;  %v9187_v29 = vmax.f32 %v4216_v31, 0.0  ;;  %vm5253_vm7 = vweird.f32 %v9159_v43 }
 0x3a2   :  { %v5249_v59 = vmul.f32 0.5, %v5248_v24  ;;  %v5257_v60 = vmul.f32 %v9185_v7, %v9142_v52  ;;  %v4653_v1 = vadd.f32 %v4652_v23, %v4343_v6  ;;  %v9192_v16 = vadd.f32 1e-06, %v4645_v25  ;;  %vm9215_vm8 = vmor %vm5252_vm5, %vm5253_vm7 }
 0x3a3   :  { %v5241_v17 = vmul.f32 %v6836_v12, %v5240_v62  ;;  %v4649_v51 = vadd.f32 %v4648_v20, %v4647_v26  ;;  %v4344_v33 = vmul.f32 %v9187_v29, %v9187_v29  ;;  %v5488_v49 = vmul.f32 %v5235_v57, %v9015_v47  ;;  %v9229_v24 = vpop.f32.mrf.mxu2  ;;  %v9773_v20 = vld [vmem:[#allocation21_spill] sm:$0xff] }
 0x3a4   :  { %v5250_v0 = vsub.f32 1.5, %v5249_v59  ;;  %v5258_v48 = vmul.f32 %v9185_v7, %v5257_v60  ;;  %v4654_v36 = vrot.slane %v4653_v1, 2  ;;  %6843 = vrsqrt.f32 %v9192_v16 }
 0x3a5   :  { %v5245_v58 = vsel %vm5244_vm1, %v6836_v12, %v5241_v17  ;;  %v4650_v30 = vrot.slane %v4649_v51, 1  ;;  %v4217_v21 = vadd.f32 %v7800_v15, %v4147_v50  ;;  %vm5263_vm9 = vweird.f32 %v9185_v7  ;;  %v4016_v17 = vpop.f32.mrf.mxu1 }
 0x3a6   :  { %v9207_v44 = vpop.eup %6841  ;;  %v5489_v6 = vmul.f32 %v5245_v58, %v9056_v18  ;;  %v5251_v47 = vmul.f32 %v9159_v43, %v5250_v0  ;;  %v5259_v31 = vmul.f32 0.5, %v5258_v48  ;;  %v4655_v19 = vadd.f32 %v4654_v36, %v4653_v1  ;;  %v4003_v1 = vpop.f32.mrf.mxu0 }
 0x3a7   :  { %v5267_v12 = vmul.f32 %v9207_v44, %v9168_v2  ;;  %v4651_v41 = vadd.f32 %v4650_v30, %v4649_v51  ;;  %v4658_v46 = vrot.slane %v4344_v33, 4  ;;  %vm5262_vm10 = vweird.f32 %v9142_v52  ;;  %v9236_v37 = vpop.f32.mrf.mxu3 }
 0x3a8   :  { %v5531_v18 = vpack.c.bf16 %v5489_v6, %v5488_v49  ;;  %v5255_v10 = vsel %vm9215_vm8, %v9159_v43, %v5251_v47  ;;  %v5260_v26 = vsub.f32 1.5, %v5259_v31  ;;  %v4656_v11 = vrot.slane %v4655_v19, 1  ;;  %vm5264_vm11 = vmor %vm5262_vm10, %vm5263_vm9 }
 0x3a9   :  { %v5268_v4 = vmul.f32 %v9207_v44, %v5267_v12  ;;  %v9227_v50 = vadd.f32 1e-06, %v4651_v41  ;;  %v4659_v57 = vadd.f32 %v4658_v46, %v4344_v33  ;;  %v9232_v25 = vmax.f32 %v4217_v21, 0.0 }
 0x3aa   :  { %5563 = vst [vmem:[#allocation7 + $0xa8] sm:$0xff] %v5531_v18  ;;  %v5261_v23 = vmul.f32 %v9185_v7, %v5260_v26  ;;  %v4657_v62 = vadd.f32 %v4656_v11, %v4655_v19  ;;  %v4148_v43 = vadd.f32 %v9111_v34, %v9773_v20  ;;  %v6844_v40 = vpop.eup %6843  ;;  %v5490_v52 = vmul.f32 %v5255_v10, %v9058_v42 }
 0x3ab   :  { %v5269_v59 = vmul.f32 0.5, %v5268_v4  ;;  %6845 = vrsqrt.f32 %v9227_v50  ;;  %v4660_v60 = vrot.slane %v4659_v57, 2  ;;  %vm5272_vm12 = vweird.f32 %v9168_v2 }
 0x3ac   :  { %v5265_v51 = vsel %vm5264_vm11, %v9185_v7, %v5261_v23  ;;  %v5277_v34 = vmul.f32 %v6844_v40, %v9192_v16  ;;  %v9245_v33 = vadd.f32 1e-06, %v4657_v62  ;;  %v4345_v48 = vmul.f32 %v9232_v25, %v9232_v25 }
 0x3ad   :  { %v5491_v49 = vmul.f32 %v5265_v51, %v9067_v54  ;;  %v5270_v42 = vsub.f32 1.5, %v5269_v59  ;;  %v4661_v0 = vadd.f32 %v4660_v60, %v4659_v57  ;;  %vm5273_vm13 = vweird.f32 %v9207_v44  ;;  %v9774_v54 = vld [vmem:[#allocation63_spill] sm:$0xff] }
 0x3ae   :  { %v5278_v36 = vmul.f32 %v6844_v40, %v5277_v34  ;;  %6847 = vrsqrt.f32 %v9245_v33  ;;  %v4218_v7 = vadd.f32 %v7800_v15, %v4148_v43  ;;  %v4664_v6 = vrot.slane %v4345_v48, 4  ;;  %vm9264_vm14 = vmor %vm5272_vm12, %vm5273_vm13  ;;  %v9311_v41 = vpop.f32.mrf.mxu0 }
 0x3af   :  { %v5532_v58 = vpack.c.bf16 %v5491_v49, %v5490_v52  ;;  %v5271_v30 = vmul.f32 %v9207_v44, %v5270_v42  ;;  %v4662_v21 = vrot.slane %v4661_v0, 1  ;;  %v4149_v19 = vadd.f32 %v9113_v5, %v9774_v54  ;;  %v4029_v5 = vpop.f32.mrf.mxu2  ;;  %v4042_v26 = vpop.f32.mrf.mxu3 }
 0x3b0   :  { %v5279_v47 = vmul.f32 0.5, %v5278_v36  ;;  %v9254_v31 = vmax.f32 %v4218_v7, 0.0  ;;  %v4150_v45 = vadd.f32 %v9150_v55, %v8160_v63  ;;  %vm5282_vm15 = vweird.f32 %v9192_v16 }
 0x3b1   :  { %v9260_v12 = vpop.eup %6845  ;;  %5564 = vst [vmem:[#allocation7 + $0xb0] sm:$0xff] %v5532_v58  ;;  %v4663_v46 = vadd.f32 %v4662_v21, %v4661_v0  ;;  %v4665_v18 = vadd.f32 %v4664_v6, %v4345_v48  ;;  %v4151_v10 = vadd.f32 %v9152_v39, %v8195_v22  ;;  %v5275_v63 = vsel %vm9264_vm14, %v9207_v44, %v5271_v30 }
 0x3b2   :  { %v5280_v55 = vsub.f32 1.5, %v5279_v47  ;;  %vm5283_vm2 = vweird.f32 %v6844_v40  ;;  %v5287_v2 = vmul.f32 %v9260_v12, %v9227_v50  ;;  %vm5292_vm3 = vweird.f32 %v9227_v50 }
 0x3b3   :  { %v9277_v11 = vadd.f32 1e-06, %v4663_v46  ;;  %v4666_v4 = vrot.slane %v4665_v18, 2  ;;  %v4346_v57 = vmul.f32 %v9254_v31, %v9254_v31  ;;  %v4219_v22 = vadd.f32 %v7800_v15, %v4149_v19  ;;  %vm5284_vm4 = vmor %vm5282_vm15, %vm5283_vm2  ;;  %v9313_v46 = vpop.f32.mrf.mxu1 }
 0x3b4   :  { %v6848_v39 = vpop.eup %6847  ;;  %v5281_v23 = vmul.f32 %v6844_v40, %v5280_v55  ;;  %v5288_v44 = vmul.f32 %v9260_v12, %v5287_v2  ;;  %v4220_v62 = vadd.f32 %v7800_v15, %v4150_v45  ;;  %v4221_v20 = vadd.f32 %v7800_v15, %v4151_v10 }
 0x3b5   :  { %v5492_v43 = vmul.f32 %v5275_v63, %v9090_v38  ;;  %vm5293_vm0 = vweird.f32 %v9260_v12  ;;  %v5297_v52 = vmul.f32 %v6848_v39, %v9245_v33  ;;  %6849 = vrsqrt.f32 %v9277_v11 }
 0x3b6   :  { %v5285_v59 = vsel %vm5284_vm4, %v6844_v40, %v5281_v23  ;;  %v5289_v60 = vmul.f32 0.5, %v5288_v44  ;;  %v4667_v1 = vadd.f32 %v4666_v4, %v4665_v18  ;;  %v4670_v17 = vrot.slane %v4346_v57, 4  ;;  %vm5294_vm6 = vmor %vm5292_vm3, %vm5293_vm0 }
 0x3b7   :  { %v5493_v51 = vmul.f32 %v5285_v59, %v9100_v53  ;;  %v5298_v34 = vmul.f32 %v6848_v39, %v5297_v52  ;;  %v9292_v49 = vmax.f32 %v4219_v22, 0.0  ;;  %v9294_v42 = vmax.f32 %v4220_v62, 0.0 }
 0x3b8   :  { %v5290_v38 = vsub.f32 1.5, %v5289_v60  ;;  %v4668_v16 = vrot.slane %v4667_v1, 1  ;;  %v4671_v0 = vadd.f32 %v4670_v17, %v4346_v57  ;;  %v9296_v48 = vmax.f32 %v4221_v20, 0.0 }
 0x3b9   :  { %v5533_v36 = vpack.c.bf16 %v5493_v51, %v5492_v43  ;;  %v5299_v7 = vmul.f32 0.5, %v5298_v34  ;;  %v4347_v40 = vmul.f32 %v9292_v49, %v9292_v49  ;;  %v4348_v58 = vmul.f32 %v9294_v42, %v9294_v42  ;;  %v9335_v51 = vpop.f32.mrf.mxu3 }
 0x3ba   :  { %v5291_v53 = vmul.f32 %v9260_v12, %v5290_v38  ;;  %vm5303_vm5 = vweird.f32 %v6848_v39  ;;  %v4669_v30 = vadd.f32 %v4668_v16, %v4667_v1  ;;  %v4672_v21 = vrot.slane %v4671_v0, 2 }
 0x3bb   :  { %v9303_v6 = vpop.eup %6849  ;;  %5565 = vst [vmem:[#allocation7 + $0xb8] sm:$0xff] %v5533_v36  ;;  %v5300_v47 = vsub.f32 1.5, %v5299_v7  ;;  %v4676_v54 = vrot.slane %v4347_v40, 4  ;;  %v4682_v19 = vrot.slane %v4348_v58, 4  ;;  %v4349_v45 = vmul.f32 %v9296_v48, %v9296_v48  ;;  %v4068_v36 = vpop.f32.mrf.mxu1 }
 0x3bc   :  { %v5295_v18 = vsel %vm5294_vm6, %v9260_v12, %v5291_v53  ;;  %v5307_v10 = vmul.f32 %v9303_v6, %v9277_v11  ;;  %v9318_v5 = vadd.f32 1e-06, %v4669_v30  ;;  %v4152_v50 = vadd.f32 %v9196_v13, %v8302_v61 }
 0x3bd   :  { %v5301_v63 = vmul.f32 %v6848_v39, %v5300_v47  ;;  %vm5302_vm7 = vweird.f32 %v9245_v33  ;;  %v4673_v55 = vadd.f32 %v4672_v21, %v4671_v0  ;;  %v4677_v2 = vadd.f32 %v4676_v54, %v4347_v40  ;;  %v4055_v0 = vpop.f32.mrf.mxu0  ;;  %v9777_v40 = vld [vmem:[#allocation52_spill] sm:$0xff] }
 0x3be   :  { %v5494_v26 = vmul.f32 %v5295_v18, %v9133_v3  ;;  %vm5304_vm1 = vmor %vm5302_vm7, %vm5303_vm5  ;;  %v5308_v4 = vmul.f32 %v9303_v6, %v5307_v10  ;;  %6851 = vrsqrt.f32 %v9318_v5  ;;  %v4683_v12 = vadd.f32 %v4682_v19, %v4348_v58 }
 0x3bf   :  { %v5305_v57 = vsel %vm5304_vm1, %v6848_v39, %v5301_v63  ;;  %v4674_v22 = vrot.slane %v4673_v55, 1  ;;  %v4678_v23 = vrot.slane %v4677_v2, 2  ;;  %v4688_v44 = vrot.slane %v4349_v45, 4  ;;  %v9333_v39 = vpop.f32.mrf.mxu2 }
 0x3c0   :  { %v5495_v61 = vmul.f32 %v5305_v57, %v9146_v14  ;;  %v5309_v13 = vmul.f32 0.5, %v5308_v4  ;;  %v4684_v62 = vrot.slane %v4683_v12, 2  ;;  %v4222_v33 = vadd.f32 %v7800_v15, %v4152_v50 }
 0x3c1   :  { %v4675_v20 = vadd.f32 %v4674_v22, %v4673_v55  ;;  %v4679_v43 = vadd.f32 %v4678_v23, %v4677_v2  ;;  %v4689_v3 = vadd.f32 %v4688_v44, %v4349_v45  ;;  %v4153_v52 = vadd.f32 %v9198_v56, %v8701_v27  ;;  %v9778_v27 = vld [vmem:[#allocation94_spill] sm:$0xff]  ;;  %v4094_v44 = vpop.f32.mrf.mxu3 }
 0x3c2   :  { %v5534_v59 = vpack.c.bf16 %v5495_v61, %v5494_v26  ;;  %v5310_v60 = vsub.f32 1.5, %v5309_v13  ;;  %v4685_v1 = vadd.f32 %v4684_v62, %v4683_v12  ;;  %v9331_v17 = vmax.f32 %v4222_v33, 0.0 }
 0x3c3   :  { %v9337_v14 = vadd.f32 1e-06, %v4675_v20  ;;  %v4680_v34 = vrot.slane %v4679_v43, 1  ;;  %v4690_v38 = vrot.slane %v4689_v3, 2  ;;  %v4223_v16 = vadd.f32 %v7800_v15, %v4153_v52 }
 0x3c4   :  { %v6852_v7 = vpop.eup %6851  ;;  %v9342_v56 = vadd.f32 %v9778_v27, %v9777_v40  ;;  %5566 = vst [vmem:[#allocation7 + $0xc0] sm:$0xff] %v5534_v59  ;;  %v4686_v58 = vrot.slane %v4685_v1, 1  ;;  %v4350_v53 = vmul.f32 %v9331_v17, %v9331_v17  ;;  %v4154_v30 = vadd.f32 %v9229_v24, %v8719_v8 }
 0x3c5   :  { %vm5312_vm8 = vweird.f32 %v9277_v11  ;;  %vm5313_vm9 = vweird.f32 %v9303_v6  ;;  %v5317_v21 = vmul.f32 %v6852_v7, %v9318_v5  ;;  %6853 = vrsqrt.f32 %v9337_v14 }
 0x3c6   :  { %v5311_v47 = vmul.f32 %v9303_v6, %v5310_v60  ;;  %v4681_v54 = vadd.f32 %v4680_v34, %v4679_v43  ;;  %v4687_v19 = vadd.f32 %v4686_v58, %v4685_v1  ;;  %v4691_v45 = vadd.f32 %v4690_v38, %v4689_v3  ;;  %vm9365_vm11 = vmor %vm5312_vm8, %vm5313_vm9 }
 0x3c7   :  { %v5318_v18 = vmul.f32 %v6852_v7, %v5317_v21  ;;  %vm5322_vm10 = vweird.f32 %v9318_v5  ;;  %v4694_v10 = vrot.slane %v4350_v53, 4  ;;  %v9354_v50 = vmax.f32 %v4223_v16, 0.0  ;;  %v4081_v23 = vpop.f32.mrf.mxu2 }
 0x3c8   :  { %v9356_v8 = vadd.f32 1e-06, %v4681_v54  ;;  %v9358_v24 = vadd.f32 1e-06, %v4687_v19  ;;  %v4692_v63 = vrot.slane %v4691_v45, 1  ;;  %v4224_v55 = vadd.f32 %v7800_v15, %v4154_v30 }
 0x3c9   :  { %v5319_v26 = vmul.f32 0.5, %v5318_v18  ;;  %v4695_v4 = vadd.f32 %v4694_v10, %v4350_v53  ;;  %v4351_v12 = vmul.f32 %v9354_v50, %v9354_v50  ;;  %v4155_v57 = vadd.f32 %v9236_v37, %v8864_v32 }
 0x3ca   :  { %v5315_v22 = vsel %vm9365_vm11, %v9303_v6, %v5311_v47  ;;  %vm5323_vm12 = vweird.f32 %v6852_v7  ;;  %6855 = vrsqrt.f32 %v9356_v8  ;;  %v4693_v11 = vadd.f32 %v4692_v63, %v4691_v45 }
 0x3cb   :  { %v9377_v61 = vpop.eup %6853  ;;  %v5320_v13 = vsub.f32 1.5, %v5319_v26  ;;  %6857 = vrsqrt.f32 %v9358_v24  ;;  %v4696_v62 = vrot.slane %v4695_v4, 2  ;;  %v4700_v33 = vrot.slane %v4351_v12, 4  ;;  %vm5324_vm14 = vmor %vm5322_vm10, %vm5323_vm12 }
 0x3cc   :  { %v5327_v32 = vmul.f32 %v9377_v61, %v9337_v14  ;;  %vm5332_vm13 = vweird.f32 %v9337_v14  ;;  %v9383_v37 = vadd.f32 1e-06, %v4693_v11  ;;  %v9385_v6 = vmax.f32 %v4224_v55, 0.0 }
 0x3cd   :  { %v5321_v20 = vmul.f32 %v6852_v7, %v5320_v13  ;;  %v4697_v43 = vadd.f32 %v4696_v62, %v4695_v4  ;;  %v4701_v3 = vadd.f32 %v4700_v33, %v4351_v12  ;;  %v4225_v52 = vadd.f32 %v7800_v15, %v4155_v57 }
 0x3ce   :  { %v5496_v59 = vmul.f32 %v5315_v22, %v9187_v29  ;;  %v5328_v60 = vmul.f32 %v9377_v61, %v5327_v32  ;;  %6859 = vrsqrt.f32 %v9383_v37  ;;  %v4352_v1 = vmul.f32 %v9385_v6, %v9385_v6 }
 0x3cf   :  { %v5325_v34 = vsel %vm5324_vm14, %v6852_v7, %v5321_v20  ;;  %v4698_v38 = vrot.slane %v4697_v43, 1  ;;  %v4702_v16 = vrot.slane %v4701_v3, 2  ;;  %v9396_v0 = vmax.f32 %v4225_v52, 0.0 }
 0x3d0   :  { %v6856_v36 = vpop.eup %6855  ;;  %v5497_v40 = vmul.f32 %v5325_v34, %v9232_v25  ;;  %v5329_v29 = vmul.f32 0.5, %v5328_v60  ;;  %v4706_v27 = vrot.slane %v4352_v1, 4  ;;  %v4156_v5 = vadd.f32 %v9311_v41, %v8899_v9 }
 0x3d1   :  { %v6858_v58 = vpop.eup %6857  ;;  %v5337_v53 = vmul.f32 %v6856_v36, %v9356_v8  ;;  %vm5342_vm15 = vweird.f32 %v9356_v8  ;;  %v4699_v30 = vadd.f32 %v4698_v38, %v4697_v43  ;;  %v4703_v21 = vadd.f32 %v4702_v16, %v4701_v3 }
 0x3d2   :  { %v5535_v7 = vpack.c.bf16 %v5497_v40, %v5496_v59  ;;  %v5330_v47 = vsub.f32 1.5, %v5329_v29  ;;  %vm5333_vm2 = vweird.f32 %v9377_v61  ;;  %v5347_v54 = vmul.f32 %v6858_v58, %v9358_v24 }
 0x3d3   :  { %vm5352_vm3 = vweird.f32 %v9358_v24  ;;  %v5338_v25 = vmul.f32 %v6856_v36, %v5337_v53  ;;  %v9406_v19 = vadd.f32 1e-06, %v4699_v30  ;;  %v4704_v45 = vrot.slane %v4703_v21, 1  ;;  %vm9414_vm4 = vmor %vm5332_vm13, %vm5333_vm2 }
 0x3d4   :  { %v4707_v9 = vadd.f32 %v4706_v27, %v4352_v1  ;;  %v6860_v41 = vpop.eup %6859  ;;  %5567 = vst [vmem:[#allocation7 + $0xc8] sm:$0xff] %v5535_v7  ;;  %v5331_v18 = vmul.f32 %v9377_v61, %v5330_v47  ;;  %v5348_v10 = vmul.f32 %v6858_v58, %v5347_v54  ;;  %v4353_v63 = vmul.f32 %v9396_v0, %v9396_v0 }
 0x3d5   :  { %v4226_v55 = vadd.f32 %v7800_v15, %v4156_v5  ;;  %v5339_v26 = vmul.f32 0.5, %v5338_v25  ;;  %vm5343_vm0 = vweird.f32 %v6856_v36  ;;  %v5357_v4 = vmul.f32 %v6860_v41, %v9383_v37 }
 0x3d6   :  { %6861 = vrsqrt.f32 %v9406_v19  ;;  %v5335_v12 = vsel %vm9414_vm4, %v9377_v61, %v5331_v18  ;;  %v5349_v57 = vmul.f32 0.5, %v5348_v10  ;;  %vm5353_vm5 = vweird.f32 %v6858_v58  ;;  %vm5344_vm7 = vmor %vm5342_vm15, %vm5343_vm0 }
 0x3d7   :  { %v4705_v22 = vadd.f32 %v4704_v45, %v4703_v21  ;;  %v5340_v11 = vsub.f32 1.5, %v5339_v26  ;;  %v5358_v23 = vmul.f32 %v6860_v41, %v5357_v4  ;;  %vm5363_vm6 = vweird.f32 %v6860_v41  ;;  %vm5354_vm1 = vmor %vm5352_vm3, %vm5353_vm5  ;;  %v9783_v26 = vld [vmem:[#allocation95_spill] sm:$0xff] }
 0x3d8   :  { %v4708_v14 = vrot.slane %v4707_v9, 2  ;;  %v5350_v44 = vsub.f32 1.5, %v5349_v57  ;;  %v4712_v62 = vrot.slane %v4353_v63, 4  ;;  %v9425_v33 = vmax.f32 %v4226_v55, 0.0 }
 0x3d9   :  { %v9423_v13 = vadd.f32 1e-06, %v4705_v22  ;;  %v5498_v32 = vmul.f32 %v5335_v12, %v9254_v31  ;;  %v5341_v20 = vmul.f32 %v6856_v36, %v5340_v11  ;;  %v5359_v43 = vmul.f32 0.5, %v5358_v23 }
 0x3da   :  { %v4709_v3 = vadd.f32 %v4708_v14, %v4707_v9  ;;  %v5351_v61 = vmul.f32 %v6858_v58, %v5350_v44  ;;  %v4713_v52 = vadd.f32 %v4712_v62, %v4353_v63  ;;  %v4157_v59 = vadd.f32 %v9313_v46, %v8913_v35 }
 0x3db   :  { %6863 = vrsqrt.f32 %v9423_v13  ;;  %v5345_v1 = vsel %vm5344_vm7, %v6856_v36, %v5341_v20  ;;  %v5360_v31 = vsub.f32 1.5, %v5359_v43  ;;  %v4354_v38 = vmul.f32 %v9425_v33, %v9425_v33 }
 0x3dc   :  { %v6862_v60 = vpop.eup %6861  ;;  %v4710_v34 = vrot.slane %v4709_v3, 1  ;;  %v5499_v8 = vmul.f32 %v5345_v1, %v9292_v49  ;;  %v5355_v16 = vsel %vm5354_vm1, %v6858_v58, %v5351_v61  ;;  %vm5362_vm8 = vweird.f32 %v9383_v37 }
 0x3dd   :  { %v5367_v40 = vmul.f32 %v6862_v60, %v9406_v19  ;;  %v5500_v35 = vmul.f32 %v5355_v16, %v9294_v42  ;;  %v5361_v46 = vmul.f32 %v6860_v41, %v5360_v31  ;;  %v4714_v29 = vrot.slane %v4713_v52, 2  ;;  %vm5364_vm9 = vmor %vm5362_vm8, %vm5363_vm6 }
 0x3de   :  { %v4711_v36 = vadd.f32 %v4710_v34, %v4709_v3  ;;  %v5536_v27 = vpack.c.bf16 %v5499_v8, %v5498_v32  ;;  %v4718_v5 = vrot.slane %v4354_v38, 4  ;;  %v4227_v53 = vadd.f32 %v7800_v15, %v4157_v59 }
 0x3df   :  { %v5368_v24 = vmul.f32 %v6862_v60, %v5367_v40  ;;  %v5365_v30 = vsel %vm5364_vm9, %v6860_v41, %v5361_v46  ;;  %v4715_v49 = vadd.f32 %v4714_v29, %v4713_v52  ;;  %v4158_v37 = vadd.f32 %v9333_v39, %v9138_v28 }
 0x3e0   :  { %v9445_v21 = vadd.f32 1e-06, %v4711_v36  ;;  %5568 = vst [vmem:[#allocation7 + $0xd0] sm:$0xff] %v5536_v27  ;;  %v5501_v42 = vmul.f32 %v5365_v30, %v9296_v48  ;;  %v4719_v47 = vadd.f32 %v4718_v5, %v4354_v38  ;;  %v9450_v54 = vmax.f32 %v4227_v53, 0.0 }
 0x3e1   :  { %v6864_v58 = vpop.eup %6863  ;;  %v5369_v7 = vmul.f32 0.5, %v5368_v24  ;;  %vm5372_vm10 = vweird.f32 %v9406_v19  ;;  %vm5373_vm11 = vweird.f32 %v6862_v60  ;;  %v4716_v41 = vrot.slane %v4715_v49, 1 }
 0x3e2   :  { %v5377_v25 = vmul.f32 %v6864_v58, %v9423_v13  ;;  %6865 = vrsqrt.f32 %v9445_v21  ;;  %v5537_v45 = vpack.c.bf16 %v5501_v42, %v5500_v35  ;;  %v4720_v18 = vrot.slane %v4719_v47, 2  ;;  %vm5374_vm12 = vmor %vm5372_vm10, %vm5373_vm11 }
 0x3e3   :  { %v5370_v9 = vsub.f32 1.5, %v5369_v7  ;;  %v4355_v39 = vmul.f32 %v9450_v54, %v9450_v54  ;;  %v4228_v48 = vadd.f32 %v7800_v15, %v4158_v37  ;;  %v4159_v10 = vadd.f32 %v9335_v51, %v9342_v56  ;;  %v9784_v56 = vld [vmem:[#allocation96_spill] sm:$0xff] }
 0x3e4   :  { %v5378_v28 = vmul.f32 %v6864_v58, %v5377_v25  ;;  %5569 = vst [vmem:[#allocation7 + $0xd8] sm:$0xff] %v5537_v45  ;;  %v4717_v55 = vadd.f32 %v4716_v41, %v4715_v49  ;;  %v4721_v2 = vadd.f32 %v4720_v18, %v4719_v47  ;;  %v4166_v4 = vadd.f32 %v7800_v15, %v9783_v26 }
 0x3e5   :  { %v5371_v63 = vmul.f32 %v6862_v60, %v5370_v9  ;;  %v4724_v57 = vrot.slane %v4355_v39, 4  ;;  %v9465_v22 = vmax.f32 %v4228_v48, 0.0  ;;  %v4229_v11 = vadd.f32 %v7800_v15, %v4159_v10 }
 0x3e6   :  { %v5379_v12 = vmul.f32 0.5, %v5378_v28  ;;  %v9468_v14 = vadd.f32 1e-06, %v4717_v55  ;;  %v4722_v51 = vrot.slane %v4721_v2, 1  ;;  %v4167_v44 = vadd.f32 %v7800_v15, %v9784_v56 }
 0x3e7   :  { %v5375_v23 = vsel %vm5374_vm12, %v6862_v60, %v5371_v63  ;;  %vm5383_vm13 = vweird.f32 %v6864_v58  ;;  %v4725_v20 = vadd.f32 %v4724_v57, %v4355_v39  ;;  %v4356_v19 = vmul.f32 %v9465_v22, %v9465_v22 }
 0x3e8   :  { %v9472_v62 = vpop.eup %6865  ;;  %v5380_v32 = vsub.f32 1.5, %v5379_v12  ;;  %v5502_v43 = vmul.f32 %v5375_v23, %v9331_v17  ;;  %vm5382_vm14 = vweird.f32 %v9423_v13  ;;  %6867 = vrsqrt.f32 %v9468_v14 }
 0x3e9   :  { %v5387_v3 = vmul.f32 %v9472_v62, %v9445_v21  ;;  %v4723_v52 = vadd.f32 %v4722_v51, %v4721_v2  ;;  %v4726_v15 = vrot.slane %v4725_v20, 2  ;;  %v4730_v59 = vrot.slane %v4356_v19, 4  ;;  %vm5384_vm15 = vmor %vm5382_vm14, %vm5383_vm13 }
 0x3ea   :  { %v5381_v61 = vmul.f32 %v6864_v58, %v5380_v32  ;;  %v9482_v1 = vmax.f32 %v4229_v11, 0.0  ;;  %v9484_v31 = vmax.f32 %v4166_v4, 0.0  ;;  %v9486_v34 = vmax.f32 %v4167_v44, 0.0 }
 0x3eb   :  { %v5388_v60 = vmul.f32 %v9472_v62, %v5387_v3  ;;  %v9488_v13 = vadd.f32 1e-06, %v4723_v52  ;;  %v4727_v38 = vadd.f32 %v4726_v15, %v4725_v20  ;;  %v4731_v8 = vadd.f32 %v4730_v59, %v4356_v19 }
 0x3ec   :  { %v5385_v17 = vsel %vm5384_vm15, %v6864_v58, %v5381_v61  ;;  %v4357_v35 = vmul.f32 %v9482_v1, %v9482_v1  ;;  %v4294_v46 = vmul.f32 %v9484_v31, %v9484_v31  ;;  %v4295_v30 = vmul.f32 %v9486_v34, %v9486_v34 }
 0x3ed   :  { %v5503_v16 = vmul.f32 %v5385_v17, %v9354_v50  ;;  %v5389_v40 = vmul.f32 0.5, %v5388_v60  ;;  %6869 = vrsqrt.f32 %v9488_v13  ;;  %v4728_v36 = vrot.slane %v4727_v38, 1 }
 0x3ee   :  { %v4732_v29 = vrot.slane %v4731_v8, 2  ;;  %v6868_v27 = vpop.eup %6867  ;;  %v4736_v53 = vrot.slane %v4357_v35, 4  ;;  %vm5393_vm2 = vweird.f32 %v9472_v62  ;;  %v4358_v42 = vrot.slane %v4294_v46, 4 }
 0x3ef   :  { %v5538_v24 = vpack.c.bf16 %v5503_v16, %v5502_v43  ;;  %v5390_v5 = vsub.f32 1.5, %v5389_v40  ;;  %v5397_v50 = vmul.f32 %v6868_v27, %v9468_v14  ;;  %v4729_v49 = vadd.f32 %v4728_v36, %v4727_v38 }
 0x3f0   :  { %v4733_v37 = vadd.f32 %v4732_v29, %v4731_v8  ;;  %v4737_v58 = vadd.f32 %v4736_v53, %v4357_v35  ;;  %v4364_v7 = vrot.slane %v4295_v30, 4  ;;  %v4359_v18 = vadd.f32 %v4358_v42, %v4294_v46 }
 0x3f1   :  { %5570 = vst [vmem:[#allocation7 + $0xe0] sm:$0xff] %v5538_v24  ;;  %v5391_v47 = vmul.f32 %v9472_v62, %v5390_v5  ;;  %v5398_v25 = vmul.f32 %v6868_v27, %v5397_v50  ;;  %v9501_v45 = vadd.f32 1e-06, %v4729_v49  ;;  %vm5392_vm3 = vweird.f32 %v9445_v21 }
 0x3f2   :  { %v4734_v9 = vrot.slane %v4733_v37, 1  ;;  %v4738_v41 = vrot.slane %v4737_v58, 2  ;;  %v4365_v28 = vadd.f32 %v4364_v7, %v4295_v30  ;;  %vm9507_vm4 = vmor %vm5392_vm3, %vm5393_vm2  ;;  %vm5403_vm0 = vweird.f32 %v6868_v27 }
 0x3f3   :  { %v6870_v39 = vpop.eup %6869  ;;  %v5399_v48 = vmul.f32 0.5, %v5398_v25  ;;  %6871 = vrsqrt.f32 %v9501_v45  ;;  %v5395_v26 = vsel %vm9507_vm4, %v9472_v62, %v5391_v47  ;;  %v4360_v21 = vrot.slane %v4359_v18, 2 }
 0x3f4   :  { %v5407_v63 = vmul.f32 %v6870_v39, %v9488_v13  ;;  %v4735_v55 = vadd.f32 %v4734_v9, %v4733_v37  ;;  %v4739_v2 = vadd.f32 %v4738_v41, %v4737_v58  ;;  %v4366_v12 = vrot.slane %v4365_v28, 2 }
 0x3f5   :  { %v5400_v4 = vsub.f32 1.5, %v5399_v48  ;;  %vm5402_vm5 = vweird.f32 %v9468_v14  ;;  %v4361_v56 = vadd.f32 %v4360_v21, %v4359_v18  ;;  %v5504_v32 = vmul.f32 %v5395_v26, %v9385_v6 }
 0x3f6   :  { %v5408_v57 = vmul.f32 %v6870_v39, %v5407_v63  ;;  %v4804_v11 = vadd.f32 1e-06, %v4735_v55  ;;  %v4740_v23 = vrot.slane %v4739_v2, 1  ;;  %v4367_v44 = vadd.f32 %v4366_v12, %v4365_v28  ;;  %vm5404_vm6 = vmor %vm5402_vm5, %vm5403_vm0 }
 0x3f7   :  { %v5401_v51 = vmul.f32 %v6868_v27, %v5400_v4  ;;  %v4362_v3 = vrot.slane %v4361_v56, 1  ;;  %vm5413_vm7 = vweird.f32 %v6870_v39  ;;  %vm5412_vm1 = vweird.f32 %v9488_v13 }
 0x3f8   :  { %v5409_v20 = vmul.f32 0.5, %v5408_v57  ;;  %6873 = vrsqrt.f32 %v4804_v11  ;;  %v4741_v19 = vadd.f32 %v4740_v23, %v4739_v2  ;;  %v4368_v61 = vrot.slane %v4367_v44, 1  ;;  %vm5414_vm8 = vmor %vm5412_vm1, %vm5413_vm7 }
 0x3f9   :  { %v6872_v43 = vpop.eup %6871  ;;  %v5405_v62 = vsel %vm5404_vm6, %v6868_v27, %v5401_v51  ;;  %v4363_v14 = vadd.f32 %v4362_v3, %v4361_v56  ;;  %vm5422_vm10 = vweird.f32 %v9501_v45  ;;  %vm5432_vm13 = vweird.f32 %v4804_v11 }
 0x3fa   :  { %v5505_v52 = vmul.f32 %v5405_v62, %v9396_v0  ;;  %v5410_v15 = vsub.f32 1.5, %v5409_v20  ;;  %v5417_v59 = vmul.f32 %v6872_v43, %v9501_v45  ;;  %v4805_v60 = vadd.f32 1e-06, %v4741_v19 }
 0x3fb   :  { %v4369_v17 = vadd.f32 %v4368_v61, %v4367_v44  ;;  %v4742_v16 = vadd.f32 1e-06, %v4363_v14  ;;  %vm5423_vm9 = vweird.f32 %v6872_v43 }
 0x3fc   :  { %v5539_v38 = vpack.c.bf16 %v5505_v52, %v5504_v32  ;;  %v5411_v8 = vmul.f32 %v6870_v39, %v5410_v15  ;;  %v5418_v6 = vmul.f32 %v6872_v43, %v5417_v59  ;;  %6875 = vrsqrt.f32 %v4805_v60  ;;  %vm5424_vm11 = vmor %vm5422_vm10, %vm5423_vm9 }
 0x3fd   :  { %v4743_v40 = vadd.f32 1e-06, %v4369_v17  ;;  %6877 = vrsqrt.f32 %v4742_v16  ;;  %vm5442_vm2 = vweird.f32 %v4805_v60  ;;  %vm4812_vm5 = vweird.f32 %v4742_v16 }
 0x3fe   :  { %v6874_v35 = vpop.eup %6873  ;;  %5571 = vst [vmem:[#allocation7 + $0xe8] sm:$0xff] %v5539_v38  ;;  %v5419_v46 = vmul.f32 0.5, %v5418_v6  ;;  %v5415_v36 = vsel %vm5414_vm8, %v6870_v39, %v5411_v8 }
 0x3ff   :  { %v5427_v0 = vmul.f32 %v6874_v35, %v4804_v11  ;;  %6879 = vrsqrt.f32 %v4743_v40  ;;  %v5506_v53 = vmul.f32 %v5415_v36, %v9425_v33  ;;  %vm5433_vm12 = vweird.f32 %v6874_v35 }
 0x400   :  { %v5420_v29 = vsub.f32 1.5, %v5419_v46  ;;  %vm5434_vm14 = vmor %vm5432_vm13, %vm5433_vm12  ;;  %vm4822_vm7 = vweird.f32 %v4743_v40 }
 0x401   :  { %v5428_v27 = vmul.f32 %v6874_v35, %v5427_v0 }
 0x402   :  { %v5421_v24 = vmul.f32 %v6872_v43, %v5420_v29  ;;  %v6876_v5 = vpop.eup %6875 }
 0x403   :  { %v5429_v30 = vmul.f32 0.5, %v5428_v27  ;;  %v5437_v49 = vmul.f32 %v6876_v5, %v4805_v60  ;;  %v6878_v13 = vpop.eup %6877  ;;  %vm5443_vm15 = vweird.f32 %v6876_v5 }
 0x404   :  { %v5425_v50 = vsel %vm5424_vm11, %v6872_v43, %v5421_v24  ;;  %v4807_v47 = vmul.f32 %v6878_v13, %v4742_v16  ;;  %vm4813_vm3 = vweird.f32 %v6878_v13  ;;  %vm5444_vm4 = vmor %vm5442_vm2, %vm5443_vm15 }
 0x405   :  { %v5507_v37 = vmul.f32 %v5425_v50, %v9450_v54  ;;  %v5430_v58 = vsub.f32 1.5, %v5429_v30  ;;  %v6880_v42 = vpop.eup %6879  ;;  %v5438_v7 = vmul.f32 %v6876_v5, %v5437_v49  ;;  %vm4814_vm6 = vmor %vm4812_vm5, %vm4813_vm3 }
 0x406   :  { %v4817_v41 = vmul.f32 %v6880_v42, %v4743_v40  ;;  %v4808_v18 = vmul.f32 %v6878_v13, %v4807_v47  ;;  %vm4823_vm0 = vweird.f32 %v6880_v42 }
 0x407   :  { %v5540_v25 = vpack.c.bf16 %v5507_v37, %v5506_v53  ;;  %v5431_v9 = vmul.f32 %v6874_v35, %v5430_v58  ;;  %v5439_v45 = vmul.f32 0.5, %v5438_v7  ;;  %vm4824_vm1 = vmor %vm4822_vm7, %vm4823_vm0 }
 0x408   :  { %v4818_v33 = vmul.f32 %v6880_v42, %v4817_v41  ;;  %v4809_v48 = vmul.f32 0.5, %v4808_v18 }
 0x409   :  { %5572 = vst [vmem:[#allocation7 + $0xf0] sm:$0xff] %v5540_v25  ;;  %v5435_v28 = vsel %vm5434_vm14, %v6874_v35, %v5431_v9  ;;  %v5440_v39 = vsub.f32 1.5, %v5439_v45 }
 0x40a   :  { %v4819_v10 = vmul.f32 0.5, %v4818_v33  ;;  %v4810_v63 = vsub.f32 1.5, %v4809_v48  ;;  %v5508_v55 = vmul.f32 %v5435_v28, %v9465_v22 }
 0x40b   :  { %v5441_v54 = vmul.f32 %v6876_v5, %v5440_v39 }
 0x40c   :  { %v4820_v2 = vsub.f32 1.5, %v4819_v10  ;;  %v4811_v4 = vmul.f32 %v6878_v13, %v4810_v63 }
 0x40d   :  { %v5445_v26 = vsel %vm5444_vm4, %v6876_v5, %v5441_v54 }
 0x40e   :  { %v5509_v21 = vmul.f32 %v5445_v26, %v9482_v1  ;;  %v4821_v12 = vmul.f32 %v6880_v42, %v4820_v2  ;;  %v4815_v57 = vsel %vm4814_vm6, %v6878_v13, %v4811_v4 }
 0x40f   :  { %v5446_v51 = vmul.f32 %v4815_v57, %v9484_v31 }
 0x410   :  { %v5541_v11 = vpack.c.bf16 %v5509_v21, %v5508_v55  ;;  %v4825_v23 = vsel %vm4824_vm1, %v6880_v42, %v4821_v12 }
 0x411   :  { %v5447_v22 = vmul.f32 %v4825_v23, %v9486_v34 }
 0x412   :  { %5573 = vst [vmem:[#allocation7 + $0xf8] sm:$0xff] %v5541_v11 }
 0x413   :  { %v5510_v56 = vpack.c.bf16 %v5447_v22, %v5446_v51 }
 0x415   :  { %5542 = vst [vmem:[#allocation7] sm:$0xff] %v5510_v56 }
 0x416   :  { %5584 = dma.vmem_to_hbm [thread:$0]  %s5580_s26, 4096, %s5582_s29, [#allocation4]  }
 0x417   :  { %6959 = dma.done.wait [#allocation4], 4096  }
 0x418   :  { %6960 = vsyncadd [#allocation4], 4294963200 }
 0x419   :  { %5589 = vsyncpa [#allocation3], 1 }
 0x41a   :  { %5590 = vsyncpa [#allocation6], 1 }
 0x41b   :  { %5591 = vsyncpa [#allocation4], 1 }

</bundles_post_ra>
